<compile_context>
chip_gen: v5e
topology: v5e:2x2
jax: 0.10.0
libtpu: 0.0.40
codegen_flags: <defaults>
</compile_context>

<pallas_src>
import jax
import jax.numpy as jnp
from jax.experimental import pallas as pl
from jax.experimental.pallas import tpu as pltpu


# layout: PyTorch reference is NCHW.  The kernel operates per (batch, HW-tile)
# on blocks with the flattened coarse grid (H*W) as the last (lane) dimension:
#   mask_unf : (N, 9, s*s, HW)   9 = 3x3 neighbourhood weights, s*s = 64 subpixels
#   flow_unf : (N, 2, 9,   HW)   zero-padded 3x3-unfolded (scale * flow)
#   out      : (N, 2, s*s, HW)
# NCHW <-> this layout (unfold, final pixel-shuffle to (N,2,8H,8W)) is JAX glue.


def _upsample_kernel(mask_ref, flow_ref, out_ref):
    # mask_ref: (9, s*s, T)  f32  -- pre-softmax 3x3 convex weights
    # flow_ref: (2, 9,   T)  f32  -- 3x3-unfolded scale*flow
    # out_ref : (2, s*s, T)  f32
    uf = flow_ref[...]                                   # tiny (2,9,T) tile

    # running max over the 9 neighbourhood logits (streamed from VMEM ref)
    m_max = mask_ref[0]
    for k in range(1, 9):
        m_max = jnp.maximum(m_max, mask_ref[k])          # (s*s, T)

    # single pass: exp, denom, and both channel accumulators (unrolled FMAs);
    # normalization is deferred to the 2-channel output.
    denom = jnp.zeros_like(m_max)
    acc0 = jnp.zeros_like(m_max)
    acc1 = jnp.zeros_like(m_max)
    for k in range(9):
        ek = jnp.exp(mask_ref[k] - m_max)                # (s*s, T)
        denom = denom + ek
        acc0 = acc0 + ek * uf[0, k:k + 1, :]             # (1,T) bcast over sublanes
        acc1 = acc1 + ek * uf[1, k:k + 1, :]

    inv = pl.reciprocal(denom, approx=False)             # exact: parity with softmax ref
    out_ref[0] = (acc0 * inv).astype(out_ref.dtype)
    out_ref[1] = (acc1 * inv).astype(out_ref.dtype)


def upsample_flow(flow, mask, scale=8, hw_tile_cap=512):
    """Pallas version of TMA.upsample_flow.

    flow: (N, 2, H, W) float32   (coarse flow, e.g. coords1 - coords0)
    mask: (N, 9*scale*scale, H, W) float32  (upmask from the update block)
    returns (N, 2, scale*H, scale*W) float32
    """
    N, _, H, W = flow.shape
    s = scale
    HW = H * W

    # mask.view(N, 1, 9, s, s, H, W): channel c = k*s*s + i*s + j
    # TODO(synk): feed bf16 mask here on v6e/v7x (bf16 VPU/EUP) to halve HBM traffic.
    mask_unf = mask.reshape(N, 9, s * s, HW).astype(jnp.float32)

    # F.unfold(scale*flow, [3,3], padding=1): neighbour k = ky*3 + kx,
    # offsets (ky-1, kx-1), zero padding.
    fpad = jnp.pad(s * flow.astype(jnp.float32), ((0, 0), (0, 0), (1, 1), (1, 1)))
    nbrs = [fpad[:, :, ky:ky + H, kx:kx + W] for ky in range(3) for kx in range(3)]
    flow_unf = jnp.stack(nbrs, axis=2).reshape(N, 2, 9, HW)   # (N, 2, 9, HW)

    # Tile the flattened HW (lane) dimension: tile is a multiple of 128,
    # capped so each mask tile is ~1 MiB (fits comfortably on v5e/v6e/v7x).
    LANE = 128
    hw128 = ((HW + LANE - 1) // LANE) * LANE
    hw_t = min(hw128, hw_tile_cap)
    hw_pad = ((HW + hw_t - 1) // hw_t) * hw_t
    if hw_pad != HW:
        pad = ((0, 0), (0, 0), (0, 0), (0, hw_pad - HW))
        mask_unf = jnp.pad(mask_unf, pad)
        flow_unf = jnp.pad(flow_unf, pad)

    grid = (N, hw_pad // hw_t)

    out = pl.pallas_call(
        _upsample_kernel,
        out_shape=jax.ShapeDtypeStruct((N, 2, s * s, hw_pad), jnp.float32),
        grid_spec=pltpu.PrefetchScalarGridSpec(
            num_scalar_prefetch=0,
            grid=grid,
            in_specs=[
                pl.BlockSpec((pl.Squeezed(), 9, s * s, hw_t),
                             lambda n, t: (n, 0, 0, t)),
                pl.BlockSpec((pl.Squeezed(), 2, 9, hw_t),
                             lambda n, t: (n, 0, 0, t)),
            ],
            out_specs=pl.BlockSpec((pl.Squeezed(), 2, s * s, hw_t),
                                   lambda n, t: (n, 0, 0, t)),
        ),
        compiler_params=pltpu.CompilerParams(
            dimension_semantics=("parallel", "parallel")),
    )(mask_unf, flow_unf)

    out = out[..., :HW]
    # Pixel shuffle: (N,2,s*s,HW) -> (N,2,s,s,H,W) -> (N,2,H,s,W,s) -> (N,2,sH,sW)
    # TODO(synk): could be fused into the kernel's output layout; kept as XLA
    # glue (single transpose-copy) for clarity.
    out = out.reshape(N, 2, s, s, H, W)
    out = jnp.transpose(out, (0, 1, 4, 2, 5, 3))
    return out.reshape(N, 2, s * H, s * W)


def upsample_flow_ref(flow, mask, scale=8):
    """Pure-JAX reference mirroring the PyTorch code exactly (for validation)."""
    N, _, H, W = flow.shape
    s = scale
    m = mask.reshape(N, 1, 9, s, s, H, W)
    m = jax.nn.softmax(m, axis=2)
    fpad = jnp.pad(s * flow, ((0, 0), (0, 0), (1, 1), (1, 1)))
    nbrs = [fpad[:, :, ky:ky + H, kx:kx + W] for ky in range(3) for kx in range(3)]
    up_flow = jnp.stack(nbrs, axis=2).reshape(N, 2, 9, 1, 1, H, W)
    up = jnp.sum(m * up_flow, axis=2)                 # (N,2,s,s,H,W)
    up = jnp.transpose(up, (0, 1, 4, 2, 5, 3))        # (N,2,H,s,W,s)
    return up.reshape(N, 2, s * H, s * W)


if __name__ == "__main__":
    # Small shapes consistent with TMA.forward: the update block operates at
    # 1/8 resolution, so a 128x128 input gives a 16x16 coarse grid.
    N, H, W, scale = 2, 16, 16, 8

    key = jax.random.PRNGKey(0)
    k_flow, k_mask = jax.random.split(key)
    flow = jax.random.normal(k_flow, (N, 2, H, W), dtype=jnp.float32)       # coords1 - coords0
    upmask = jax.random.normal(k_mask, (N, 9 * scale * scale, H, W), dtype=jnp.float32)

    out = upsample_flow(flow, upmask, scale=scale)
    out = jax.block_until_ready(out)

    ref = jax.block_until_ready(upsample_flow_ref(flow, upmask, scale=scale))
    assert out.shape == (N, 2, scale * H, scale * W)
    assert jnp.allclose(out, ref, atol=1e-5, rtol=1e-5), "mismatch vs reference"

    print("KERNEL_OK")
</pallas_src>

<mosaic_0001>
module attributes {stable_mosaic.version = 11 : i64} {
  func.func @_upsample_kernel(%arg0: i32, %arg1: i32, %arg2: memref<1x9x64x256xf32, #tpu.memory_space<vmem>>, %arg3: memref<1x2x9x256xf32, #tpu.memory_space<vmem>>, %arg4: memref<1x2x64x256xf32, #tpu.memory_space<vmem>>) attributes {dimension_semantics = [#tpu.dimension_semantics<parallel>, #tpu.dimension_semantics<parallel>], iteration_bounds = array<i64: 2, 1>, scalar_prefetch = 0 : i64, scratch_operands = 0 : i64, tpu.core_type = #tpu.core_type<tc>, window_params = [{transform_indices = @transform_0, window_bounds = array<i64: 1, 9, 64, 256>}, {transform_indices = @transform_1, window_bounds = array<i64: 1, 2, 9, 256>}, {transform_indices = @transform_2, window_bounds = array<i64: 1, 2, 64, 256>}]} {
    %c0 = arith.constant 0 : index
    %c0_0 = arith.constant 0 : index
    %c0_1 = arith.constant 0 : index
    %c0_2 = arith.constant 0 : index
    %0 = vector.load %arg3[%c0, %c0_0, %c0_1, %c0_2] : memref<1x2x9x256xf32, #tpu.memory_space<vmem>>, vector<1x2x9x256xf32>
    %1 = vector.shape_cast %0 : vector<1x2x9x256xf32> to vector<2x9x256xf32>
    %c0_3 = arith.constant 0 : index
    %c0_4 = arith.constant 0 : index
    %c0_5 = arith.constant 0 : index
    %c0_6 = arith.constant 0 : index
    %2 = vector.load %arg2[%c0_3, %c0_4, %c0_5, %c0_6] : memref<1x9x64x256xf32, #tpu.memory_space<vmem>>, vector<1x1x64x256xf32>
    %3 = vector.shape_cast %2 : vector<1x1x64x256xf32> to vector<64x256xf32>
    %c0_7 = arith.constant 0 : index
    %c1 = arith.constant 1 : index
    %c0_8 = arith.constant 0 : index
    %c0_9 = arith.constant 0 : index
    %4 = vector.load %arg2[%c0_7, %c1, %c0_8, %c0_9] : memref<1x9x64x256xf32, #tpu.memory_space<vmem>>, vector<1x1x64x256xf32>
    %5 = vector.shape_cast %4 : vector<1x1x64x256xf32> to vector<64x256xf32>
    %6 = arith.maximumf %3, %5 : vector<64x256xf32>
    %c0_10 = arith.constant 0 : index
    %c2 = arith.constant 2 : index
    %c0_11 = arith.constant 0 : index
    %c0_12 = arith.constant 0 : index
    %7 = vector.load %arg2[%c0_10, %c2, %c0_11, %c0_12] : memref<1x9x64x256xf32, #tpu.memory_space<vmem>>, vector<1x1x64x256xf32>
    %8 = vector.shape_cast %7 : vector<1x1x64x256xf32> to vector<64x256xf32>
    %9 = arith.maximumf %6, %8 : vector<64x256xf32>
    %c0_13 = arith.constant 0 : index
    %c3 = arith.constant 3 : index
    %c0_14 = arith.constant 0 : index
    %c0_15 = arith.constant 0 : index
    %10 = vector.load %arg2[%c0_13, %c3, %c0_14, %c0_15] : memref<1x9x64x256xf32, #tpu.memory_space<vmem>>, vector<1x1x64x256xf32>
    %11 = vector.shape_cast %10 : vector<1x1x64x256xf32> to vector<64x256xf32>
    %12 = arith.maximumf %9, %11 : vector<64x256xf32>
    %c0_16 = arith.constant 0 : index
    %c4 = arith.constant 4 : index
    %c0_17 = arith.constant 0 : index
    %c0_18 = arith.constant 0 : index
    %13 = vector.load %arg2[%c0_16, %c4, %c0_17, %c0_18] : memref<1x9x64x256xf32, #tpu.memory_space<vmem>>, vector<1x1x64x256xf32>
    %14 = vector.shape_cast %13 : vector<1x1x64x256xf32> to vector<64x256xf32>
    %15 = arith.maximumf %12, %14 : vector<64x256xf32>
    %c0_19 = arith.constant 0 : index
    %c5 = arith.constant 5 : index
    %c0_20 = arith.constant 0 : index
    %c0_21 = arith.constant 0 : index
    %16 = vector.load %arg2[%c0_19, %c5, %c0_20, %c0_21] : memref<1x9x64x256xf32, #tpu.memory_space<vmem>>, vector<1x1x64x256xf32>
    %17 = vector.shape_cast %16 : vector<1x1x64x256xf32> to vector<64x256xf32>
    %18 = arith.maximumf %15, %17 : vector<64x256xf32>
    %c0_22 = arith.constant 0 : index
    %c6 = arith.constant 6 : index
    %c0_23 = arith.constant 0 : index
    %c0_24 = arith.constant 0 : index
    %19 = vector.load %arg2[%c0_22, %c6, %c0_23, %c0_24] : memref<1x9x64x256xf32, #tpu.memory_space<vmem>>, vector<1x1x64x256xf32>
    %20 = vector.shape_cast %19 : vector<1x1x64x256xf32> to vector<64x256xf32>
    %21 = arith.maximumf %18, %20 : vector<64x256xf32>
    %c0_25 = arith.constant 0 : index
    %c7 = arith.constant 7 : index
    %c0_26 = arith.constant 0 : index
    %c0_27 = arith.constant 0 : index
    %22 = vector.load %arg2[%c0_25, %c7, %c0_26, %c0_27] : memref<1x9x64x256xf32, #tpu.memory_space<vmem>>, vector<1x1x64x256xf32>
    %23 = vector.shape_cast %22 : vector<1x1x64x256xf32> to vector<64x256xf32>
    %24 = arith.maximumf %21, %23 : vector<64x256xf32>
    %c0_28 = arith.constant 0 : index
    %c8 = arith.constant 8 : index
    %c0_29 = arith.constant 0 : index
    %c0_30 = arith.constant 0 : index
    %25 = vector.load %arg2[%c0_28, %c8, %c0_29, %c0_30] : memref<1x9x64x256xf32, #tpu.memory_space<vmem>>, vector<1x1x64x256xf32>
    %26 = vector.shape_cast %25 : vector<1x1x64x256xf32> to vector<64x256xf32>
    %27 = arith.maximumf %24, %26 : vector<64x256xf32>
    %cst = arith.constant 0.000000e+00 : f32
    %28 = vector.broadcast %cst : f32 to vector<64x256xf32>
    %cst_31 = arith.constant 0.000000e+00 : f32
    %29 = vector.broadcast %cst_31 : f32 to vector<64x256xf32>
    %cst_32 = arith.constant 0.000000e+00 : f32
    %30 = vector.broadcast %cst_32 : f32 to vector<64x256xf32>
    %c0_33 = arith.constant 0 : index
    %c0_34 = arith.constant 0 : index
    %c0_35 = arith.constant 0 : index
    %c0_36 = arith.constant 0 : index
    %31 = vector.load %arg2[%c0_33, %c0_34, %c0_35, %c0_36] : memref<1x9x64x256xf32, #tpu.memory_space<vmem>>, vector<1x1x64x256xf32>
    %32 = vector.shape_cast %31 : vector<1x1x64x256xf32> to vector<64x256xf32>
    %33 = arith.subf %32, %27 : vector<64x256xf32>
    %34 = math.exp %33 : vector<64x256xf32>
    %35 = arith.addf %28, %34 : vector<64x256xf32>
    %36 = vector.extract_strided_slice %1 {offsets = [0, 0, 0], sizes = [1, 1, 256], strides = [1, 1, 1]} : vector<2x9x256xf32> to vector<1x1x256xf32>
    %37 = vector.shape_cast %36 : vector<1x1x256xf32> to vector<1x256xf32>
    %38 = vector.broadcast %37 : vector<1x256xf32> to vector<64x256xf32>
    %39 = arith.mulf %34, %38 : vector<64x256xf32>
    %40 = arith.addf %29, %39 : vector<64x256xf32>
    %41 = vector.extract_strided_slice %1 {offsets = [1, 0, 0], sizes = [1, 1, 256], strides = [1, 1, 1]} : vector<2x9x256xf32> to vector<1x1x256xf32>
    %42 = vector.shape_cast %41 : vector<1x1x256xf32> to vector<1x256xf32>
    %43 = vector.broadcast %42 : vector<1x256xf32> to vector<64x256xf32>
    %44 = arith.mulf %34, %43 : vector<64x256xf32>
    %45 = arith.addf %30, %44 : vector<64x256xf32>
    %c0_37 = arith.constant 0 : index
    %c1_38 = arith.constant 1 : index
    %c0_39 = arith.constant 0 : index
    %c0_40 = arith.constant 0 : index
    %46 = vector.load %arg2[%c0_37, %c1_38, %c0_39, %c0_40] : memref<1x9x64x256xf32, #tpu.memory_space<vmem>>, vector<1x1x64x256xf32>
    %47 = vector.shape_cast %46 : vector<1x1x64x256xf32> to vector<64x256xf32>
    %48 = arith.subf %47, %27 : vector<64x256xf32>
    %49 = math.exp %48 : vector<64x256xf32>
    %50 = arith.addf %35, %49 : vector<64x256xf32>
    %51 = vector.extract_strided_slice %1 {offsets = [0, 1, 0], sizes = [1, 1, 256], strides = [1, 1, 1]} : vector<2x9x256xf32> to vector<1x1x256xf32>
    %52 = vector.shape_cast %51 : vector<1x1x256xf32> to vector<1x256xf32>
    %53 = vector.broadcast %52 : vector<1x256xf32> to vector<64x256xf32>
    %54 = arith.mulf %49, %53 : vector<64x256xf32>
    %55 = arith.addf %40, %54 : vector<64x256xf32>
    %56 = vector.extract_strided_slice %1 {offsets = [1, 1, 0], sizes = [1, 1, 256], strides = [1, 1, 1]} : vector<2x9x256xf32> to vector<1x1x256xf32>
    %57 = vector.shape_cast %56 : vector<1x1x256xf32> to vector<1x256xf32>
    %58 = vector.broadcast %57 : vector<1x256xf32> to vector<64x256xf32>
    %59 = arith.mulf %49, %58 : vector<64x256xf32>
    %60 = arith.addf %45, %59 : vector<64x256xf32>
    %c0_41 = arith.constant 0 : index
    %c2_42 = arith.constant 2 : index
    %c0_43 = arith.constant 0 : index
    %c0_44 = arith.constant 0 : index
    %61 = vector.load %arg2[%c0_41, %c2_42, %c0_43, %c0_44] : memref<1x9x64x256xf32, #tpu.memory_space<vmem>>, vector<1x1x64x256xf32>
    %62 = vector.shape_cast %61 : vector<1x1x64x256xf32> to vector<64x256xf32>
    %63 = arith.subf %62, %27 : vector<64x256xf32>
    %64 = math.exp %63 : vector<64x256xf32>
    %65 = arith.addf %50, %64 : vector<64x256xf32>
    %66 = vector.extract_strided_slice %1 {offsets = [0, 2, 0], sizes = [1, 1, 256], strides = [1, 1, 1]} : vector<2x9x256xf32> to vector<1x1x256xf32>
    %67 = vector.shape_cast %66 : vector<1x1x256xf32> to vector<1x256xf32>
    %68 = vector.broadcast %67 : vector<1x256xf32> to vector<64x256xf32>
    %69 = arith.mulf %64, %68 : vector<64x256xf32>
    %70 = arith.addf %55, %69 : vector<64x256xf32>
    %71 = vector.extract_strided_slice %1 {offsets = [1, 2, 0], sizes = [1, 1, 256], strides = [1, 1, 1]} : vector<2x9x256xf32> to vector<1x1x256xf32>
    %72 = vector.shape_cast %71 : vector<1x1x256xf32> to vector<1x256xf32>
    %73 = vector.broadcast %72 : vector<1x256xf32> to vector<64x256xf32>
    %74 = arith.mulf %64, %73 : vector<64x256xf32>
    %75 = arith.addf %60, %74 : vector<64x256xf32>
    %c0_45 = arith.constant 0 : index
    %c3_46 = arith.constant 3 : index
    %c0_47 = arith.constant 0 : index
    %c0_48 = arith.constant 0 : index
    %76 = vector.load %arg2[%c0_45, %c3_46, %c0_47, %c0_48] : memref<1x9x64x256xf32, #tpu.memory_space<vmem>>, vector<1x1x64x256xf32>
    %77 = vector.shape_cast %76 : vector<1x1x64x256xf32> to vector<64x256xf32>
    %78 = arith.subf %77, %27 : vector<64x256xf32>
    %79 = math.exp %78 : vector<64x256xf32>
    %80 = arith.addf %65, %79 : vector<64x256xf32>
    %81 = vector.extract_strided_slice %1 {offsets = [0, 3, 0], sizes = [1, 1, 256], strides = [1, 1, 1]} : vector<2x9x256xf32> to vector<1x1x256xf32>
    %82 = vector.shape_cast %81 : vector<1x1x256xf32> to vector<1x256xf32>
    %83 = vector.broadcast %82 : vector<1x256xf32> to vector<64x256xf32>
    %84 = arith.mulf %79, %83 : vector<64x256xf32>
    %85 = arith.addf %70, %84 : vector<64x256xf32>
    %86 = vector.extract_strided_slice %1 {offsets = [1, 3, 0], sizes = [1, 1, 256], strides = [1, 1, 1]} : vector<2x9x256xf32> to vector<1x1x256xf32>
    %87 = vector.shape_cast %86 : vector<1x1x256xf32> to vector<1x256xf32>
    %88 = vector.broadcast %87 : vector<1x256xf32> to vector<64x256xf32>
    %89 = arith.mulf %79, %88 : vector<64x256xf32>
    %90 = arith.addf %75, %89 : vector<64x256xf32>
    %c0_49 = arith.constant 0 : index
    %c4_50 = arith.constant 4 : index
    %c0_51 = arith.constant 0 : index
    %c0_52 = arith.constant 0 : index
    %91 = vector.load %arg2[%c0_49, %c4_50, %c0_51, %c0_52] : memref<1x9x64x256xf32, #tpu.memory_space<vmem>>, vector<1x1x64x256xf32>
    %92 = vector.shape_cast %91 : vector<1x1x64x256xf32> to vector<64x256xf32>
    %93 = arith.subf %92, %27 : vector<64x256xf32>
    %94 = math.exp %93 : vector<64x256xf32>
    %95 = arith.addf %80, %94 : vector<64x256xf32>
    %96 = vector.extract_strided_slice %1 {offsets = [0, 4, 0], sizes = [1, 1, 256], strides = [1, 1, 1]} : vector<2x9x256xf32> to vector<1x1x256xf32>
    %97 = vector.shape_cast %96 : vector<1x1x256xf32> to vector<1x256xf32>
    %98 = vector.broadcast %97 : vector<1x256xf32> to vector<64x256xf32>
    %99 = arith.mulf %94, %98 : vector<64x256xf32>
    %100 = arith.addf %85, %99 : vector<64x256xf32>
    %101 = vector.extract_strided_slice %1 {offsets = [1, 4, 0], sizes = [1, 1, 256], strides = [1, 1, 1]} : vector<2x9x256xf32> to vector<1x1x256xf32>
    %102 = vector.shape_cast %101 : vector<1x1x256xf32> to vector<1x256xf32>
    %103 = vector.broadcast %102 : vector<1x256xf32> to vector<64x256xf32>
    %104 = arith.mulf %94, %103 : vector<64x256xf32>
    %105 = arith.addf %90, %104 : vector<64x256xf32>
    %c0_53 = arith.constant 0 : index
    %c5_54 = arith.constant 5 : index
    %c0_55 = arith.constant 0 : index
    %c0_56 = arith.constant 0 : index
    %106 = vector.load %arg2[%c0_53, %c5_54, %c0_55, %c0_56] : memref<1x9x64x256xf32, #tpu.memory_space<vmem>>, vector<1x1x64x256xf32>
    %107 = vector.shape_cast %106 : vector<1x1x64x256xf32> to vector<64x256xf32>
    %108 = arith.subf %107, %27 : vector<64x256xf32>
    %109 = math.exp %108 : vector<64x256xf32>
    %110 = arith.addf %95, %109 : vector<64x256xf32>
    %111 = vector.extract_strided_slice %1 {offsets = [0, 5, 0], sizes = [1, 1, 256], strides = [1, 1, 1]} : vector<2x9x256xf32> to vector<1x1x256xf32>
    %112 = vector.shape_cast %111 : vector<1x1x256xf32> to vector<1x256xf32>
    %113 = vector.broadcast %112 : vector<1x256xf32> to vector<64x256xf32>
    %114 = arith.mulf %109, %113 : vector<64x256xf32>
    %115 = arith.addf %100, %114 : vector<64x256xf32>
    %116 = vector.extract_strided_slice %1 {offsets = [1, 5, 0], sizes = [1, 1, 256], strides = [1, 1, 1]} : vector<2x9x256xf32> to vector<1x1x256xf32>
    %117 = vector.shape_cast %116 : vector<1x1x256xf32> to vector<1x256xf32>
    %118 = vector.broadcast %117 : vector<1x256xf32> to vector<64x256xf32>
    %119 = arith.mulf %109, %118 : vector<64x256xf32>
    %120 = arith.addf %105, %119 : vector<64x256xf32>
    %c0_57 = arith.constant 0 : index
    %c6_58 = arith.constant 6 : index
    %c0_59 = arith.constant 0 : index
    %c0_60 = arith.constant 0 : index
    %121 = vector.load %arg2[%c0_57, %c6_58, %c0_59, %c0_60] : memref<1x9x64x256xf32, #tpu.memory_space<vmem>>, vector<1x1x64x256xf32>
    %122 = vector.shape_cast %121 : vector<1x1x64x256xf32> to vector<64x256xf32>
    %123 = arith.subf %122, %27 : vector<64x256xf32>
    %124 = math.exp %123 : vector<64x256xf32>
    %125 = arith.addf %110, %124 : vector<64x256xf32>
    %126 = vector.extract_strided_slice %1 {offsets = [0, 6, 0], sizes = [1, 1, 256], strides = [1, 1, 1]} : vector<2x9x256xf32> to vector<1x1x256xf32>
    %127 = vector.shape_cast %126 : vector<1x1x256xf32> to vector<1x256xf32>
    %128 = vector.broadcast %127 : vector<1x256xf32> to vector<64x256xf32>
    %129 = arith.mulf %124, %128 : vector<64x256xf32>
    %130 = arith.addf %115, %129 : vector<64x256xf32>
    %131 = vector.extract_strided_slice %1 {offsets = [1, 6, 0], sizes = [1, 1, 256], strides = [1, 1, 1]} : vector<2x9x256xf32> to vector<1x1x256xf32>
    %132 = vector.shape_cast %131 : vector<1x1x256xf32> to vector<1x256xf32>
    %133 = vector.broadcast %132 : vector<1x256xf32> to vector<64x256xf32>
    %134 = arith.mulf %124, %133 : vector<64x256xf32>
    %135 = arith.addf %120, %134 : vector<64x256xf32>
    %c0_61 = arith.constant 0 : index
    %c7_62 = arith.constant 7 : index
    %c0_63 = arith.constant 0 : index
    %c0_64 = arith.constant 0 : index
    %136 = vector.load %arg2[%c0_61, %c7_62, %c0_63, %c0_64] : memref<1x9x64x256xf32, #tpu.memory_space<vmem>>, vector<1x1x64x256xf32>
    %137 = vector.shape_cast %136 : vector<1x1x64x256xf32> to vector<64x256xf32>
    %138 = arith.subf %137, %27 : vector<64x256xf32>
    %139 = math.exp %138 : vector<64x256xf32>
    %140 = arith.addf %125, %139 : vector<64x256xf32>
    %141 = vector.extract_strided_slice %1 {offsets = [0, 7, 0], sizes = [1, 1, 256], strides = [1, 1, 1]} : vector<2x9x256xf32> to vector<1x1x256xf32>
    %142 = vector.shape_cast %141 : vector<1x1x256xf32> to vector<1x256xf32>
    %143 = vector.broadcast %142 : vector<1x256xf32> to vector<64x256xf32>
    %144 = arith.mulf %139, %143 : vector<64x256xf32>
    %145 = arith.addf %130, %144 : vector<64x256xf32>
    %146 = vector.extract_strided_slice %1 {offsets = [1, 7, 0], sizes = [1, 1, 256], strides = [1, 1, 1]} : vector<2x9x256xf32> to vector<1x1x256xf32>
    %147 = vector.shape_cast %146 : vector<1x1x256xf32> to vector<1x256xf32>
    %148 = vector.broadcast %147 : vector<1x256xf32> to vector<64x256xf32>
    %149 = arith.mulf %139, %148 : vector<64x256xf32>
    %150 = arith.addf %135, %149 : vector<64x256xf32>
    %c0_65 = arith.constant 0 : index
    %c8_66 = arith.constant 8 : index
    %c0_67 = arith.constant 0 : index
    %c0_68 = arith.constant 0 : index
    %151 = vector.load %arg2[%c0_65, %c8_66, %c0_67, %c0_68] : memref<1x9x64x256xf32, #tpu.memory_space<vmem>>, vector<1x1x64x256xf32>
    %152 = vector.shape_cast %151 : vector<1x1x64x256xf32> to vector<64x256xf32>
    %153 = arith.subf %152, %27 : vector<64x256xf32>
    %154 = math.exp %153 : vector<64x256xf32>
    %155 = arith.addf %140, %154 : vector<64x256xf32>
    %156 = vector.extract_strided_slice %1 {offsets = [0, 8, 0], sizes = [1, 1, 256], strides = [1, 1, 1]} : vector<2x9x256xf32> to vector<1x1x256xf32>
    %157 = vector.shape_cast %156 : vector<1x1x256xf32> to vector<1x256xf32>
    %158 = vector.broadcast %157 : vector<1x256xf32> to vector<64x256xf32>
    %159 = arith.mulf %154, %158 : vector<64x256xf32>
    %160 = arith.addf %145, %159 : vector<64x256xf32>
    %161 = vector.extract_strided_slice %1 {offsets = [1, 8, 0], sizes = [1, 1, 256], strides = [1, 1, 1]} : vector<2x9x256xf32> to vector<1x1x256xf32>
    %162 = vector.shape_cast %161 : vector<1x1x256xf32> to vector<1x256xf32>
    %163 = vector.broadcast %162 : vector<1x256xf32> to vector<64x256xf32>
    %164 = arith.mulf %154, %163 : vector<64x256xf32>
    %165 = arith.addf %150, %164 : vector<64x256xf32>
    %166 = tpu.reciprocal %155 : vector<64x256xf32> -> vector<64x256xf32>
    %167 = arith.mulf %160, %166 : vector<64x256xf32>
    %c0_69 = arith.constant 0 : index
    %c0_70 = arith.constant 0 : index
    %c0_71 = arith.constant 0 : index
    %c0_72 = arith.constant 0 : index
    %168 = vector.load %arg4[%c0_69, %c0_70, %c0_71, %c0_72] : memref<1x2x64x256xf32, #tpu.memory_space<vmem>>, vector<1x1x64x256xf32>
    %169 = vector.shape_cast %168 : vector<1x1x64x256xf32> to vector<64x256xf32>
    %170 = vector.shape_cast %167 : vector<64x256xf32> to vector<1x1x64x256xf32>
    tpu.vector_store %arg4[%c0_69, %c0_70, %c0_71, %c0_72], %170 {strides = array<i32>} : memref<1x2x64x256xf32, #tpu.memory_space<vmem>>, vector<1x1x64x256xf32>,
    %171 = arith.mulf %165, %166 : vector<64x256xf32>
    %c0_73 = arith.constant 0 : index
    %c1_74 = arith.constant 1 : index
    %c0_75 = arith.constant 0 : index
    %c0_76 = arith.constant 0 : index
    %172 = vector.load %arg4[%c0_73, %c1_74, %c0_75, %c0_76] : memref<1x2x64x256xf32, #tpu.memory_space<vmem>>, vector<1x1x64x256xf32>
    %173 = vector.shape_cast %172 : vector<1x1x64x256xf32> to vector<64x256xf32>
    %174 = vector.shape_cast %171 : vector<64x256xf32> to vector<1x1x64x256xf32>
    tpu.vector_store %arg4[%c0_73, %c1_74, %c0_75, %c0_76], %174 {strides = array<i32>} : memref<1x2x64x256xf32, #tpu.memory_space<vmem>>, vector<1x1x64x256xf32>,
    return
  }
  func.func @transform_0(%arg0: i32, %arg1: i32) -> (i32, i32, i32, i32) {
    %c0_i32 = arith.constant 0 : i32
    %c0_i32_0 = arith.constant 0 : i32
    %c0_i32_1 = arith.constant 0 : i32
    return %arg0, %c0_i32, %c0_i32_0, %arg1 : i32, i32, i32, i32
  }
  func.func @transform_1(%arg0: i32, %arg1: i32) -> (i32, i32, i32, i32) {
    %c0_i32 = arith.constant 0 : i32
    %c0_i32_0 = arith.constant 0 : i32
    %c0_i32_1 = arith.constant 0 : i32
    return %arg0, %c0_i32, %c0_i32_0, %arg1 : i32, i32, i32, i32
  }
  func.func @transform_2(%arg0: i32, %arg1: i32) -> (i32, i32, i32, i32) {
    %c0_i32 = arith.constant 0 : i32
    %c0_i32_0 = arith.constant 0 : i32
    %c0_i32_1 = arith.constant 0 : i32
    return %arg0, %c0_i32, %c0_i32_0, %arg1 : i32, i32, i32, i32
  }
}

</mosaic_0001>

<bundles_post_ra>
// kernel: tpu_custom_call.1
= control target key start
LH: loop header
LB: loop body
LE: loop exit
PB: predicated region body
PF: predicated region fallthrough
CT: control target
= control target key end

     0   :  { %7 = vsyncpa [#allocation3], 0  ;;  %s5378_s0 = inlined_call_operand.hbm [shape: f32[2,9,64,256], index: 0, kind: input, shape index: {}]   ;;  %s5379_s1 = inlined_call_operand.vmem [shape: f32[2,2,9,256], index: 1, kind: input, shape index: {}]   ;;  %s5380_s2 = inlined_call_operand.hbm [shape: f32[2,2,64,256], index: 2, kind: output, shape index: {}]  }
   0x1   :  { %9 = vsyncpa [#allocation3 + $0x1], 0 }
   0x2   :  { %10 = vsyncpa [#allocation4], 0 }
   0x3   :  { %12 = vsyncpa [#allocation4 + $0x1], 0  ;;  %s2798_s9 = smov 0   ;;  %s2800_s10 = smov 0  }
   0x4   :  { %s2802_s11 = smov 0   ;;  %s2804_s12 = smov 0  }
   0x5   :  { %s2806_s13 = smov 0   ;;  %s2808_s14 = smov 0  }
   0x6 LB: > { %s2108_s15 = sadd.s32 4294967295, %s2777_s14   ;;  %s2109_s16 = sadd.s32 4294967294, %s2777_s14   ;;  %s2777_s14 = sphi %s2808_s14, %s18_s14   ;;  %s2773_s13 = sphi %s2806_s13, %s5916_s13   ;;  %s2769_s12 = sphi %s2804_s12, %s5915_s12   ;;  %s2765_s11 = sphi %s2802_s11, %s5914_s11   ;;  %s2761_s10 = sphi %s2800_s10, %s5913_s10   ;;  %s2757_s9 = sphi %s2798_s9, %s5912_s9  }
   0x7   : > { %s30_s17 = sadd.s32 1, %s2773_s13  ;;  %s39_s18 = sadd.s32 1, %s2765_s11 }
   0x8   : > { %p32_p0 = scmp.ge.s32.totalorder %s30_s17, 2  ;;  %p46_p1 = scmp.ne.s32.totalorder %s2765_s11, %s2761_s10 }
   0x9   : > { %p47_p2 = scmp.eq.s32.totalorder %s2777_s14, 0  ;;  %p52_p3 = scmp.ne.s32.totalorder %s2761_s10, %s2757_s9 }
   0xa   : > { %s5918_s17 = smov (%p32_p0, %s30_s17), 0  ;;  %p53_p5 = scmp.eq.s32.totalorder %s2108_s15, 0 }
   0xb   : > { %p2839_p4 = por %p47_p2, %p46_p1  ;;  %s34_s20 = ssub.s32 %s2773_s13, %s5918_s17 }
   0xc   : > { %p106_p6 = scmp.eq.s32.totalorder %s2108_s15, 1  ;;  %p37_p7 = scmp.eq.s32.totalorder %s34_s20, 0 }
   0xd   : > { %p2845_p8 = por %p53_p5, %p52_p3  ;;  %p112_p10 = scmp.eq.s32.totalorder %s2109_s16, 1 }
   0xe   : > { %p2849_p9 = por %p106_p6, %p46_p1  ;;  %p2111_p12 = scmp.ge.s32.totalorder %s2777_s14, 2 }
   0xf   : > { %s2854_s23 = scalar_select %p37_p7, %s2765_s11, %s39_s18  }
  0x10   : > { %p2856_p11 = por %p112_p10, %p52_p3  ;;  %p2283_p13 = scmp.lt.s32.totalorder %s2777_s14, 2 }
  0x11   : > { %s132_s25 = sand.u32 1, %s2765_s11   ;;  %s2269_s27 = smul.u32 1152, %s2773_s13 }
  0x12   : > { %s2268_s26 = smul.u32 1152, %s132_s25  ;;  %p2276_p0 = pnand %p2283_p13, %p2839_p4 }
  0x13   : > { %s143_s30 = scalar_lea.hbm %s5378_s0, %s2269_s27  ;;  %p2113_p1 = scmp.ge.s32.totalorder %s2777_s14, 1 }
  0x14   : > { %s136_s3 = scalar_lea.vmem [#allocation2], %s2268_s26  ;;  %s144_s5 = sshll.u32 %s143_s30, 4  ;;  %s145_s5 = int_to_ptr.hbm [resolvable:$true] %s144_s5 }
  0x15   : > { %s146_s4 = sshll.u32 %s136_s3, 4  ;;  %s133_s6 = scalar_lea.sflag [#allocation3], %s132_s25  ;;  %s147_s4 = int_to_ptr.vmem [resolvable:$true] %s146_s4 }
  0x16   : > { %s2779_s7 = smov 256   ;;  %s2780_s8 = smov 16  }
  0x17   : > { %2278 = dma.hbm_to_vmem [thread:$0]  (!%p2276_p0), %s145_s5, 18432, %s147_s4, %s133_s6, %s2779_s7, %s2779_s7, %s2780_s8  }
  0x18   : > { %p167_p2 = scmp.lt.s32.totalorder %s2777_s14, 3 }
  0x1a   : > { %p168_p3 = pnand %p2113_p1, %p167_p2 }
  0x1c   : > { %171 = sbr.rel (%p168_p3) target bundleno = 441 (0x1b9), region = 28 }
  0x21   : > { %s2872_s15 = sand.u32 1, %s2761_s10  }
  0x22   : > { %s2270_s16 = smul.u32 1152, %s2872_s15  ;;  %s174_s18 = scalar_lea.sflag [#allocation3], %s2872_s15 }
  0x24   : > { %s2876_s19 = scalar_lea.vmem [#allocation2], %s2270_s16 }
  0x25   : > { %2748 = dma.done.wait (%p2845_p8), %s174_s18, 18432  }
  0x26   : > { %2750 = vsyncadd (%p2845_p8), %s174_s18, 4294948864  ;;  %p210_p4 = scmp.lt.s32.totalorder %s2769_s12, 1  ;;  %v2890_v0 = vld [vmem:[%s2876_s19] sm:$0xff]  ;;  %v2905_v6 = vld [vmem:[%s2876_s19 + $0x8] sm:$0xff]  ;;  %s2114_s28 = sshll.u32 %s2872_s15, 8 }
  0x27   : > { %v2893_v1 = vld [vmem:[%s2876_s19 + $0x80] sm:$0xff]  ;;  %v2908_v7 = vld [vmem:[%s2876_s19 + $0x88] sm:$0xff]  ;;  %v2927_v15 = vld [vmem:[%s2876_s19 + $0x10] sm:$0xff]  ;;  %s3307_s29 = scalar_lea.vmem [#allocation5], %s2114_s28  ;;  %s2267_s30 = sshll.u32 %s2769_s12, 8 }
  0x28   : > { %s211_s20 = scalar_select %p210_p4, %s2769_s12, 1  ;;  %v2896_v2 = vld [vmem:[%s2876_s19 + $0x100] sm:$0xff]  ;;  %v261_v3 = vmax.f32 %v2890_v0, %v2893_v1  ;;  %v2911_v8 = vld [vmem:[%s2876_s19 + $0x108] sm:$0xff]  ;;  %v262_v10 = vmax.f32 %v2905_v6, %v2908_v7  ;;  %v2930_v16 = vld [vmem:[%s2876_s19 + $0x90] sm:$0xff] }
  0x29   : > { %v2901_v4 = vld [vmem:[%s2876_s19 + $0x180] sm:$0xff]  ;;  %v2923_v13 = vld [vmem:[%s2876_s19 + $0x188] sm:$0xff]  ;;  %v2933_v17 = vld [vmem:[%s2876_s19 + $0x110] sm:$0xff]  ;;  %v263_v20 = vmax.f32 %v2927_v15, %v2930_v16  ;;  %s1999_s5 = scalar_lea.hbm %s5380_s2, %s2267_s30  ;;  %s2000_s12 = sshll.u32 %s3307_s29, 4  ;;  %s2001_s12 = int_to_ptr.vmem [resolvable:$true] %s2000_s12 }
  0x2a   : > { %s2266_s25 = sshll.u32 %s211_s20, 6  ;;  %v294_v5 = vmax.f32 %v261_v3, %v2896_v2  ;;  %v2914_v9 = vld [vmem:[%s2876_s19 + $0x200] sm:$0xff]  ;;  %v295_v14 = vmax.f32 %v262_v10, %v2911_v8  ;;  %v2937_v19 = vld [vmem:[%s2876_s19 + $0x208] sm:$0xff]  ;;  %v2945_v24 = vld [vmem:[%s2876_s19 + $0x190] sm:$0xff]  ;;  %s2002_s6 = sshll.u32 %s1999_s5, 4  ;;  %s2003_s6 = int_to_ptr.hbm [resolvable:$true] %s2002_s6 }
  0x2b   : > { %s2887_s21 = scalar_lea.vmem %s5379_s1, %s2266_s25  ;;  %v2920_v12 = vld [vmem:[%s2876_s19 + $0x280] sm:$0xff]  ;;  %v2949_v26 = vld [vmem:[%s2876_s19 + $0x288] sm:$0xff]  ;;  %v296_v27 = vmax.f32 %v263_v20, %v2933_v17  ;;  %v2953_v28 = vld [vmem:[%s2876_s19 + $0x18] sm:$0xff]  ;;  %s1986_s7 = scalar_lea.sflag [#allocation4], %s2872_s15 }
  0x2c   : > { %v327_v11 = vmax.f32 %v294_v5, %v2901_v4  ;;  %v220_v21 = vld [vmem:[%s2887_s21] sm:$0xff]  ;;  %v328_v23 = vmax.f32 %v295_v14, %v2923_v13  ;;  %v2956_v29 = vld [vmem:[%s2876_s19 + $0x98] sm:$0xff]  ;;  %v2961_v32 = vld [vmem:[%s2876_s19 + $0x210] sm:$0xff]  ;;  %s2709_s8 = sshra.s32 %s2003_s6, 4  ;;  %s2715_s20 = scalar_lea.hbm %s5380_s2, 512  ;;  %s2710_s8 = int_to_ptr.hbm [resolvable:$true] %s2709_s8 }
  0x2d   : > { %v2197_v22 = vld [vmem:[%s2876_s19 + $0x300] sm:$0xff]  ;;  %v264_v33 = vmax.f32 %v2953_v28, %v2956_v29  ;;  %v2966_v34 = vld [vmem:[%s2876_s19 + $0x118] sm:$0xff]  ;;  %v2969_v36 = vld [vmem:[%s2876_s19 + $0x308] sm:$0xff]  ;;  %v329_v37 = vmax.f32 %v296_v27, %v2945_v24  ;;  %v2975_v42 = vperm.slane %v220_v21, 0  ;;  %v2989_v47 = vperm.slane %v220_v21, 1  ;;  %s2711_s16 = scalar_lea.hbm %s2710_s8, 256  ;;  %p2716_p8 = scmp.lt.s32.totalorder %s2710_s8, %s5380_s2 }
  0x2e   : > { %v360_v18 = vmax.f32 %v327_v11, %v2914_v9  ;;  %v2213_v30 = vld [vmem:[%s2876_s19 + $0x380] sm:$0xff]  ;;  %v361_v31 = vmax.f32 %v328_v23, %v2937_v19  ;;  %v2978_v43 = vld [vmem:[%s2876_s19 + $0x388] sm:$0xff]  ;;  %v2984_v45 = vld [vmem:[%s2876_s19 + $0x290] sm:$0xff]  ;;  %v2991_v48 = vperm.slane %v220_v21, 2  ;;  %v2993_v49 = vperm.slane %v220_v21, 3  ;;  %p2712_p5 = scmp.ne.s32.totalorder %s2710_s8, %s2711_s16  ;;  %p2717_p10 = scmp.lt.s32.totalorder %s2715_s20, %s2711_s16 }
  0x2f   : > { %v2229_v38 = vld [vmem:[%s2876_s19 + $0x400] sm:$0xff]  ;;  %v297_v40 = vmax.f32 %v264_v33, %v2966_v34  ;;  %v2981_v44 = vmax.f32 %v329_v37, %v2961_v32  ;;  %v2987_v46 = vld [vmem:[%s2876_s19 + $0x198] sm:$0xff]  ;;  %v2996_v52 = vperm.slane %v220_v21, 4  ;;  %v2998_v53 = vperm.slane %v220_v21, 5  ;;  %v3006_v57 = vld [vmem:[%s2876_s19 + $0x408] sm:$0xff] }
  0x30   : > { %v393_v25 = vmax.f32 %v360_v18, %v2920_v12  ;;  %v394_v39 = vmax.f32 %v361_v31, %v2949_v26  ;;  %v3000_v54 = vperm.slane %v220_v21, 6  ;;  %v3002_v55 = vperm.slane %v220_v21, 7  ;;  %v3016_v3 = vld [vmem:[%s2876_s19 + $0x218] sm:$0xff]  ;;  %v3019_v5 = vld [vmem:[%s2876_s19 + $0x20] sm:$0xff]  ;;  %p2713_p6 = pnand %p2712_p5, %p2849_p9  ;;  %p2718_p13 = por %p2717_p10, %p2716_p8 }
  0x31   : > { %v395_v58 = vmax.f32 %v2981_v44, %v2984_v45  ;;  %v330_v59 = vmax.f32 %v297_v40, %v2987_v46  ;;  %v3022_v10 = vld [vmem:[%s2876_s19 + $0xa0] sm:$0xff] }
  0x32   : > { %v426_v35 = vmax.f32 %v393_v25, %v2197_v22  ;;  %v427_v50 = vmax.f32 %v394_v39, %v2969_v36  ;;  %p2714_p7 = pneg %p2713_p6 }
  0x33   : > { %v3033_v27 = vmax.f32 %v330_v59, %v3016_v3 }
  0x34   : > { %v459_v41 = vmax.f32 %v426_v35, %v2213_v30  ;;  %v460_v56 = vmax.f32 %v427_v50, %v2978_v43  ;;  %p2719_p0 = pnand %p2718_p13, %p2714_p7 }
  0x36   : > { %v492_v51 = vmax.f32 %v459_v41, %v2229_v38 }
  0x38   : > { %v508_v60 = vsub.f32 %v2890_v0, %v492_v51  ;;  %v640_v61 = vsub.f32 %v2893_v1, %v492_v51  ;;  %v772_v62 = vsub.f32 %v2896_v2, %v492_v51  ;;  %v904_v63 = vsub.f32 %v2901_v4, %v492_v51  ;;  %v3027_v2 = vld [vmem:[%s2887_s21 + $0x8] sm:$0xff] }
  0x39   : > { %v1036_v11 = vsub.f32 %v2914_v9, %v492_v51  ;;  %v1168_v14 = vsub.f32 %v2920_v12, %v492_v51  ;;  %v1300_v18 = vsub.f32 %v2197_v22, %v492_v51  ;;  %v1432_v20 = vsub.f32 %v2213_v30, %v492_v51 }
  0x3a   : > { %v524_v0 = vmul.f32 1.442695, %v508_v60  ;;  %v656_v21 = vmul.f32 1.442695, %v640_v61  ;;  %v788_v23 = vmul.f32 1.442695, %v772_v62  ;;  %v1564_v1 = vsub.f32 %v2229_v38, %v492_v51 }
  0x3b   : > { %v920_v25 = vmul.f32 1.442695, %v904_v63  ;;  %v3030_v4 = vmax.f32 %v460_v56, %v3006_v57  ;;  %v1052_v12 = vmul.f32 1.442695, %v1036_v11  ;;  %v1184_v22 = vmul.f32 1.442695, %v1168_v14 }
  0x3c   : > { %2341 = vpow2.f32 %v524_v0  ;;  %v1316_v30 = vmul.f32 1.442695, %v1300_v18  ;;  %v1448_v31 = vmul.f32 1.442695, %v1432_v20  ;;  %v1580_v37 = vmul.f32 1.442695, %v1564_v1 }
  0x3d   : > { %2343 = vpow2.f32 %v656_v21  ;;  %v509_v33 = vsub.f32 %v2905_v6, %v3030_v4  ;;  %v641_v35 = vsub.f32 %v2908_v7, %v3030_v4  ;;  %v3042_v38 = vperm.slane %v3027_v2, 0 }
  0x3e   : > { %2345 = vpow2.f32 %v788_v23  ;;  %v773_v39 = vsub.f32 %v2911_v8, %v3030_v4  ;;  %v3047_v40 = vperm.slane %v3027_v2, 1  ;;  %v3050_v41 = vperm.slane %v3027_v2, 2 }
  0x3f   : > { %2347 = vpow2.f32 %v920_v25  ;;  %v905_v6 = vsub.f32 %v2923_v13, %v3030_v4  ;;  %v526_v7 = vmul.f32 1.442695, %v509_v33  ;;  %v658_v50 = vmul.f32 1.442695, %v641_v35  ;;  %v3098_v33 = vld [vmem:[%s2887_s21 + $0x10] ss:$0 sm:$0xff] }
  0x40   : > { %2349 = vpow2.f32 %v1052_v12  ;;  %v1037_v51 = vsub.f32 %v2937_v19, %v3030_v4  ;;  %v790_v56 = vmul.f32 1.442695, %v773_v39  ;;  %v3057_v8 = vperm.slane %v3027_v2, 3 }
  0x41   : > { %2351 = vpow2.f32 %v1184_v22  ;;  %v1169_v59 = vsub.f32 %v2949_v26, %v3030_v4  ;;  %v922_v61 = vmul.f32 1.442695, %v905_v6  ;;  %v3064_v13 = vperm.slane %v3027_v2, 4 }
  0x42   : > { %v3061_v60 = vpop.eup %2341  ;;  %2353 = vpow2.f32 %v1316_v30  ;;  %v1301_v62 = vsub.f32 %v2969_v36, %v3030_v4  ;;  %v1054_v11 = vmul.f32 1.442695, %v1037_v51  ;;  %v1433_v26 = vsub.f32 %v2978_v43, %v3030_v4  ;;  %v3093_v30 = vld [vmem:[%s2876_s19 + $0x310] sm:$0xff] }
  0x43   : > { %5540 = vst [vmem:[#allocation8_spill] sm:$0xff] %v3061_v60  ;;  %v3068_v63 = vpop.eup %2343  ;;  %v574_v19 = vmul.f32 %v3061_v60, %v2975_v42  ;;  %2355 = vpow2.f32 %v1448_v31  ;;  %v3081_v20 = vperm.slane %v3027_v2, 5  ;;  %v1186_v43 = vmul.f32 1.442695, %v1169_v59  ;;  %v3111_v59 = vld [vmem:[%s2876_s19 + $0x390] sm:$0xff] }
  0x44   : > { %5541 = vst [vmem:[#allocation9_spill] sm:$0xff] %v3068_v63  ;;  %v3074_v14 = vpop.eup %2345  ;;  %v688_v18 = vadd.f32 %v3068_v63, %v3061_v60  ;;  %v706_v36 = vmul.f32 %v3068_v63, %v2989_v47  ;;  %2357 = vpow2.f32 %v1580_v37  ;;  %v1318_v23 = vmul.f32 1.442695, %v1301_v62 }
  0x45   : > { %5542 = vst [vmem:[#allocation10_spill] sm:$0xff] %v3074_v14  ;;  %v3083_v0 = vpop.eup %2347  ;;  %v838_v21 = vmul.f32 %v3074_v14, %v2991_v48  ;;  %2359 = vpow2.f32 %v526_v7  ;;  %v3101_v35 = vperm.slane %v3027_v2, 6  ;;  %v1450_v37 = vmul.f32 1.442695, %v1433_v26 }
  0x46   : > { %5543 = vst [vmem:[#allocation11_spill] sm:$0xff] %v3083_v0  ;;  %v3087_v1 = vpop.eup %2349  ;;  %v722_v25 = vadd.f32 %v706_v36, %v574_v19  ;;  %v820_v12 = vadd.f32 %v3074_v14, %v688_v18  ;;  %v970_v22 = vmul.f32 %v3083_v0, %v2993_v49  ;;  %2361 = vpow2.f32 %v658_v50  ;;  %v3463_v14 = vld [vmem:[%s2876_s19 + $0x1b8] sm:$0xff] }
  0x47   : > { %5544 = vst [vmem:[#allocation12_spill] sm:$0xff] %v3087_v1  ;;  %v3095_v31 = vpop.eup %2351  ;;  %2363 = vpow2.f32 %v790_v56  ;;  %v1565_v39 = vsub.f32 %v3006_v57, %v3030_v4  ;;  %v1102_v51 = vmul.f32 %v3087_v1, %v2996_v52  ;;  %v3120_v4 = vperm.slane %v3027_v2, 7 }
  0x48   : > { %5545 = vst [vmem:[#allocation13_spill] sm:$0xff] %v3095_v31  ;;  %v3105_v6 = vpop.eup %2353  ;;  %v854_v7 = vadd.f32 %v838_v21, %v722_v25  ;;  %v952_v50 = vadd.f32 %v3083_v0, %v820_v12  ;;  %2365 = vpow2.f32 %v922_v61  ;;  %v1234_v62 = vmul.f32 %v3095_v31, %v2998_v53  ;;  %v3130_v21 = vld [vmem:[%s2876_s19 + $0x410] sm:$0xff] }
  0x49   : > { %5546 = vst [vmem:[#allocation14_spill] sm:$0xff] %v3101_v35  ;;  %v3113_v56 = vpop.eup %2355  ;;  %v1366_v57 = vmul.f32 %v3105_v6, %v3000_v54  ;;  %v428_v19 = vmax.f32 %v395_v58, %v3093_v30  ;;  %2367 = vpow2.f32 %v1054_v11  ;;  %v1582_v36 = vmul.f32 1.442695, %v1565_v39  ;;  %v3140_v58 = vld [vmem:[%s2876_s19 + $0x298] sm:$0xff] }
  0x4a   : > { %5547 = vst [vmem:[#allocation15_spill] sm:$0xff] %v3105_v6  ;;  %v3126_v61 = vpop.eup %2357  ;;  %v986_v26 = vadd.f32 %v970_v22, %v854_v7  ;;  %v1084_v18 = vadd.f32 %v3087_v1, %v952_v50  ;;  %v1498_v2 = vmul.f32 %v3113_v56, %v3002_v55  ;;  %2369 = vpow2.f32 %v1186_v43 }
  0x4b   : > { %5548 = vst [vmem:[#allocation16_spill] sm:$0xff] %v3113_v56  ;;  %v3132_v25 = vpop.eup %2359  ;;  %v1630_v12 = vmul.f32 %v3126_v61, %v3098_v33  ;;  %v461_v44 = vmax.f32 %v428_v19, %v3111_v59  ;;  %2371 = vpow2.f32 %v1318_v23 }
  0x4c   : > { %5549 = vst [vmem:[#allocation17_spill] sm:$0xff] %v3126_v61  ;;  %v3142_v22 = vpop.eup %2361  ;;  %v1118_v7 = vadd.f32 %v1102_v51, %v986_v26  ;;  %v1216_v11 = vadd.f32 %v3095_v31, %v1084_v18  ;;  %v575_v39 = vmul.f32 %v3132_v25, %v3042_v38  ;;  %2373 = vpow2.f32 %v1450_v37 }
  0x4d   : > { %5550 = vst [vmem:[#allocation18_spill] sm:$0xff] %v3132_v25  ;;  %v3147_v50 = vpop.eup %2363  ;;  %v689_v9 = vadd.f32 %v3142_v22, %v3132_v25  ;;  %v707_v43 = vmul.f32 %v3142_v22, %v3047_v40  ;;  %v3154_v19 = vmax.f32 %v461_v44, %v3130_v21  ;;  %v396_v31 = vmax.f32 %v3033_v27, %v3140_v58 }
  0x4e   : > { %5551 = vst [vmem:[#allocation19_spill] sm:$0xff] %v3142_v22  ;;  %v3156_v51 = vpop.eup %2365  ;;  %v1250_v26 = vadd.f32 %v1234_v62, %v1118_v7  ;;  %v1348_v18 = vadd.f32 %v3105_v6, %v1216_v11  ;;  %v839_v23 = vmul.f32 %v3147_v50, %v3050_v41  ;;  %v3169_v22 = vld [vmem:[%s2876_s19 + $0x318] sm:$0xff]  ;;  %2375 = vpow2.f32 %v1582_v36 }
  0x4f   : > { %5552 = vst [vmem:[#allocation20_spill] sm:$0xff] %v3147_v50  ;;  %v723_v1 = vadd.f32 %v707_v43, %v575_v39  ;;  %v821_v25 = vadd.f32 %v3147_v50, %v689_v9  ;;  %v971_v37 = vmul.f32 %v3156_v51, %v3057_v8  ;;  %v510_v44 = vsub.f32 %v2927_v15, %v3154_v19  ;;  %v3171_v62 = vpop.eup %2367 }
  0x50   : > { %5553 = vst [vmem:[#allocation21_spill] sm:$0xff] %v3156_v51  ;;  %v1382_v7 = vadd.f32 %v1366_v57, %v1250_v26  ;;  %v1480_v11 = vadd.f32 %v3113_v56, %v1348_v18  ;;  %v642_v27 = vsub.f32 %v2930_v16, %v3154_v19  ;;  %v3176_v39 = vpop.eup %2369  ;;  %v1103_v15 = vmul.f32 %v3171_v62, %v3064_v13  ;;  %v3460_v56 = vld [vmem:[%s2876_s19 + $0x230] sm:$0xff] }
  0x51   : > { %5554 = vst [vmem:[#allocation22_spill] sm:$0xff] %v3171_v62  ;;  %v855_v9 = vadd.f32 %v839_v23, %v723_v1  ;;  %v953_v43 = vadd.f32 %v3156_v51, %v821_v25  ;;  %v528_v50 = vmul.f32 1.442695, %v510_v44  ;;  %v3181_v6 = vpop.eup %2371  ;;  %v429_v26 = vmax.f32 %v396_v31, %v3169_v22  ;;  %v3193_v23 = vld [vmem:[%s2887_s21 + $0x18] ss:$0 sm:$0xff] }
  0x52   : > { %5555 = vst [vmem:[#allocation23_spill] sm:$0xff] %v3176_v39  ;;  %v1514_v0 = vadd.f32 %v1498_v2, %v1382_v7  ;;  %v3184_v57 = vadd.f32 %v3126_v61, %v1480_v11  ;;  %v660_v36 = vmul.f32 1.442695, %v642_v27  ;;  %v3187_v18 = vpop.eup %2373  ;;  %v1235_v25 = vmul.f32 %v3176_v39, %v3081_v20  ;;  %v3245_v51 = vld [vmem:[%s2876_s19 + $0x418] sm:$0xff]  ;;  %v3457_v61 = vld [vmem:[%s2876_s19 + $0x228] sm:$0xff] }
  0x53   : > { %5556 = vst [vmem:[#allocation24_spill] sm:$0xff] %v3181_v6  ;;  %v987_v16 = vadd.f32 %v971_v37, %v855_v9  ;;  %v1085_v1 = vadd.f32 %v3171_v62, %v953_v43  ;;  %2377 = vpow2.f32 %v528_v50  ;;  %v1367_v2 = vmul.f32 %v3181_v6, %v3101_v35 }
  0x54   : > { %5557 = vst [vmem:[#allocation25_spill] sm:$0xff] %v3187_v18  ;;  %v3195_v44 = vadd.f32 %v1630_v12, %v1514_v0  ;;  %2379 = vrcp.f32 %v3184_v57  ;;  %v1499_v31 = vmul.f32 %v3187_v18, %v3120_v4  ;;  %vm1701_vm0 = vweird.f32 %v3184_v57  ;;  %v3205_v27 = vpop.eup %2375 }
  0x55   : > { %v1705_v37 = vand.u32 2147483647, %v3184_v57  ;;  %v1119_v7 = vadd.f32 %v1103_v15, %v987_v16  ;;  %v1217_v11 = vadd.f32 %v3176_v39, %v1085_v1  ;;  %5558 = vst [vmem:[#allocation26_spill] sm:$0xff] %v3205_v27  ;;  %v1707_v0 = vand.u32 2147483648, %v3184_v57 }
  0x56   : > { %2381 = vpow2.f32 %v660_v36  ;;  %v774_v12 = vsub.f32 %v2933_v17, %v3154_v19  ;;  %v906_v50 = vsub.f32 %v2945_v24, %v3154_v19  ;;  %v1631_v15 = vmul.f32 %v3205_v27, %v3193_v23  ;;  %5588 = vst [vmem:[#allocation47_spill] sm:$0xff] %v3460_v56 }
  0x57   : > { %v1251_v9 = vadd.f32 %v1235_v25, %v1119_v7  ;;  %v1349_v43 = vadd.f32 %v3181_v6, %v1217_v11  ;;  %v1038_v16 = vsub.f32 %v2961_v32, %v3154_v19  ;;  %v1170_v36 = vsub.f32 %v2984_v45, %v3154_v19  ;;  %v3231_v11 = vld [vmem:[%s2876_s19 + $0x398] sm:$0xff]  ;;  %5589 = vst [vmem:[#allocation48_spill] sm:$0xff] %v3463_v14 }
  0x58   : > { %v792_v1 = vmul.f32 1.442695, %v774_v12  ;;  %v924_v39 = vmul.f32 1.442695, %v906_v50  ;;  %v1302_v17 = vsub.f32 %v3093_v30, %v3154_v19  ;;  %vm3223_vm1 = vcmp.eq.f32.partialorder %v1705_v37, 8.507059e+37 }
  0x59   : > { %v3221_v62 = vpop.eup %2377  ;;  %v1383_v25 = vadd.f32 %v1367_v2, %v1251_v9  ;;  %v1481_v7 = vadd.f32 %v3187_v18, %v1349_v43  ;;  %v1434_v32 = vsub.f32 %v3111_v59, %v3154_v19  ;;  %v1708_v45 = vor.u32 1.1754944e-38, %v1707_v0 }
  0x5a   : > { %5559 = vst [vmem:[#allocation27_spill] sm:$0xff] %v3221_v62  ;;  %v2380_v12 = vpop.eup %2379  ;;  %v576_v30 = vmul.f32 %v3221_v62, %v2975_v42  ;;  %2383 = vpow2.f32 %v792_v1  ;;  %v1056_v50 = vmul.f32 1.442695, %v1038_v16  ;;  %v1188_v9 = vmul.f32 1.442695, %v1170_v36 }
  0x5b   : > { %v1697_v37 = vmul.f32 %v2380_v12, %v3184_v57  ;;  %v1515_v6 = vadd.f32 %v1499_v31, %v1383_v25  ;;  %v3237_v2 = vadd.f32 %v3205_v27, %v1481_v7  ;;  %2385 = vpow2.f32 %v924_v39 }
  0x5c   : > { %v3239_v43 = vpop.eup %2381  ;;  %v1320_v59 = vmul.f32 1.442695, %v1302_v17  ;;  %v1566_v18 = vsub.f32 %v3130_v21, %v3154_v19  ;;  %v462_v0 = vmax.f32 %v429_v26, %v3231_v11  ;;  %vm1702_vm2 = vweird.f32 %v2380_v12 }
  0x5d   : > { %5562 = vst [vmem:[#allocation28_spill] sm:$0xff] %v3239_v43  ;;  %v1698_v1 = vsub.f32 1.0, %v1697_v37  ;;  %2387 = vrcp.f32 %v3237_v2  ;;  %v1452_v31 = vmul.f32 1.442695, %v1434_v32  ;;  %v3248_v16 = vadd.f32 %v1631_v15, %v1515_v6  ;;  %vm3263_vm4 = vmor %vm1701_vm0, %vm1702_vm2 }
  0x5e   : > { %v1719_v36 = vand.u32 2147483647, %v3237_v2  ;;  %v690_v39 = vadd.f32 %v3239_v43, %v3221_v62  ;;  %v708_v21 = vmul.f32 %v3239_v43, %v2989_v47  ;;  %vm1715_vm3 = vweird.f32 %v3237_v2 }
  0x5f   : > { %v1699_v19 = vmul.f32 %v2380_v12, %v1698_v1  ;;  %2389 = vpow2.f32 %v1056_v50  ;;  %v3257_v26 = vmax.f32 %v462_v0, %v3245_v51  ;;  %v1721_v15 = vand.u32 2147483648, %v3237_v2 }
  0x60   : > { %v3259_v17 = vpop.eup %2383  ;;  %v724_v25 = vadd.f32 %v708_v21, %v576_v30  ;;  %2391 = vpow2.f32 %v1188_v9  ;;  %v1584_v7 = vmul.f32 1.442695, %v1566_v18  ;;  %vm3274_vm5 = vcmp.eq.f32.partialorder %v1719_v36, 8.507059e+37 }
  0x61   : > { %5563 = vst [vmem:[#allocation29_spill] sm:$0xff] %v3259_v17  ;;  %v1700_v32 = vadd.f32 %v2380_v12, %v1699_v19  ;;  %v822_v50 = vadd.f32 %v3259_v17, %v690_v39  ;;  %v840_v37 = vmul.f32 %v3259_v17, %v2991_v48  ;;  %2393 = vpow2.f32 %v1320_v59  ;;  %v3272_v0 = vpop.eup %2385  ;;  %v3444_v17 = vld [vmem:[%s2876_s19 + $0x138] sm:$0xff] }
  0x62   : > { %5566 = vst [vmem:[#allocation30_spill] sm:$0xff] %v3272_v0  ;;  %2395 = vpow2.f32 %v1452_v31  ;;  %v511_v30 = vsub.f32 %v2953_v28, %v3257_v26  ;;  %v643_v18 = vsub.f32 %v2956_v29, %v3257_v26  ;;  %v775_v9 = vsub.f32 %v2966_v34, %v3257_v26 }
  0x63   : > { %v2388_v1 = vpop.eup %2387  ;;  %v1704_v59 = vsel %vm3263_vm4, %v2380_v12, %v1700_v32  ;;  %v856_v39 = vadd.f32 %v840_v37, %v724_v25  ;;  %v954_v36 = vadd.f32 %v3272_v0, %v822_v50  ;;  %v972_v21 = vmul.f32 %v3272_v0, %v2993_v49  ;;  %5587 = vst [vmem:[#allocation46_spill] sm:$0xff] %v3444_v17 }
  0x64   : > { %v3291_v28 = vsel %vm3223_vm1, %v1708_v45, %v1704_v59  ;;  %v1711_v29 = vmul.f32 %v2388_v1, %v3237_v2  ;;  %vm1716_vm6 = vweird.f32 %v2388_v1  ;;  %2397 = vpow2.f32 %v1584_v7 }
  0x65   : > { %5569 = vst [vmem:[#allocation31_spill] sm:$0xff] %v3291_v28  ;;  %v3294_v34 = vpop.eup %2389  ;;  %v1920_v12 = vmul.f32 %v3291_v28, %v3195_v44  ;;  %v988_v31 = vadd.f32 %v972_v21, %v856_v39  ;;  %v530_v19 = vmul.f32 1.442695, %v511_v30  ;;  %v662_v6 = vmul.f32 1.442695, %v643_v18  ;;  %vm3324_vm7 = vmor %vm1715_vm3, %vm1716_vm6 }
  0x66   : > { %5570 = vst [vmem:[#allocation32_spill] sm:$0xff] %v3294_v34  ;;  %v3298_v25 = vpop.eup %2391  ;;  %v1712_v32 = vsub.f32 1.0, %v1711_v29  ;;  %v1086_v24 = vadd.f32 %v3294_v34, %v954_v36  ;;  %v1104_v45 = vmul.f32 %v3294_v34, %v2996_v52  ;;  %v794_v50 = vmul.f32 1.442695, %v775_v9 }
  0x67   : > { %5571 = vst [vmem:[#allocation33_spill] sm:$0xff] %v3298_v25  ;;  %v3303_v37 = vpop.eup %2393  ;;  %v1236_v44 = vmul.f32 %v3298_v25, %v2998_v53  ;;  %2399 = vpow2.f32 %v530_v19  ;;  %v907_v7 = vsub.f32 %v2987_v46, %v3257_v26  ;;  %v1039_v30 = vsub.f32 %v3016_v3, %v3257_v26 }
  0x68   : > { %5572 = vst [vmem:[#allocation34_spill] sm:$0xff] %v3303_v37  ;;  %v3316_v18 = vpop.eup %2395  ;;  %v1713_v9 = vmul.f32 %v2388_v1, %v1712_v32  ;;  %v1120_v59 = vadd.f32 %v1104_v45, %v988_v31  ;;  %v1218_v39 = vadd.f32 %v3298_v25, %v1086_v24  ;;  %v1368_v36 = vmul.f32 %v3303_v37, %v3000_v54 }
  0x69   : > { %1936 = vst [vmem:[%s3307_s29] sm:$0xff] %v1920_v12  ;;  %v1722_v46 = vor.u32 1.1754944e-38, %v1721_v15  ;;  %2401 = vpow2.f32 %v662_v6  ;;  %v926_v29 = vmul.f32 1.442695, %v907_v7  ;;  %v1058_v3 = vmul.f32 1.442695, %v1039_v30 }
  0x6a   : > { %5573 = vst [vmem:[#allocation35_spill] sm:$0xff] %v3316_v18  ;;  %v3328_v12 = vpop.eup %2397  ;;  %v1714_v19 = vadd.f32 %v2388_v1, %v1713_v9  ;;  %v1252_v31 = vadd.f32 %v1236_v44, %v1120_v59  ;;  %v1350_v32 = vadd.f32 %v3303_v37, %v1218_v39  ;;  %2403 = vpow2.f32 %v794_v50 }
  0x6b   : > { %5576 = vst [vmem:[#allocation36_spill] sm:$0xff] %v3328_v12  ;;  %v1500_v24 = vmul.f32 %v3316_v18, %v3002_v55  ;;  %2405 = vpow2.f32 %v926_v29  ;;  %v1171_v2 = vsub.f32 %v3140_v58, %v3257_v26  ;;  %v1303_v15 = vsub.f32 %v3169_v22, %v3257_v26  ;;  %v3349_v22 = vld [vmem:[%s2876_s19 + $0x120] sm:$0xff] }
  0x6c   : > { %v1718_v6 = vsel %vm3324_vm7, %v2388_v1, %v1714_v19  ;;  %v1384_v45 = vadd.f32 %v1368_v36, %v1252_v31  ;;  %v1482_v7 = vadd.f32 %v3316_v18, %v1350_v32  ;;  %2407 = vpow2.f32 %v1058_v3  ;;  %v3377_v19 = vld [vmem:[%s2876_s19 + $0x1a0] sm:$0xff]  ;;  %v3380_v31 = vld [vmem:[%s2876_s19 + $0x28] sm:$0xff] }
  0x6d   : > { %v3340_v44 = vpop.eup %2399  ;;  %v3344_v50 = vsel %vm3274_vm5, %v1722_v46, %v1718_v6  ;;  %v1190_v30 = vmul.f32 1.442695, %v1171_v2  ;;  %v1435_v58 = vsub.f32 %v3231_v11, %v3257_v26  ;;  %v1322_v59 = vmul.f32 1.442695, %v1303_v15  ;;  %v3395_v15 = vld [vmem:[%s2876_s19 + $0x30] sm:$0xff] }
  0x6e   : > { %5577 = vst [vmem:[#allocation37_spill] sm:$0xff] %v3340_v44  ;;  %v1921_v1 = vmul.f32 %v3344_v50, %v3248_v16  ;;  %v3354_v9 = vadd.f32 %v3328_v12, %v1482_v7  ;;  %v3360_v57 = vmul.f32 %v3328_v12, %v3098_v33  ;;  %v577_v11 = vmul.f32 %v3340_v44, %v3042_v38  ;;  %v3398_v6 = vld [vmem:[%s2876_s19 + $0xb0] sm:$0xff] }
  0x6f   : > { %5578 = vst [vmem:[#allocation38_spill] sm:$0xff] %v3344_v50  ;;  %v3356_v39 = vpop.eup %2401  ;;  %2409 = vpow2.f32 %v1190_v30  ;;  %v1567_v36 = vsub.f32 %v3245_v51, %v3257_v26  ;;  %v3369_v21 = vadd.f32 %v1500_v24, %v1384_v45  ;;  %v1454_v46 = vmul.f32 1.442695, %v1435_v58  ;;  %v3383_v51 = vld [vmem:[%s2876_s19 + $0xa8] sm:$0xff]  ;;  %v3401_v45 = vld [vmem:[%s2876_s19 + $0x38] sm:$0xff] }
  0x70   : > { %5579 = vst [vmem:[#allocation39_spill] sm:$0xff] %v3356_v39  ;;  %v3366_v16 = vpop.eup %2403  ;;  %2411 = vrcp.f32 %v3354_v9  ;;  %v5581_v29 = vmax.f32 %v3019_v5, %v3022_v10  ;;  %vm1729_vm8 = vweird.f32 %v3354_v9  ;;  %v691_v32 = vadd.f32 %v3356_v39, %v3340_v44  ;;  %v3419_v44 = vld [vmem:[%s2876_s19 + $0x128] sm:$0xff] }
  0x71   : > { %5580 = vst [vmem:[#allocation40_spill] sm:$0xff] %v3366_v16  ;;  %v3385_v26 = vpop.eup %2405  ;;  %v709_v24 = vmul.f32 %v3356_v39, %v3047_v40  ;;  %v841_v2 = vmul.f32 %v3366_v16, %v3050_v41  ;;  %v1733_v30 = vand.u32 2147483647, %v3354_v9  ;;  %v1735_v58 = vand.u32 2147483648, %v3354_v9  ;;  %v3416_v39 = vld [vmem:[%s2876_s19 + $0x220] sm:$0xff] }
  0x72   : > { %1937 = vst [vmem:[%s3307_s29 + $0x8] sm:$0xff] %v1921_v1  ;;  %v298_v3 = vmax.f32 %v5581_v29, %v3349_v22  ;;  %v3403_v7 = vpop.eup %2407  ;;  %2413 = vpow2.f32 %v1322_v59  ;;  %v1586_v1 = vmul.f32 1.442695, %v1567_v36  ;;  %v3408_v29 = vld [vmem:[%s2876_s19 + $0xb8] sm:$0xff]  ;;  %v823_v12 = vadd.f32 %v3366_v16, %v691_v32  ;;  %v3422_v59 = vld [vmem:[%s2876_s19 + $0x130] sm:$0xff]  ;;  %v3426_v36 = vld [vmem:[%s2876_s19 + $0x2a0] sm:$0xff] }
  0x73   : > { %5582 = vst [vmem:[#allocation41_spill] sm:$0xff] %v3385_v26  ;;  %v725_v50 = vadd.f32 %v709_v24, %v577_v11  ;;  %v973_v18 = vmul.f32 %v3385_v26, %v3057_v8  ;;  %v1105_v37 = vmul.f32 %v3403_v7, %v3064_v13  ;;  %2415 = vpow2.f32 %v1454_v46  ;;  %v3436_v46 = vld [vmem:[%s2876_s19 + $0x1a8] sm:$0xff] }
  0x74   : > { %5583 = vst [vmem:[#allocation42_spill] sm:$0xff] %v3401_v45  ;;  %v331_v11 = vmax.f32 %v298_v3, %v3377_v19  ;;  %v266_v32 = vmax.f32 %v3380_v31, %v3383_v51  ;;  %v267_v24 = vmax.f32 %v3395_v15, %v3398_v6  ;;  %v955_v34 = vadd.f32 %v3385_v26, %v823_v12  ;;  %v3439_v3 = vld [vmem:[%s2876_s19 + $0x1b0] sm:$0xff]  ;;  %v3450_v12 = vld [vmem:[%s2876_s19 + $0x320] sm:$0xff] }
  0x75   : > { %5584 = vst [vmem:[#allocation43_spill] sm:$0xff] %v3403_v7  ;;  %v3432_v16 = vpop.eup %2409  ;;  %v857_v25 = vadd.f32 %v841_v2, %v725_v50  ;;  %2417 = vpow2.f32 %v1586_v1  ;;  %v268_v0 = vmax.f32 %v3401_v45, %v3408_v29  ;;  %vm3507_vm11 = vcmp.eq.f32.partialorder %v1733_v30, 8.507059e+37 }
  0x76   : > { %5585 = vst [vmem:[#allocation44_spill] sm:$0xff] %v3408_v29  ;;  %v2412_v43 = vpop.eup %2411  ;;  %v1237_v27 = vmul.f32 %v3432_v16, %v3081_v20  ;;  %v364_v50 = vmax.f32 %v331_v11, %v3416_v39  ;;  %v299_v2 = vmax.f32 %v266_v32, %v3419_v44  ;;  %v300_v1 = vmax.f32 %v267_v24, %v3422_v59  ;;  %v3475_v29 = vld [vmem:[%s2876_s19 + $0x3a0] sm:$0xff] }
  0x77   : > { %5586 = vst [vmem:[#allocation45_spill] sm:$0xff] %v3432_v16  ;;  %v1725_v26 = vmul.f32 %v2412_v43, %v3354_v9  ;;  %vm1730_vm9 = vweird.f32 %v2412_v43  ;;  %v989_v62 = vadd.f32 %v973_v18, %v857_v25  ;;  %v1087_v28 = vadd.f32 %v3403_v7, %v955_v34 }
  0x78   : > { %v3465_v11 = vpop.eup %2413  ;;  %v397_v32 = vmax.f32 %v364_v50, %v3426_v36  ;;  %v332_v24 = vmax.f32 %v299_v2, %v3436_v46  ;;  %v333_v63 = vmax.f32 %v300_v1, %v3439_v3  ;;  %v301_v25 = vmax.f32 %v268_v0, %v3444_v17  ;;  %v3482_v1 = vld [vmem:[%s2876_s19 + $0x2a8] sm:$0xff]  ;;  %vm3503_vm10 = vmor %vm1729_vm8, %vm1730_vm9 }
  0x79   : > { %5590 = vst [vmem:[#allocation49_spill] sm:$0xff] %v3465_v11  ;;  %v1726_v18 = vsub.f32 1.0, %v1725_v26  ;;  %v1121_v34 = vadd.f32 %v1105_v37, %v989_v62  ;;  %v1219_v7 = vadd.f32 %v3432_v16, %v1087_v28  ;;  %v1369_v60 = vmul.f32 %v3465_v11, %v3101_v35  ;;  %v3477_v45 = vpop.eup %2415  ;;  %v3486_v26 = vld [vmem:[%s2876_s19 + $0x2b0] sm:$0xff]  ;;  %v3493_v35 = vld [vmem:[%s2876_s19 + $0x420] sm:$0xff] }
  0x7a   : > { %5591 = vst [vmem:[#allocation50_spill] sm:$0xff] %v3477_v45  ;;  %v430_v50 = vmax.f32 %v397_v32, %v3450_v12  ;;  %v365_v2 = vmax.f32 %v332_v24, %v3457_v61  ;;  %v366_v0 = vmax.f32 %v333_v63, %v3460_v56  ;;  %v334_v62 = vmax.f32 %v301_v25, %v3463_v14  ;;  %v3496_v32 = vld [vmem:[%s2876_s19 + $0x238] sm:$0xff]  ;;  %v3519_v14 = vld [vmem:[%s2876_s19 + $0x328] sm:$0xff]  ;;  %v3522_v56 = vld [vmem:[%s2876_s19 + $0x330] sm:$0xff] }
  0x7b   : > { %v3489_v28 = vpop.eup %2417  ;;  %v1727_v37 = vmul.f32 %v2412_v43, %v1726_v18  ;;  %v1253_v16 = vadd.f32 %v1237_v27, %v1121_v34  ;;  %v1351_v17 = vadd.f32 %v3465_v11, %v1219_v7  ;;  %v1648_v24 = vadd.f32 %v3360_v57, %v3369_v21 }
  0x7c   : > { %5592 = vst [vmem:[#allocation51_spill] sm:$0xff] %v3489_v28  ;;  %v1736_v7 = vor.u32 1.1754944e-38, %v1735_v58  ;;  %v463_v25 = vmax.f32 %v430_v50, %v3475_v29  ;;  %v398_v57 = vmax.f32 %v365_v2, %v3482_v1  ;;  %v399_v21 = vmax.f32 %v366_v0, %v3486_v26 }
  0x7d   : > { %v1728_v18 = vadd.f32 %v2412_v43, %v1727_v37  ;;  %v1483_v34 = vadd.f32 %v3477_v45, %v1351_v17  ;;  %v1385_v9 = vadd.f32 %v1369_v60, %v1253_v16  ;;  %v1501_v11 = vmul.f32 %v3477_v45, %v3120_v4  ;;  %v3535_v16 = vld [vmem:[%s2876_s19 + $0x2b8] sm:$0xff]  ;;  %v3981_v45 = vld [vmem:[%s2876_s19 + $0x3c0] sm:$0xff] }
  0x7e   : > { %v496_v30 = vmax.f32 %v463_v25, %v3493_v35  ;;  %v3525_v58 = vmax.f32 %v334_v62, %v3496_v32  ;;  %v1633_v60 = vmul.f32 %v3489_v28, %v3193_v23  ;;  %v431_v63 = vmax.f32 %v398_v57, %v3519_v14 }
  0x7f   : > { %v1732_v17 = vsel %vm3503_vm10, %v2412_v43, %v1728_v18  ;;  %v3530_v50 = vadd.f32 %v3489_v28, %v1483_v34  ;;  %v3548_v25 = vmax.f32 %v399_v21, %v3522_v56  ;;  %v1517_v18 = vadd.f32 %v1501_v11, %v1385_v9 }
  0x80   : > { %v3539_v2 = vsel %vm3507_vm11, %v1736_v7, %v1732_v17  ;;  %v512_v0 = vsub.f32 %v3019_v5, %v496_v30  ;;  %v644_v62 = vsub.f32 %v3022_v10, %v496_v30  ;;  %v776_v43 = vsub.f32 %v3349_v22, %v496_v30  ;;  %v3557_v17 = vld [vmem:[%s2876_s19 + $0x3a8] sm:$0xff] }
  0x81   : > { %5597 = vst [vmem:[#allocation52_spill] sm:$0xff] %v3539_v2  ;;  %v1922_v37 = vmul.f32 %v3539_v2, %v1648_v24  ;;  %2419 = vrcp.f32 %v3530_v50  ;;  %v908_v7 = vsub.f32 %v3377_v19, %v496_v30  ;;  %v1040_v22 = vsub.f32 %v3416_v39, %v496_v30 }
  0x82   : > { %v532_v27 = vmul.f32 1.442695, %v512_v0  ;;  %v664_v10 = vmul.f32 1.442695, %v644_v62  ;;  %v796_v34 = vmul.f32 1.442695, %v776_v43  ;;  %v1172_v24 = vsub.f32 %v3426_v36, %v496_v30 }
  0x83   : > { %1938 = vst [vmem:[%s3307_s29 + $0x10] sm:$0xff] %v1922_v37  ;;  %v1747_v57 = vand.u32 2147483647, %v3530_v50  ;;  %v1749_v11 = vand.u32 2147483648, %v3530_v50  ;;  %v928_v19 = vmul.f32 1.442695, %v908_v7  ;;  %v1304_v0 = vsub.f32 %v3450_v12, %v496_v30 }
  0x84   : > { %2421 = vpow2.f32 %v532_v27  ;;  %v1060_v21 = vmul.f32 1.442695, %v1040_v22  ;;  %v1192_v9 = vmul.f32 1.442695, %v1172_v24  ;;  %v1436_v62 = vsub.f32 %v3475_v29, %v496_v30  ;;  %v3566_v43 = vld [vmem:[%s2876_s19 + $0x428] sm:$0xff]  ;;  %v3570_v7 = vld [vmem:[%s2876_s19 + $0x3b0] sm:$0xff] }
  0x85   : > { %2423 = vpow2.f32 %v664_v10  ;;  %v1568_v39 = vsub.f32 %v3493_v35, %v496_v30  ;;  %v464_v36 = vmax.f32 %v431_v63, %v3557_v17  ;;  %v1649_v5 = vadd.f32 %v1633_v60, %v1517_v18 }
  0x86   : > { %2425 = vpow2.f32 %v796_v34  ;;  %vm1743_vm12 = vweird.f32 %v3530_v50  ;;  %v1324_v27 = vmul.f32 1.442695, %v1304_v0  ;;  %vm3573_vm13 = vcmp.eq.f32.partialorder %v1747_v57, 8.507059e+37  ;;  %v3599_v0 = vld [vmem:[%s2876_s19 + $0x430] sm:$0xff] }
  0x87   : > { %v2420_v37 = vpop.eup %2419  ;;  %2427 = vpow2.f32 %v928_v19  ;;  %v1456_v35 = vmul.f32 1.442695, %v1436_v62  ;;  %v1750_v29 = vor.u32 1.1754944e-38, %v1749_v11  ;;  %v1588_v30 = vmul.f32 1.442695, %v1568_v39 }
  0x88   : > { %v1739_v10 = vmul.f32 %v2420_v37, %v3530_v50  ;;  %2429 = vpow2.f32 %v1060_v21  ;;  %v3578_v63 = vmax.f32 %v464_v36, %v3566_v43  ;;  %vm1744_vm14 = vweird.f32 %v2420_v37 }
  0x89   : > { %2431 = vpow2.f32 %v1192_v9  ;;  %v465_v34 = vmax.f32 %v3548_v25, %v3570_v7  ;;  %vm3606_vm15 = vmor %vm1743_vm12, %vm1744_vm14 }
  0x8a   : > { %v3580_v60 = vpop.eup %2421  ;;  %v1740_v18 = vsub.f32 1.0, %v1739_v10  ;;  %2433 = vpow2.f32 %v1324_v27  ;;  %v513_v57 = vsub.f32 %v3380_v31, %v3578_v63  ;;  %v645_v11 = vsub.f32 %v3383_v51, %v3578_v63 }
  0x8b   : > { %5600 = vst [vmem:[#allocation53_spill] sm:$0xff] %v3580_v60  ;;  %v3584_v22 = vpop.eup %2423  ;;  %v578_v24 = vmul.f32 %v3580_v60, %v2975_v42  ;;  %2435 = vpow2.f32 %v1456_v35  ;;  %v777_v27 = vsub.f32 %v3419_v44, %v3578_v63 }
  0x8c   : > { %5601 = vst [vmem:[#allocation54_spill] sm:$0xff] %v3584_v22  ;;  %v3592_v19 = vpop.eup %2425  ;;  %v1741_v21 = vmul.f32 %v2420_v37, %v1740_v18  ;;  %v692_v9 = vadd.f32 %v3584_v22, %v3580_v60  ;;  %v710_v25 = vmul.f32 %v3584_v22, %v2989_v47  ;;  %2437 = vpow2.f32 %v1588_v30  ;;  %v4000_v22 = vld [vmem:[%s2876_s19 + $0x250] sm:$0xff] }
  0x8d   : > { %5602 = vst [vmem:[#allocation55_spill] sm:$0xff] %v3592_v19  ;;  %v3601_v62 = vpop.eup %2427  ;;  %v842_v51 = vmul.f32 %v3592_v19, %v2991_v48  ;;  %v534_v39 = vmul.f32 1.442695, %v513_v57  ;;  %v666_v36 = vmul.f32 1.442695, %v645_v11  ;;  %v909_v57 = vsub.f32 %v3436_v46, %v3578_v63 }
  0x8e   : > { %5603 = vst [vmem:[#allocation56_spill] sm:$0xff] %v3601_v62  ;;  %v3614_v10 = vpop.eup %2429  ;;  %v1742_v35 = vadd.f32 %v2420_v37, %v1741_v21  ;;  %v726_v30 = vadd.f32 %v710_v25, %v578_v24  ;;  %v824_v18 = vadd.f32 %v3592_v19, %v692_v9  ;;  %v974_v50 = vmul.f32 %v3601_v62, %v2993_v49  ;;  %v3997_v19 = vld [vmem:[%s2876_s19 + $0x440] sm:$0xff] }
  0x8f   : > { %5606 = vst [vmem:[#allocation57_spill] sm:$0xff] %v3614_v10  ;;  %v3619_v2 = vpop.eup %2431  ;;  %2439 = vpow2.f32 %v534_v39  ;;  %v798_v28 = vmul.f32 1.442695, %v777_v27  ;;  %v3624_v11 = vmax.f32 %v465_v34, %v3599_v0  ;;  %v1106_v25 = vmul.f32 %v3614_v10, %v2996_v52 }
  0x90   : > { %5607 = vst [vmem:[#allocation58_spill] sm:$0xff] %v3619_v2  ;;  %v3626_v44 = vpop.eup %2433  ;;  %v1746_v24 = vsel %vm3606_vm15, %v2420_v37, %v1742_v35  ;;  %v858_v21 = vadd.f32 %v842_v51, %v726_v30  ;;  %v956_v9 = vadd.f32 %v3601_v62, %v824_v18  ;;  %v1238_v34 = vmul.f32 %v3619_v2, %v2998_v53  ;;  %v3988_v62 = vld [vmem:[%s2876_s19 + $0x2c8] sm:$0xff] }
  0x91   : > { %5608 = vst [vmem:[#allocation59_spill] sm:$0xff] %v3626_v44  ;;  %v3633_v39 = vpop.eup %2435  ;;  %v3637_v46 = vsel %vm3573_vm13, %v1750_v29, %v1746_v24  ;;  %2441 = vpow2.f32 %v666_v36  ;;  %v930_v27 = vmul.f32 1.442695, %v909_v57  ;;  %v1370_v30 = vmul.f32 %v3626_v44, %v3000_v54 }
  0x92   : > { %5609 = vst [vmem:[#allocation60_spill] sm:$0xff] %v3633_v39  ;;  %v3641_v31 = vpop.eup %2437  ;;  %v1923_v37 = vmul.f32 %v3637_v46, %v1649_v5  ;;  %v990_v51 = vadd.f32 %v974_v50, %v858_v21  ;;  %v1088_v35 = vadd.f32 %v3614_v10, %v956_v9  ;;  %v1502_v12 = vmul.f32 %v3633_v39, %v3002_v55 }
  0x93   : > { %5610 = vst [vmem:[#allocation61_spill] sm:$0xff] %v3637_v46  ;;  %2443 = vpow2.f32 %v798_v28  ;;  %v1041_v29 = vsub.f32 %v3457_v61, %v3578_v63  ;;  %v1173_v36 = vsub.f32 %v3482_v1, %v3578_v63  ;;  %v1305_v50 = vsub.f32 %v3519_v14, %v3578_v63 }
  0x94   : > { %5611 = vst [vmem:[#allocation62_spill] sm:$0xff] %v3641_v31  ;;  %v1122_v18 = vadd.f32 %v1106_v25, %v990_v51  ;;  %v1220_v5 = vadd.f32 %v3619_v2, %v1088_v35  ;;  %2445 = vpow2.f32 %v930_v27  ;;  %v1437_v28 = vsub.f32 %v3557_v17, %v3578_v63 }
  0x95   : > { %1939 = vst [vmem:[%s3307_s29 + $0x18] sm:$0xff] %v1923_v37  ;;  %v3657_v57 = vpop.eup %2439  ;;  %v1062_v24 = vmul.f32 1.442695, %v1041_v29  ;;  %v1194_v21 = vmul.f32 1.442695, %v1173_v36  ;;  %v1569_v61 = vsub.f32 %v3566_v43, %v3578_v63  ;;  %v1634_v25 = vmul.f32 %v3641_v31, %v3098_v33 }
  0x96   : > { %5612 = vst [vmem:[#allocation63_spill] sm:$0xff] %v3657_v57  ;;  %v1254_v9 = vadd.f32 %v1238_v34, %v1122_v18  ;;  %v1352_v1 = vadd.f32 %v3626_v44, %v1220_v5  ;;  %v579_v14 = vmul.f32 %v3657_v57, %v3042_v38  ;;  %v1326_v37 = vmul.f32 1.442695, %v1305_v50 }
  0x97   : > { %v3668_v27 = vpop.eup %2441  ;;  %2447 = vpow2.f32 %v1062_v24  ;;  %v1458_v51 = vmul.f32 1.442695, %v1437_v28  ;;  %v514_v17 = vsub.f32 %v3395_v15, %v3624_v11  ;;  %v1590_v29 = vmul.f32 1.442695, %v1569_v61  ;;  %v3684_v15 = vld [vmem:[%s2876_s19 + $0x338] sm:$0xff] }
  0x98   : > { %5613 = vst [vmem:[#allocation64_spill] sm:$0xff] %v3668_v27  ;;  %v1386_v35 = vadd.f32 %v1370_v30, %v1254_v9  ;;  %v1484_v43 = vadd.f32 %v3633_v39, %v1352_v1  ;;  %v693_v63 = vadd.f32 %v3668_v27, %v3657_v57  ;;  %v711_v33 = vmul.f32 %v3668_v27, %v3047_v40  ;;  %v3944_v39 = vld [vmem:[%s2876_s19 + $0x2c0] sm:$0xff]  ;;  %v3963_v27 = vld [vmem:[%s2876_s19 + $0x1d0] sm:$0xff] }
  0x99   : > { %v3677_v34 = vpop.eup %2443  ;;  %2449 = vpow2.f32 %v1194_v21  ;;  %v646_v36 = vsub.f32 %v3398_v6, %v3624_v11  ;;  %v778_v18 = vsub.f32 %v3422_v59, %v3624_v11  ;;  %v536_v61 = vmul.f32 1.442695, %v514_v17 }
  0x9a   : > { %5614 = vst [vmem:[#allocation65_spill] sm:$0xff] %v3677_v34  ;;  %v3686_v30 = vpop.eup %2445  ;;  %v1518_v5 = vadd.f32 %v1502_v12, %v1386_v35  ;;  %v3689_v50 = vadd.f32 %v3641_v31, %v1484_v43  ;;  %v727_v24 = vadd.f32 %v711_v33, %v579_v14  ;;  %v825_v28 = vadd.f32 %v3677_v34, %v693_v63 }
  0x9b   : > { %5615 = vst [vmem:[#allocation66_spill] sm:$0xff] %v3686_v30  ;;  %v843_v21 = vmul.f32 %v3677_v34, %v3050_v41  ;;  %v975_v6 = vmul.f32 %v3686_v30, %v3057_v8  ;;  %2451 = vpow2.f32 %v1326_v37  ;;  %v668_v9 = vmul.f32 1.442695, %v646_v36  ;;  %v3948_v34 = vld [vmem:[%s2876_s19 + $0x1c8] sm:$0xff] }
  0x9c   : > { %v3696_v59 = vadd.f32 %v1634_v25, %v1518_v5  ;;  %2453 = vrcp.f32 %v3689_v50  ;;  %v5616_v12 = vmax.f32 %v3525_v58, %v3535_v16  ;;  %vm1757_vm0 = vweird.f32 %v3689_v50 }
  0x9d   : > { %v3705_v14 = vpop.eup %2447  ;;  %v859_v35 = vadd.f32 %v843_v21, %v727_v24  ;;  %v957_v43 = vadd.f32 %v3686_v30, %v825_v28  ;;  %2455 = vpow2.f32 %v1458_v51  ;;  %v1761_v25 = vand.u32 2147483647, %v3689_v50  ;;  %v5619_v24 = vld [vmem:[#allocation47_spill] sm:$0xff] }
  0x9e   : > { %v3703_v1 = vmax.f32 %v5616_v12, %v3684_v15  ;;  %5617 = vst [vmem:[#allocation67_spill] sm:$0xff] %v3705_v14  ;;  %v1107_v37 = vmul.f32 %v3705_v14, %v3064_v13  ;;  %2457 = vpow2.f32 %v1590_v29  ;;  %v800_v17 = vmul.f32 1.442695, %v778_v18  ;;  %v5621_v12 = vld [vmem:[#allocation14_spill] sm:$0xff] }
  0x9f   : > { %v3712_v63 = vpop.eup %2449  ;;  %v1763_v58 = vand.u32 2147483648, %v3689_v50  ;;  %v991_v33 = vadd.f32 %v975_v6, %v859_v35  ;;  %v1089_v36 = vadd.f32 %v3705_v14, %v957_v43  ;;  %2459 = vpow2.f32 %v536_v61 }
  0xa0   : > { %5618 = vst [vmem:[#allocation68_spill] sm:$0xff] %v3712_v63  ;;  %v1239_v5 = vmul.f32 %v3712_v63, %v3081_v20  ;;  %2461 = vpow2.f32 %v668_v9  ;;  %v910_v51 = vsub.f32 %v3439_v3, %v3624_v11  ;;  %v1042_v28 = vsub.f32 %v5619_v24, %v3624_v11 }
  0xa1   : > { %v3722_v29 = vpop.eup %2451  ;;  %v1123_v18 = vadd.f32 %v1107_v37, %v991_v33  ;;  %v1221_v21 = vadd.f32 %v3712_v63, %v1089_v36  ;;  %2463 = vpow2.f32 %v800_v17  ;;  %v1174_v6 = vsub.f32 %v3486_v26, %v3624_v11 }
  0xa2   : > { %5620 = vst [vmem:[#allocation47_spill] sm:$0xff] %v3722_v29  ;;  %v2454_v61 = vpop.eup %2453  ;;  %v1371_v35 = vmul.f32 %v3722_v29, %v5621_v12  ;;  %v932_v9 = vmul.f32 1.442695, %v910_v51  ;;  %v1064_v43 = vmul.f32 1.442695, %v1042_v28  ;;  %v1306_v3 = vsub.f32 %v3522_v56, %v3624_v11 }
  0xa3   : > { %v3731_v46 = vpop.eup %2455  ;;  %v1753_v24 = vmul.f32 %v2454_v61, %v3689_v50  ;;  %v1764_v37 = vor.u32 1.1754944e-38, %v1763_v58  ;;  %v1255_v33 = vadd.f32 %v1239_v5, %v1123_v18  ;;  %v1353_v17 = vadd.f32 %v3722_v29, %v1221_v21  ;;  %v3779_v50 = vld [vmem:[%s2876_s19 + $0x40] sm:$0xff]  ;;  %v3795_v29 = vld [vmem:[%s2876_s19 + $0x438] sm:$0xff] }
  0xa4   : > { %5622 = vst [vmem:[#allocation14_spill] sm:$0xff] %v3731_v46  ;;  %v3735_v36 = vpop.eup %2457  ;;  %vm1758_vm1 = vweird.f32 %v2454_v61  ;;  %v1503_v26 = vmul.f32 %v3731_v46, %v3120_v4  ;;  %2465 = vpow2.f32 %v932_v9  ;;  %v1196_v51 = vmul.f32 1.442695, %v1174_v6 }
  0xa5   : > { %5623 = vst [vmem:[#allocation69_spill] sm:$0xff] %v3735_v36  ;;  %v3739_v28 = vpop.eup %2459  ;;  %v1754_v56 = vsub.f32 1.0, %v1753_v24  ;;  %v1387_v63 = vadd.f32 %v1371_v35, %v1255_v33  ;;  %v1485_v31 = vadd.f32 %v3731_v46, %v1353_v17  ;;  %v1328_v14 = vmul.f32 1.442695, %v1306_v3  ;;  %v3760_v24 = vld [vmem:[%s2876_s19 + $0x3b8] sm:$0xff]  ;;  %vm3765_vm2 = vmor %vm1757_vm0, %vm1758_vm1 }
  0xa6   : > { %5624 = vst [vmem:[#allocation70_spill] sm:$0xff] %v3739_v28  ;;  %v3742_v58 = vpop.eup %2461  ;;  %v1635_v5 = vmul.f32 %v3735_v36, %v3193_v23  ;;  %v580_v18 = vmul.f32 %v3739_v28, %v2975_v42  ;;  %2467 = vpow2.f32 %v1064_v43  ;;  %v1438_v21 = vsub.f32 %v3570_v7, %v3624_v11 }
  0xa7   : > { %5625 = vst [vmem:[#allocation71_spill] sm:$0xff] %v3742_v58  ;;  %v3750_v6 = vpop.eup %2463  ;;  %v1755_v35 = vmul.f32 %v2454_v61, %v1754_v56  ;;  %v3753_v9 = vadd.f32 %v3735_v36, %v1485_v31  ;;  %v694_v3 = vadd.f32 %v3742_v58, %v3739_v28  ;;  %v1570_v23 = vsub.f32 %v3599_v0, %v3624_v11  ;;  %v3782_v56 = vld [vmem:[%s2876_s19 + $0xc0] sm:$0xff] }
  0xa8   : > { %5626 = vst [vmem:[#allocation72_spill] sm:$0xff] %v3750_v6  ;;  %v1519_v43 = vadd.f32 %v1503_v26, %v1387_v63  ;;  %v712_v31 = vmul.f32 %v3742_v58, %v2989_v47  ;;  %v844_v33 = vmul.f32 %v3750_v6, %v2991_v48  ;;  %2469 = vpow2.f32 %v1196_v51 }
  0xa9   : > { %v1756_v17 = vadd.f32 %v2454_v61, %v1755_v35  ;;  %vm3773_vm3 = vcmp.eq.f32.partialorder %v1761_v25, 8.507059e+37  ;;  %2471 = vrcp.f32 %v3753_v9  ;;  %v1460_v11 = vmul.f32 1.442695, %v1438_v21 }
  0xaa   : > { %v3784_v63 = vpop.eup %2465  ;;  %v1775_v26 = vand.u32 2147483647, %v3753_v9  ;;  %v728_v36 = vadd.f32 %v712_v31, %v580_v18  ;;  %v826_v51 = vadd.f32 %v3750_v6, %v694_v3  ;;  %v466_v25 = vmax.f32 %v3703_v1, %v3760_v24 }
  0xab   : > { %5631 = vst [vmem:[#allocation73_spill] sm:$0xff] %v3784_v63  ;;  %v1760_v35 = vsel %vm3765_vm2, %v2454_v61, %v1756_v17  ;;  %v976_v21 = vmul.f32 %v3784_v63, %v2993_v49  ;;  %2473 = vpow2.f32 %v1328_v14  ;;  %v1592_v46 = vmul.f32 1.442695, %v1570_v23 }
  0xac   : > { %v3797_v58 = vpop.eup %2467  ;;  %v3801_v18 = vsel %vm3773_vm3, %v1764_v37, %v1760_v35  ;;  %v3803_v3 = vadd.f32 %v1635_v5, %v1519_v43  ;;  %v860_v1 = vadd.f32 %v844_v33, %v728_v36  ;;  %v269_v61 = vmax.f32 %v3779_v50, %v3782_v56  ;;  %v5639_v35 = vld [vmem:[#allocation44_spill] sm:$0xff] }
  0xad   : > { %5632 = vst [vmem:[#allocation74_spill] sm:$0xff] %v3797_v58  ;;  %v1924_v7 = vmul.f32 %v3801_v18, %v3696_v59  ;;  %v958_v14 = vadd.f32 %v3784_v63, %v826_v51  ;;  %v1108_v23 = vmul.f32 %v3797_v58, %v2996_v52  ;;  %2475 = vpow2.f32 %v1460_v11  ;;  %v5637_v11 = vld [vmem:[#allocation42_spill] sm:$0xff] }
  0xae   : > { %5633 = vst [vmem:[#allocation75_spill] sm:$0xff] %v3801_v18  ;;  %v3812_v31 = vpop.eup %2469  ;;  %vm1771_vm4 = vweird.f32 %v3753_v9  ;;  %v992_v37 = vadd.f32 %v976_v21, %v860_v1  ;;  %2477 = vpow2.f32 %v1592_v46  ;;  %v3816_v36 = vmax.f32 %v466_v25, %v3795_v29  ;;  %v5640_v1 = vld [vmem:[#allocation46_spill] sm:$0xff] }
  0xaf   : > { %5634 = vst [vmem:[#allocation76_spill] sm:$0xff] %v3812_v31  ;;  %v2472_v5 = vpop.eup %2471  ;;  %vm3819_vm5 = vcmp.eq.f32.partialorder %v1775_v26, 8.507059e+37  ;;  %v1777_v43 = vand.u32 2147483648, %v3753_v9  ;;  %v1090_v33 = vadd.f32 %v3797_v58, %v958_v14  ;;  %v1240_v17 = vmul.f32 %v3812_v31, %v2998_v53  ;;  %v5641_v14 = vld [vmem:[#allocation48_spill] sm:$0xff] }
  0xb0   : > { %1940 = vst [vmem:[%s3307_s29 + $0x20] sm:$0xff] %v1924_v7  ;;  %v1767_v0 = vmul.f32 %v2472_v5, %v3753_v9  ;;  %vm1772_vm6 = vweird.f32 %v2472_v5  ;;  %v1124_v46 = vadd.f32 %v1108_v23, %v992_v37  ;;  %v515_v51 = vsub.f32 %v5637_v11, %v3816_v36  ;;  %v3840_v58 = vld [vmem:[%s2876_s19 + $0x140] sm:$0xff] }
  0xb1   : > { %v3830_v25 = vpop.eup %2473  ;;  %v1222_v26 = vadd.f32 %v3812_v31, %v1090_v33  ;;  %v647_v21 = vsub.f32 %v5639_v35, %v3816_v36  ;;  %v779_v7 = vsub.f32 %v5640_v1, %v3816_v36  ;;  %v911_v18 = vsub.f32 %v5641_v14, %v3816_v36  ;;  %vm3853_vm7 = vmor %vm1771_vm4, %vm1772_vm6 }
  0xb2   : > { %5638 = vst [vmem:[#allocation42_spill] sm:$0xff] %v3830_v25  ;;  %v1768_v63 = vsub.f32 1.0, %v1767_v0  ;;  %v1256_v23 = vadd.f32 %v1240_v17, %v1124_v46  ;;  %v1372_v37 = vmul.f32 %v3830_v25, %v3000_v54  ;;  %v538_v11 = vmul.f32 1.442695, %v515_v51 }
  0xb3   : > { %v3844_v6 = vpop.eup %2475  ;;  %v1354_v33 = vadd.f32 %v3830_v25, %v1222_v26  ;;  %v670_v35 = vmul.f32 1.442695, %v647_v21  ;;  %v802_v31 = vmul.f32 1.442695, %v779_v7  ;;  %v934_v1 = vmul.f32 1.442695, %v911_v18 }
  0xb4   : > { %5642 = vst [vmem:[#allocation44_spill] sm:$0xff] %v3844_v6  ;;  %v3847_v28 = vpop.eup %2477  ;;  %v1769_v14 = vmul.f32 %v2472_v5, %v1768_v63  ;;  %v1778_v0 = vor.u32 1.1754944e-38, %v1777_v43  ;;  %2479 = vpow2.f32 %v538_v11  ;;  %v302_v17 = vmax.f32 %v269_v61, %v3840_v58  ;;  %v3861_v63 = vld [vmem:[%s2876_s19 + $0x48] sm:$0xff]  ;;  %v3871_v7 = vld [vmem:[%s2876_s19 + $0x50] sm:$0xff] }
  0xb5   : > { %5643 = vst [vmem:[#allocation46_spill] sm:$0xff] %v3847_v28  ;;  %v1388_v51 = vadd.f32 %v1372_v37, %v1256_v23  ;;  %v1486_v26 = vadd.f32 %v3844_v6, %v1354_v33  ;;  %2481 = vpow2.f32 %v670_v35  ;;  %v1043_v18 = vsub.f32 %v3496_v32, %v3816_v36  ;;  %v3864_v43 = vld [vmem:[%s2876_s19 + $0xc8] sm:$0xff]  ;;  %v3874_v23 = vld [vmem:[%s2876_s19 + $0xd0] sm:$0xff] }
  0xb6   : > { %v1770_v61 = vadd.f32 %v2472_v5, %v1769_v14  ;;  %v1504_v9 = vmul.f32 %v3844_v6, %v3002_v55  ;;  %2483 = vpow2.f32 %v802_v31  ;;  %v1175_v21 = vsub.f32 %v3535_v16, %v3816_v36 }
  0xb7   : > { %v3877_v37 = vadd.f32 %v3847_v28, %v1486_v26  ;;  %2485 = vpow2.f32 %v934_v1  ;;  %v1066_v32 = vmul.f32 1.442695, %v1043_v18  ;;  %v1307_v11 = vsub.f32 %v3684_v15, %v3816_v36  ;;  %v3892_v1 = vld [vmem:[%s2887_s21 + $0x10] ss:$0 sm:$0xff]  ;;  %v3908_v26 = vld [vmem:[%s2876_s19 + $0x1c0] sm:$0xff] }
  0xb8   : > { %v1774_v33 = vsel %vm3853_vm7, %v2472_v5, %v1770_v61  ;;  %v1198_v31 = vmul.f32 1.442695, %v1175_v21  ;;  %v1439_v16 = vsub.f32 %v3760_v24, %v3816_v36  ;;  %v270_v35 = vmax.f32 %v3861_v63, %v3864_v43 }
  0xb9   : > { %v3889_v14 = vsel %vm3819_vm5, %v1778_v0, %v1774_v33  ;;  %v3896_v15 = vmul.f32 %v3892_v1, %v3847_v28  ;;  %2487 = vrcp.f32 %v3877_v37  ;;  %v271_v24 = vmax.f32 %v3871_v7, %v3874_v23  ;;  %v3916_v33 = vld [vmem:[%s2876_s19 + $0x148] sm:$0xff] }
  0xba   : > { %5646 = vst [vmem:[#allocation48_spill] sm:$0xff] %v3889_v14  ;;  %v3901_v5 = vpop.eup %2479  ;;  %v1925_v59 = vmul.f32 %v3889_v14, %v3803_v3  ;;  %v3905_v0 = vadd.f32 %v1504_v9, %v1388_v51  ;;  %2489 = vpow2.f32 %v1066_v32  ;;  %v1330_v46 = vmul.f32 1.442695, %v1307_v11  ;;  %v3928_v14 = vld [vmem:[%s2876_s19 + $0x240] sm:$0xff] }
  0xbb   : > { %5647 = vst [vmem:[#allocation77_spill] sm:$0xff] %v3901_v5  ;;  %v3910_v18 = vpop.eup %2481  ;;  %vm1785_vm8 = vweird.f32 %v3877_v37  ;;  %v581_v61 = vmul.f32 %v3901_v5, %v3042_v38  ;;  %2491 = vpow2.f32 %v1198_v31  ;;  %v1462_v21 = vmul.f32 1.442695, %v1439_v16  ;;  %v3931_v31 = vld [vmem:[%s2876_s19 + $0x150] sm:$0xff] }
  0xbc   : > { %5648 = vst [vmem:[#allocation78_spill] sm:$0xff] %v3910_v18  ;;  %v3918_v3 = vpop.eup %2483  ;;  %v1789_v51 = vand.u32 2147483647, %v3877_v37  ;;  %v1791_v9 = vand.u32 2147483648, %v3877_v37  ;;  %v695_v32 = vadd.f32 %v3910_v18, %v3901_v5  ;;  %v713_v11 = vmul.f32 %v3910_v18, %v3047_v40 }
  0xbd   : > { %5649 = vst [vmem:[#allocation79_spill] sm:$0xff] %v3918_v3  ;;  %v3933_v16 = vpop.eup %2485  ;;  %2493 = vpow2.f32 %v1330_v46  ;;  %v1571_v28 = vsub.f32 %v3795_v29, %v3816_v36  ;;  %v335_v6 = vmax.f32 %v302_v17, %v3908_v26  ;;  %v303_v30 = vmax.f32 %v270_v35, %v3916_v33  ;;  %v3952_v17 = vld [vmem:[%s2876_s19 + $0x340] sm:$0xff] }
  0xbe   : > { %1941 = vst [vmem:[%s3307_s29 + $0x28] sm:$0xff] %v1925_v59  ;;  %v845_v59 = vmul.f32 %v3918_v3, %v3050_v41  ;;  %v729_v25 = vadd.f32 %v713_v11, %v581_v61  ;;  %v827_v18 = vadd.f32 %v3918_v3, %v695_v32  ;;  %v977_v5 = vmul.f32 %v3933_v16, %v3057_v8  ;;  %v3955_v61 = vld [vmem:[%s2876_s19 + $0x248] sm:$0xff] }
  0xbf   : > { %5650 = vst [vmem:[#allocation80_spill] sm:$0xff] %v3933_v16  ;;  %v2488_v46 = vpop.eup %2487  ;;  %2495 = vpow2.f32 %v1462_v21  ;;  %v1594_v29 = vmul.f32 1.442695, %v1571_v28  ;;  %v368_v36 = vmax.f32 %v335_v6, %v3928_v14  ;;  %v304_v32 = vmax.f32 %v271_v24, %v3931_v31  ;;  %v3966_v28 = vld [vmem:[%s2876_s19 + $0x58] sm:$0xff] }
  0xc0   : > { %v3958_v11 = vpop.eup %2489  ;;  %v1781_v3 = vmul.f32 %v2488_v46, %v3877_v37  ;;  %vm1786_vm9 = vweird.f32 %v2488_v46  ;;  %v861_v35 = vadd.f32 %v845_v59, %v729_v25  ;;  %v959_v44 = vadd.f32 %v3933_v16, %v827_v18  ;;  %v3969_v6 = vld [vmem:[%s2876_s19 + $0xd8] sm:$0xff] }
  0xc1   : > { %5651 = vst [vmem:[#allocation81_spill] sm:$0xff] %v3958_v11  ;;  %v3971_v21 = vpop.eup %2491  ;;  %v1109_v24 = vmul.f32 %v3958_v11, %v3064_v13  ;;  %2497 = vpow2.f32 %v1594_v29  ;;  %v401_v57 = vmax.f32 %v368_v36, %v3944_v39  ;;  %v336_v2 = vmax.f32 %v303_v30, %v3948_v34  ;;  %vm4012_vm10 = vmor %vm1785_vm8, %vm1786_vm9 }
  0xc2   : > { %5652 = vst [vmem:[#allocation82_spill] sm:$0xff] %v3969_v6  ;;  %v1782_v25 = vsub.f32 1.0, %v1781_v3  ;;  %v993_v18 = vadd.f32 %v977_v5, %v861_v35  ;;  %v1091_v59 = vadd.f32 %v3958_v11, %v959_v44  ;;  %v1241_v16 = vmul.f32 %v3971_v21, %v3081_v20 }
  0xc3   : > { %5653 = vst [vmem:[#allocation83_spill] sm:$0xff] %v3971_v21  ;;  %v3983_v10 = vpop.eup %2493  ;;  %v434_v29 = vmax.f32 %v401_v57, %v3952_v17  ;;  %v369_v36 = vmax.f32 %v336_v2, %v3955_v61  ;;  %v337_v30 = vmax.f32 %v304_v32, %v3963_v27  ;;  %v272_v5 = vmax.f32 %v3966_v28, %v3969_v6  ;;  %v4003_v57 = vld [vmem:[%s2876_s19 + $0x158] sm:$0xff] }
  0xc4   : > { %5654 = vst [vmem:[#allocation84_spill] sm:$0xff] %v3983_v10  ;;  %v1783_v3 = vmul.f32 %v2488_v46, %v1782_v25  ;;  %v1125_v44 = vadd.f32 %v1109_v24, %v993_v18  ;;  %v1223_v35 = vadd.f32 %v3971_v21, %v1091_v59  ;;  %v1373_v11 = vmul.f32 %v3983_v10, %v5621_v12 }
  0xc5   : > { %v4005_v2 = vpop.eup %2495  ;;  %v1652_v32 = vadd.f32 %v3896_v15, %v3905_v0  ;;  %vm4016_vm11 = vcmp.eq.f32.partialorder %v1789_v51, 8.507059e+37  ;;  %v1792_v18 = vor.u32 1.1754944e-38, %v1791_v9  ;;  %v467_v59 = vmax.f32 %v434_v29, %v3981_v45 }
  0xc6   : > { %5655 = vst [vmem:[#allocation85_spill] sm:$0xff] %v4005_v2  ;;  %v1784_v21 = vadd.f32 %v2488_v46, %v1783_v3  ;;  %v1257_v60 = vadd.f32 %v1241_v16, %v1125_v44  ;;  %v1355_v6 = vadd.f32 %v3983_v10, %v1223_v35  ;;  %v1505_v37 = vmul.f32 %v4005_v2, %v3120_v4  ;;  %v4036_v35 = vld [vmem:[%s2887_s21 + $0x18] ss:$0 sm:$0xff] }
  0xc7   : > { %v4024_v15 = vpop.eup %2497  ;;  %v500_v0 = vmax.f32 %v467_v59, %v3997_v19  ;;  %v402_v51 = vmax.f32 %v369_v36, %v3988_v62  ;;  %v370_v9 = vmax.f32 %v337_v30, %v4000_v22  ;;  %v4030_v29 = vmax.f32 %v272_v5, %v4003_v57 }
  0xc8   : > { %5660 = vst [vmem:[#allocation86_spill] sm:$0xff] %v4024_v15  ;;  %v1788_v16 = vsel %vm4012_vm10, %v2488_v46, %v1784_v21  ;;  %v1389_v3 = vadd.f32 %v1373_v11, %v1257_v60  ;;  %v1487_v44 = vadd.f32 %v4005_v2, %v1355_v6  ;;  %v1637_v10 = vmul.f32 %v4036_v35, %v4024_v15  ;;  %v4048_v60 = vld [vmem:[%s2876_s19 + $0x348] sm:$0xff]  ;;  %v4051_v11 = vld [vmem:[%s2876_s19 + $0x2d0] sm:$0xff]  ;;  %v4054_v6 = vld [vmem:[%s2876_s19 + $0x1d8] sm:$0xff] }
  0xc9   : > { %v4042_v36 = vsel %vm4016_vm11, %v1792_v18, %v1788_v16  ;;  %v516_v30 = vsub.f32 %v3779_v50, %v500_v0  ;;  %v648_v5 = vsub.f32 %v3782_v56, %v500_v0  ;;  %v780_v46 = vsub.f32 %v3840_v58, %v500_v0  ;;  %v4066_v2 = vld [vmem:[%s2876_s19 + $0x3c8] sm:$0xff] }
  0xca   : > { %5661 = vst [vmem:[#allocation87_spill] sm:$0xff] %v4042_v36  ;;  %v1926_v21 = vmul.f32 %v4042_v36, %v1652_v32  ;;  %v1521_v24 = vadd.f32 %v1505_v37, %v1389_v3  ;;  %v4058_v25 = vadd.f32 %v4024_v15, %v1487_v44  ;;  %v912_v18 = vsub.f32 %v3908_v26, %v500_v0  ;;  %v4084_v37 = vld [vmem:[%s2876_s19 + $0x350] sm:$0xff] }
  0xcb   : > { %v540_v50 = vmul.f32 1.442695, %v516_v30  ;;  %v672_v59 = vmul.f32 1.442695, %v648_v5  ;;  %v804_v56 = vmul.f32 1.442695, %v780_v46  ;;  %v1044_v16 = vsub.f32 %v3928_v14, %v500_v0 }
  0xcc   : > { %1942 = vst [vmem:[%s3307_s29 + $0x30] sm:$0xff] %v1926_v21  ;;  %2499 = vrcp.f32 %v4058_v25  ;;  %v435_v58 = vmax.f32 %v402_v51, %v4048_v60  ;;  %v403_v32 = vmax.f32 %v370_v9, %v4051_v11  ;;  %v1803_v26 = vand.u32 2147483647, %v4058_v25  ;;  %v4080_v21 = vld [vmem:[%s2876_s19 + $0x448] sm:$0xff] }
  0xcd   : > { %2501 = vpow2.f32 %v540_v50  ;;  %v936_v3 = vmul.f32 1.442695, %v912_v18  ;;  %v1068_v44 = vmul.f32 1.442695, %v1044_v16  ;;  %v1805_v14 = vand.u32 2147483648, %v4058_v25 }
  0xce   : > { %2503 = vpow2.f32 %v672_v59  ;;  %v1176_v30 = vsub.f32 %v3944_v39, %v500_v0  ;;  %v1308_v51 = vsub.f32 %v3952_v17, %v500_v0  ;;  %v4075_v5 = vadd.f32 %v1637_v10, %v1521_v24 }
  0xcf   : > { %2505 = vpow2.f32 %v804_v56  ;;  %v1440_v9 = vsub.f32 %v3981_v45, %v500_v0  ;;  %v1572_v46 = vsub.f32 %v3997_v19, %v500_v0  ;;  %v468_v16 = vmax.f32 %v435_v58, %v4066_v2 }
  0xd0   : > { %2507 = vpow2.f32 %v936_v3  ;;  %v1200_v50 = vmul.f32 1.442695, %v1176_v30  ;;  %v1332_v18 = vmul.f32 1.442695, %v1308_v51  ;;  %vm1799_vm12 = vweird.f32 %v4058_v25 }
  0xd1   : > { %2509 = vpow2.f32 %v1068_v44  ;;  %v1464_v39 = vmul.f32 1.442695, %v1440_v9  ;;  %v1596_v10 = vmul.f32 1.442695, %v1572_v46  ;;  %vm4087_vm13 = vcmp.eq.f32.partialorder %v1803_v26, 8.507059e+37  ;;  %v4115_v9 = vld [vmem:[%s2876_s19 + $0x3d0] sm:$0xff] }
  0xd2   : > { %v2500_v17 = vpop.eup %2499  ;;  %v1806_v45 = vor.u32 1.1754944e-38, %v1805_v14  ;;  %2511 = vpow2.f32 %v1200_v50  ;;  %v4092_v19 = vmax.f32 %v468_v16, %v4080_v21  ;;  %v4098_v56 = vmax.f32 %v403_v32, %v4084_v37 }
  0xd3   : > { %v4094_v0 = vpop.eup %2501  ;;  %v1795_v59 = vmul.f32 %v2500_v17, %v4058_v25  ;;  %vm1800_vm14 = vweird.f32 %v2500_v17  ;;  %2513 = vpow2.f32 %v1332_v18 }
  0xd4   : > { %5664 = vst [vmem:[#allocation88_spill] sm:$0xff] %v4094_v0  ;;  %v4100_v58 = vpop.eup %2503  ;;  %v582_v26 = vmul.f32 %v4094_v0, %v2975_v42  ;;  %2515 = vpow2.f32 %v1464_v39  ;;  %v517_v3 = vsub.f32 %v3861_v63, %v4092_v19  ;;  %v649_v44 = vsub.f32 %v3864_v43, %v4092_v19  ;;  %vm4133_vm15 = vmor %vm1799_vm12, %vm1800_vm14 }
  0xd5   : > { %5665 = vst [vmem:[#allocation89_spill] sm:$0xff] %v4100_v58  ;;  %v4108_v14 = vpop.eup %2505  ;;  %v1796_v30 = vsub.f32 1.0, %v1795_v59  ;;  %v696_v51 = vadd.f32 %v4100_v58, %v4094_v0  ;;  %v714_v32 = vmul.f32 %v4100_v58, %v2989_v47  ;;  %2517 = vpow2.f32 %v1596_v10 }
  0xd6   : > { %5666 = vst [vmem:[#allocation90_spill] sm:$0xff] %v4108_v14  ;;  %v4117_v46 = vpop.eup %2507  ;;  %v846_v63 = vmul.f32 %v4108_v14, %v2991_v48  ;;  %v542_v50 = vmul.f32 1.442695, %v517_v3  ;;  %v674_v18 = vmul.f32 1.442695, %v649_v44  ;;  %v781_v43 = vsub.f32 %v3916_v33, %v4092_v19 }
  0xd7   : > { %5667 = vst [vmem:[#allocation91_spill] sm:$0xff] %v4117_v46  ;;  %v4123_v16 = vpop.eup %2509  ;;  %v1797_v39 = vmul.f32 %v2500_v17, %v1796_v30  ;;  %v730_v59 = vadd.f32 %v714_v32, %v582_v26  ;;  %v828_v36 = vadd.f32 %v4108_v14, %v696_v51  ;;  %v978_v10 = vmul.f32 %v4117_v46, %v2993_v49 }
  0xd8   : > { %5668 = vst [vmem:[#allocation92_spill] sm:$0xff] %v4123_v16  ;;  %v4128_v15 = vpop.eup %2511  ;;  %2519 = vpow2.f32 %v542_v50  ;;  %v806_v33 = vmul.f32 1.442695, %v781_v43  ;;  %v913_v44 = vsub.f32 %v3948_v34, %v4092_v19  ;;  %v469_v26 = vmax.f32 %v4098_v56, %v4115_v9 }
  0xd9   : > { %5669 = vst [vmem:[#allocation93_spill] sm:$0xff] %v4128_v15  ;;  %v4141_v30 = vpop.eup %2513  ;;  %v1798_v51 = vadd.f32 %v2500_v17, %v1797_v39  ;;  %v862_v32 = vadd.f32 %v846_v63, %v730_v59  ;;  %v960_v14 = vadd.f32 %v4117_v46, %v828_v36  ;;  %v1110_v25 = vmul.f32 %v4123_v16, %v2996_v52  ;;  %v4409_v46 = vld [vmem:[%s2876_s19 + $0x2e0] sm:$0xff] }
  0xda   : > { %5672 = vst [vmem:[#allocation94_spill] sm:$0xff] %v4141_v30  ;;  %v4146_v58 = vpop.eup %2515  ;;  %v1242_v50 = vmul.f32 %v4128_v15, %v2998_v53  ;;  %2521 = vpow2.f32 %v674_v18  ;;  %v938_v34 = vmul.f32 1.442695, %v913_v44  ;;  %v1045_v56 = vsub.f32 %v3955_v61, %v4092_v19 }
  0xdb   : > { %5673 = vst [vmem:[#allocation95_spill] sm:$0xff] %v4146_v58  ;;  %v4152_v43 = vpop.eup %2517  ;;  %v1802_v63 = vsel %vm4133_vm15, %v2500_v17, %v1798_v51  ;;  %v994_v36 = vadd.f32 %v978_v10, %v862_v32  ;;  %v1092_v39 = vadd.f32 %v4123_v16, %v960_v14  ;;  %v1374_v59 = vmul.f32 %v4141_v30, %v3000_v54  ;;  %v4169_v14 = vld [vmem:[%s2876_s19 + $0x450] sm:$0xff] }
  0xdc   : > { %5674 = vst [vmem:[#allocation96_spill] sm:$0xff] %v4152_v43  ;;  %v4161_v18 = vsel %vm4087_vm13, %v1806_v45, %v1802_v63  ;;  %v1506_v44 = vmul.f32 %v4146_v58, %v3002_v55  ;;  %2523 = vpow2.f32 %v806_v33  ;;  %v1070_v61 = vmul.f32 1.442695, %v1045_v56  ;;  %v5702_v16 = vld [vmem:[#allocation82_spill] sm:$0xff] }
  0xdd   : > { %5675 = vst [vmem:[#allocation97_spill] sm:$0xff] %v4161_v18  ;;  %v1927_v3 = vmul.f32 %v4161_v18, %v4075_v5  ;;  %v1126_v17 = vadd.f32 %v1110_v25, %v994_v36  ;;  %v1224_v10 = vadd.f32 %v4128_v15, %v1092_v39  ;;  %2525 = vpow2.f32 %v938_v34  ;;  %v4381_v15 = vld [vmem:[%s2876_s19 + $0x1e8] sm:$0xff] }
  0xde   : > { %v4171_v51 = vpop.eup %2519  ;;  %v1638_v24 = vmul.f32 %v3892_v1, %v4152_v43  ;;  %v1177_v45 = vsub.f32 %v3988_v62, %v4092_v19  ;;  %v1309_v33 = vsub.f32 %v4048_v60, %v4092_v19  ;;  %v1441_v5 = vsub.f32 %v4066_v2, %v4092_v19 }
  0xdf   : > { %5676 = vst [vmem:[#allocation98_spill] sm:$0xff] %v4171_v51  ;;  %v1258_v32 = vadd.f32 %v1242_v50, %v1126_v17  ;;  %v1356_v25 = vadd.f32 %v4141_v30, %v1224_v10  ;;  %v583_v34 = vmul.f32 %v4171_v51, %v3042_v38  ;;  %2527 = vpow2.f32 %v1070_v61  ;;  %v4365_v30 = vld [vmem:[%s2876_s19 + $0xf0] sm:$0xff] }
  0xe0   : > { %1943 = vst [vmem:[%s3307_s29 + $0x38] sm:$0xff] %v1927_v3  ;;  %v4185_v56 = vpop.eup %2521  ;;  %v1202_v63 = vmul.f32 1.442695, %v1177_v45  ;;  %v1334_v36 = vmul.f32 1.442695, %v1309_v33  ;;  %v1573_v62 = vsub.f32 %v4080_v21, %v4092_v19  ;;  %v4190_v60 = vmax.f32 %v469_v26, %v4169_v14 }
  0xe1   : > { %5677 = vst [vmem:[#allocation99_spill] sm:$0xff] %v4185_v56  ;;  %v1390_v2 = vadd.f32 %v1374_v59, %v1258_v32  ;;  %v1488_v50 = vadd.f32 %v4146_v58, %v1356_v25  ;;  %v697_v39 = vadd.f32 %v4185_v56, %v4171_v51  ;;  %v715_v61 = vmul.f32 %v4185_v56, %v3047_v40  ;;  %v4210_v32 = vld [vmem:[%s2876_s19 + $0x258] sm:$0xff]  ;;  %v4362_v58 = vld [vmem:[%s2876_s19 + $0x70] sm:$0xff] }
  0xe2   : > { %v4197_v3 = vpop.eup %2523  ;;  %2529 = vpow2.f32 %v1202_v63  ;;  %v1466_v17 = vmul.f32 1.442695, %v1441_v5  ;;  %v518_v21 = vsub.f32 %v3871_v7, %v4190_v60  ;;  %v650_v19 = vsub.f32 %v3874_v23, %v4190_v60 }
  0xe3   : > { %5678 = vst [vmem:[#allocation100_spill] sm:$0xff] %v4197_v3  ;;  %v4203_v26 = vpop.eup %2525  ;;  %v1522_v59 = vadd.f32 %v1506_v44, %v1390_v2  ;;  %v4206_v10 = vadd.f32 %v4152_v43, %v1488_v50  ;;  %v731_v45 = vadd.f32 %v715_v61, %v583_v34  ;;  %v829_v33 = vadd.f32 %v4197_v3, %v697_v39 }
  0xe4   : > { %5679 = vst [vmem:[#allocation101_spill] sm:$0xff] %v4203_v26  ;;  %v847_v5 = vmul.f32 %v4197_v3, %v3050_v41  ;;  %v979_v7 = vmul.f32 %v4203_v26, %v3057_v8  ;;  %2531 = vpow2.f32 %v1334_v36  ;;  %v1598_v25 = vmul.f32 1.442695, %v1573_v62 }
  0xe5   : > { %v4216_v23 = vpop.eup %2527  ;;  %2533 = vrcp.f32 %v4206_v10  ;;  %v544_v44 = vmul.f32 1.442695, %v518_v21  ;;  %v961_v34 = vadd.f32 %v4203_v26, %v829_v33  ;;  %v5681_v50 = vmax.f32 %v4030_v29, %v4054_v6 }
  0xe6   : > { %5680 = vst [vmem:[#allocation102_spill] sm:$0xff] %v4216_v23  ;;  %v863_v63 = vadd.f32 %v847_v5, %v731_v45  ;;  %v1111_v2 = vmul.f32 %v4216_v23, %v3064_v13  ;;  %v4228_v61 = vadd.f32 %v1638_v24, %v1522_v59  ;;  %2535 = vpow2.f32 %v1466_v17 }
  0xe7   : > { %v4226_v39 = vmax.f32 %v5681_v50, %v4210_v32  ;;  %v676_v36 = vmul.f32 1.442695, %v650_v19  ;;  %v782_v62 = vsub.f32 %v3931_v31, %v4190_v60  ;;  %v1819_v45 = vand.u32 2147483648, %v4206_v10 }
  0xe8   : > { %v4232_v21 = vpop.eup %2529  ;;  %v995_v33 = vadd.f32 %v979_v7, %v863_v63  ;;  %v1093_v5 = vadd.f32 %v4216_v23, %v961_v34  ;;  %2537 = vpow2.f32 %v1598_v25  ;;  %v914_v24 = vsub.f32 %v3963_v27, %v4190_v60 }
  0xe9   : > { %5682 = vst [vmem:[#allocation103_spill] sm:$0xff] %v4232_v21  ;;  %v1243_v29 = vmul.f32 %v4232_v21, %v3081_v20  ;;  %2539 = vpow2.f32 %v544_v44  ;;  %v808_v50 = vmul.f32 1.442695, %v782_v62  ;;  %v1046_v59 = vsub.f32 %v4000_v22, %v4190_v60 }
  0xea   : > { %v4240_v17 = vpop.eup %2531  ;;  %v1127_v19 = vadd.f32 %v1111_v2, %v995_v33  ;;  %v1225_v31 = vadd.f32 %v4232_v21, %v1093_v5  ;;  %2541 = vpow2.f32 %v676_v36  ;;  %v940_v63 = vmul.f32 1.442695, %v914_v24 }
  0xeb   : > { %5683 = vst [vmem:[#allocation104_spill] sm:$0xff] %v4240_v17  ;;  %v2534_v7 = vpop.eup %2533  ;;  %v1375_v25 = vmul.f32 %v4240_v17, %v5621_v12  ;;  %2543 = vpow2.f32 %v808_v50  ;;  %v1178_v44 = vsub.f32 %v4051_v11, %v4190_v60  ;;  %vm1813_vm0 = vweird.f32 %v4206_v10 }
  0xec   : > { %v1809_v27 = vmul.f32 %v2534_v7, %v4206_v10  ;;  %v1259_v34 = vadd.f32 %v1243_v29, %v1127_v19  ;;  %v1357_v2 = vadd.f32 %v4240_v17, %v1225_v31  ;;  %v4252_v36 = vpop.eup %2535  ;;  %2545 = vpow2.f32 %v940_v63  ;;  %v4272_v17 = vld [vmem:[%s2876_s19 + $0x60] sm:$0xff] }
  0xed   : > { %5684 = vst [vmem:[#allocation105_spill] sm:$0xff] %v4252_v36  ;;  %v1072_v22 = vmul.f32 1.442695, %v1046_v59  ;;  %v1204_v62 = vmul.f32 1.442695, %v1178_v44  ;;  %v1310_v33 = vsub.f32 %v4084_v37, %v4190_v60  ;;  %vm1814_vm1 = vweird.f32 %v2534_v7 }
  0xee   : > { %v4256_v5 = vpop.eup %2537  ;;  %v1810_v11 = vsub.f32 1.0, %v1809_v27  ;;  %v1817_v50 = vand.u32 2147483647, %v4206_v10  ;;  %v1489_v29 = vadd.f32 %v4252_v36, %v1357_v2  ;;  %v1820_v19 = vor.u32 1.1754944e-38, %v1819_v45  ;;  %v4275_v2 = vld [vmem:[%s2876_s19 + $0xe0] sm:$0xff]  ;;  %vm4282_vm2 = vmor %vm1813_vm0, %vm1814_vm1 }
  0xef   : > { %5685 = vst [vmem:[#allocation106_spill] sm:$0xff] %v4256_v5  ;;  %v4260_v24 = vpop.eup %2539  ;;  %v1391_v31 = vadd.f32 %v1375_v25, %v1259_v34  ;;  %2547 = vpow2.f32 %v1072_v22  ;;  %v1442_v59 = vsub.f32 %v4115_v9, %v4190_v60  ;;  %v1336_v18 = vmul.f32 1.442695, %v1310_v33  ;;  %v4319_v9 = vld [vmem:[%s2876_s19 + $0x68] sm:$0xff] }
  0xf0   : > { %5686 = vst [vmem:[#allocation107_spill] sm:$0xff] %v4260_v24  ;;  %v4264_v63 = vpop.eup %2541  ;;  %v1811_v37 = vmul.f32 %v2534_v7, %v1810_v11  ;;  %v4267_v44 = vadd.f32 %v4256_v5, %v1489_v29  ;;  %v584_v27 = vmul.f32 %v4260_v24, %v2975_v42  ;;  %v1507_v25 = vmul.f32 %v4252_v36, %v3120_v4 }
  0xf1   : > { %5687 = vst [vmem:[#allocation108_spill] sm:$0xff] %v4264_v63  ;;  %v4277_v45 = vpop.eup %2543  ;;  %v698_v34 = vadd.f32 %v4264_v63, %v4260_v24  ;;  %v716_v22 = vmul.f32 %v4264_v63, %v2989_v47  ;;  %2549 = vpow2.f32 %v1204_v62  ;;  %vm1818_vm3 = vcmp.eq.f32.partialorder %v1817_v50, 8.507059e+37  ;;  %v4355_v24 = vld [vmem:[%s2876_s19 + $0x3d8] sm:$0xff] }
  0xf2   : > { %5688 = vst [vmem:[#allocation109_spill] sm:$0xff] %v4277_v45  ;;  %v1812_v33 = vadd.f32 %v2534_v7, %v1811_v37  ;;  %2551 = vrcp.f32 %v4267_v44  ;;  %v1468_v10 = vmul.f32 1.442695, %v1442_v59  ;;  %v4293_v11 = vpop.eup %2545  ;;  %v1639_v29 = vmul.f32 %v4036_v35, %v4256_v5  ;;  %v4307_v37 = vld [vmem:[%s2876_s19 + $0x2d8] sm:$0xff]  ;;  %v4310_v5 = vld [vmem:[%s2876_s19 + $0x160] sm:$0xff] }
  0xf3   : > { %5691 = vst [vmem:[#allocation110_spill] sm:$0xff] %v4293_v11  ;;  %v732_v36 = vadd.f32 %v716_v22, %v584_v27  ;;  %v830_v43 = vadd.f32 %v4277_v45, %v698_v34  ;;  %v273_v63 = vmax.f32 %v4272_v17, %v4275_v2  ;;  %v848_v50 = vmul.f32 %v4277_v45, %v2991_v48 }
  0xf4   : > { %v1816_v62 = vsel %vm4282_vm2, %v2534_v7, %v1812_v33  ;;  %v980_v59 = vmul.f32 %v4293_v11, %v2993_v49  ;;  %2553 = vpow2.f32 %v1336_v18  ;;  %v1523_v22 = vadd.f32 %v1507_v25, %v1391_v31  ;;  %v4322_v33 = vld [vmem:[%s2876_s19 + $0xe8] sm:$0xff] }
  0xf5   : > { %v4312_v27 = vpop.eup %2547  ;;  %v4314_v34 = vsel %vm1818_vm3, %v1820_v19, %v1816_v62  ;;  %vm1827_vm4 = vweird.f32 %v4267_v44  ;;  %v962_v7 = vadd.f32 %v4293_v11, %v830_v43  ;;  %v864_v45 = vadd.f32 %v848_v50, %v732_v36  ;;  %v4336_v11 = vld [vmem:[%s2876_s19 + $0x358] sm:$0xff]  ;;  %v4340_v36 = vld [vmem:[%s2876_s19 + $0x1e0] sm:$0xff] }
  0xf6   : > { %5692 = vst [vmem:[#allocation111_spill] sm:$0xff] %v4312_v27  ;;  %v1928_v18 = vmul.f32 %v4314_v34, %v4228_v61  ;;  %v1112_v19 = vmul.f32 %v4312_v27, %v2996_v52  ;;  %2555 = vpow2.f32 %v1468_v10  ;;  %v1574_v43 = vsub.f32 %v4169_v14, %v4190_v60 }
  0xf7   : > { %5693 = vst [vmem:[#allocation112_spill] sm:$0xff] %v4314_v34  ;;  %v4328_v62 = vpop.eup %2549  ;;  %v1094_v31 = vadd.f32 %v4312_v27, %v962_v7  ;;  %v404_v25 = vmax.f32 %v4226_v39, %v4307_v37  ;;  %v306_v61 = vmax.f32 %v273_v63, %v4310_v5  ;;  %v1831_v10 = vand.u32 2147483647, %v4267_v44  ;;  %v4349_v39 = vld [vmem:[%s2876_s19 + $0x168] sm:$0xff] }
  0xf8   : > { %5694 = vst [vmem:[#allocation113_spill] sm:$0xff] %v4328_v62  ;;  %v2552_v50 = vpop.eup %2551  ;;  %v996_v7 = vadd.f32 %v980_v59, %v864_v45  ;;  %v1244_v14 = vmul.f32 %v4328_v62, %v2998_v53  ;;  %v274_v60 = vmax.f32 %v4319_v9, %v4322_v33  ;;  %v1833_v34 = vand.u32 2147483648, %v4267_v44 }
  0xf9   : > { %1944 = vst [vmem:[%s3307_s29 + $0x40] sm:$0xff] %v1928_v18  ;;  %v1823_v63 = vmul.f32 %v2552_v50, %v4267_v44  ;;  %v1226_v18 = vadd.f32 %v4328_v62, %v1094_v31  ;;  %v1600_v27 = vmul.f32 1.442695, %v1574_v43  ;;  %vm1828_vm5 = vweird.f32 %v2552_v50  ;;  %v4369_v43 = vld [vmem:[%s2876_s19 + $0x458] sm:$0xff] }
  0xfa   : > { %v4357_v21 = vpop.eup %2553  ;;  %v1128_v45 = vadd.f32 %v1112_v19, %v996_v7  ;;  %v437_v59 = vmax.f32 %v404_v25, %v4336_v11  ;;  %v339_v23 = vmax.f32 %v306_v61, %v4340_v36  ;;  %v307_v62 = vmax.f32 %v274_v60, %v4349_v39  ;;  %v4378_v7 = vld [vmem:[%s2876_s19 + $0x260] sm:$0xff]  ;;  %vm4388_vm6 = vmor %vm1827_vm4, %vm1828_vm5 }
  0xfb   : > { %5695 = vst [vmem:[#allocation114_spill] sm:$0xff] %v4357_v21  ;;  %v1824_v26 = vsub.f32 1.0, %v1823_v63  ;;  %v1358_v31 = vadd.f32 %v4357_v21, %v1226_v18  ;;  %2557 = vpow2.f32 %v1600_v27  ;;  %v1376_v25 = vmul.f32 %v4357_v21, %v3000_v54 }
  0xfc   : > { %v4372_v3 = vpop.eup %2555  ;;  %v1260_v19 = vadd.f32 %v1244_v14, %v1128_v45  ;;  %v470_v61 = vmax.f32 %v437_v59, %v4355_v24  ;;  %v1655_v63 = vadd.f32 %v1639_v29, %v1523_v22  ;;  %v275_v27 = vmax.f32 %v4362_v58, %v4365_v30  ;;  %v4399_v29 = vld [vmem:[%s2876_s19 + $0x170] sm:$0xff] }
  0xfd   : > { %5696 = vst [vmem:[#allocation115_spill] sm:$0xff] %v4372_v3  ;;  %v1825_v18 = vmul.f32 %v2552_v50, %v1824_v26  ;;  %vm4392_vm7 = vcmp.eq.f32.partialorder %v1831_v10, 8.507059e+37  ;;  %v1834_v45 = vor.u32 1.1754944e-38, %v1833_v34  ;;  %v1490_v59 = vadd.f32 %v4372_v3, %v1358_v31 }
  0xfe   : > { %v503_v26 = vmax.f32 %v470_v61, %v4369_v43  ;;  %5701 = vst [vmem:[#allocation116_spill] sm:$0xff] %v4399_v29  ;;  %v1508_v44 = vmul.f32 %v4372_v3, %v3002_v55  ;;  %v372_v21 = vmax.f32 %v339_v23, %v4378_v7  ;;  %v340_v56 = vmax.f32 %v307_v62, %v4381_v15  ;;  %v4418_v62 = vld [vmem:[%s2876_s19 + $0x268] sm:$0xff] }
  0xff   : > { %v1826_v22 = vadd.f32 %v2552_v50, %v1825_v18  ;;  %v1392_v10 = vadd.f32 %v1376_v25, %v1260_v19 }
 0x100   : > { %v519_v51 = vsub.f32 %v3966_v28, %v503_v26  ;;  %v651_v34 = vsub.f32 %v5702_v16, %v503_v26  ;;  %v783_v31 = vsub.f32 %v4003_v57, %v503_v26  ;;  %v915_v3 = vsub.f32 %v4054_v6, %v503_v26 }
 0x101   : > { %v4411_v61 = vpop.eup %2557  ;;  %v1830_v18 = vsel %vm4388_vm6, %v2552_v50, %v1826_v22  ;;  %v1047_v23 = vsub.f32 %v4210_v32, %v503_v26  ;;  %v4421_v28 = vmax.f32 %v275_v27, %v4399_v29  ;;  %v1179_v50 = vsub.f32 %v4307_v37, %v503_v26 }
 0x102   : > { %5703 = vst [vmem:[#allocation82_spill] sm:$0xff] %v4411_v61  ;;  %v4425_v57 = vsel %vm4392_vm7, %v1834_v45, %v1830_v18  ;;  %v4428_v16 = vadd.f32 %v4411_v61, %v1490_v59  ;;  %v546_v19 = vmul.f32 1.442695, %v519_v51  ;;  %v678_v32 = vmul.f32 1.442695, %v651_v34  ;;  %v4435_v45 = vld [vmem:[%s2876_s19 + $0x360] sm:$0xff] }
 0x103   : > { %5704 = vst [vmem:[#allocation117_spill] sm:$0xff] %v4425_v57  ;;  %v1929_v6 = vmul.f32 %v4425_v57, %v1655_v63  ;;  %v810_v25 = vmul.f32 1.442695, %v783_v31  ;;  %v405_v14 = vmax.f32 %v372_v21, %v4409_v46  ;;  %v1524_v27 = vadd.f32 %v1508_v44, %v1392_v10  ;;  %v4443_v21 = vld [vmem:[%s2876_s19 + $0x2e8] sm:$0xff]  ;;  %v4448_v10 = vld [vmem:[%s2876_s19 + $0x3e0] sm:$0xff] }
 0x104   : > { %2559 = vrcp.f32 %v4428_v16  ;;  %v942_v60 = vmul.f32 1.442695, %v915_v3  ;;  %v373_v59 = vmax.f32 %v340_v56, %v4418_v62  ;;  %v1640_v51 = vmul.f32 %v3892_v1, %v4411_v61  ;;  %v4451_v56 = vld [vmem:[%s2876_s19 + $0x1f0] sm:$0xff] }
 0x105   : > { %1945 = vst [vmem:[%s3307_s29 + $0x48] sm:$0xff] %v1929_v6  ;;  %v1845_v37 = vand.u32 2147483647, %v4428_v16  ;;  %2561 = vpow2.f32 %v546_v19  ;;  %v1074_v63 = vmul.f32 1.442695, %v1047_v23  ;;  %v1311_v44 = vsub.f32 %v4336_v11, %v503_v26  ;;  %v4457_v19 = vld [vmem:[%s2876_s19 + $0x460] sm:$0xff] }
 0x106   : > { %2563 = vpow2.f32 %v678_v32  ;;  %v1206_v22 = vmul.f32 1.442695, %v1179_v50  ;;  %v1443_v3 = vsub.f32 %v4355_v24, %v503_v26  ;;  %v1847_v1 = vand.u32 2147483648, %v4428_v16  ;;  %v4462_v6 = vld [vmem:[%s2876_s19 + $0x368] sm:$0xff] }
 0x107   : > { %2565 = vpow2.f32 %v810_v25  ;;  %v1575_v34 = vsub.f32 %v4369_v43, %v503_v26  ;;  %v438_v31 = vmax.f32 %v405_v14, %v4435_v45  ;;  %v1338_v18 = vmul.f32 1.442695, %v1311_v44 }
 0x108   : > { %2567 = vpow2.f32 %v942_v60  ;;  %v1470_v23 = vmul.f32 1.442695, %v1443_v3  ;;  %v406_v11 = vmax.f32 %v373_v59, %v4443_v21  ;;  %v1656_v43 = vadd.f32 %v1640_v51, %v1524_v27 }
 0x109   : > { %2569 = vpow2.f32 %v1074_v63  ;;  %v1602_v24 = vmul.f32 1.442695, %v1575_v34  ;;  %v471_v50 = vmax.f32 %v438_v31, %v4448_v10  ;;  %vm1841_vm8 = vweird.f32 %v4428_v16  ;;  %v4489_v34 = vld [vmem:[%s2876_s19 + $0x3e8] sm:$0xff] }
 0x10a   : > { %v2560_v25 = vpop.eup %2559  ;;  %vm4467_vm9 = vcmp.eq.f32.partialorder %v1845_v37, 8.507059e+37  ;;  %2571 = vpow2.f32 %v1206_v22  ;;  %v1848_v59 = vor.u32 1.1754944e-38, %v1847_v1  ;;  %v439_v51 = vmax.f32 %v406_v11, %v4462_v6 }
 0x10b   : > { %v4471_v14 = vpop.eup %2561  ;;  %v1837_v60 = vmul.f32 %v2560_v25, %v4428_v16  ;;  %2573 = vpow2.f32 %v1338_v18  ;;  %v4475_v63 = vmax.f32 %v471_v50, %v4457_v19  ;;  %vm1842_vm10 = vweird.f32 %v2560_v25 }
 0x10c   : > { %5707 = vst [vmem:[#allocation118_spill] sm:$0xff] %v4471_v14  ;;  %v4477_v44 = vpop.eup %2563  ;;  %v585_v27 = vmul.f32 %v4471_v14, %v3042_v38  ;;  %2575 = vpow2.f32 %v1470_v23  ;;  %vm4511_vm11 = vmor %vm1841_vm8, %vm1842_vm10 }
 0x10d   : > { %5708 = vst [vmem:[#allocation119_spill] sm:$0xff] %v4477_v44  ;;  %v4482_v37 = vpop.eup %2565  ;;  %v1838_v22 = vsub.f32 1.0, %v1837_v60  ;;  %v699_v3 = vadd.f32 %v4477_v44, %v4471_v14  ;;  %v717_v1 = vmul.f32 %v4477_v44, %v3047_v40  ;;  %2577 = vpow2.f32 %v1602_v24 }
 0x10e   : > { %5709 = vst [vmem:[#allocation120_spill] sm:$0xff] %v4482_v37  ;;  %v4491_v31 = vpop.eup %2567  ;;  %v849_v18 = vmul.f32 %v4482_v37, %v3050_v41  ;;  %v520_v23 = vsub.f32 %v4272_v17, %v4475_v63  ;;  %v652_v11 = vsub.f32 %v4275_v2, %v4475_v63  ;;  %v784_v50 = vsub.f32 %v4310_v5, %v4475_v63 }
 0x10f   : > { %v4501_v60 = vpop.eup %2569  ;;  %v1839_v32 = vmul.f32 %v2560_v25, %v1838_v22  ;;  %v733_v24 = vadd.f32 %v717_v1, %v585_v27  ;;  %v831_v57 = vadd.f32 %v4482_v37, %v699_v3  ;;  %v981_v61 = vmul.f32 %v4491_v31, %v3057_v8 }
 0x110   : > { %v4506_v44 = vpop.eup %2571  ;;  %v1113_v5 = vmul.f32 %v4501_v60, %v3064_v13  ;;  %v548_v2 = vmul.f32 1.442695, %v520_v23  ;;  %v680_v22 = vmul.f32 1.442695, %v652_v11  ;;  %v472_v27 = vmax.f32 %v439_v51, %v4489_v34 }
 0x111   : > { %v4518_v3 = vpop.eup %2573  ;;  %v1840_v1 = vadd.f32 %v2560_v25, %v1839_v32  ;;  %v865_v37 = vadd.f32 %v849_v18, %v733_v24  ;;  %v963_v14 = vadd.f32 %v4491_v31, %v831_v57  ;;  %v812_v0 = vmul.f32 1.442695, %v784_v50 }
 0x112   : > { %v4521_v29 = vpop.eup %2575  ;;  %v1245_v16 = vmul.f32 %v4506_v44, %v3081_v20  ;;  %2579 = vpow2.f32 %v548_v2  ;;  %v916_v23 = vsub.f32 %v4340_v36, %v4475_v63  ;;  %v1048_v51 = vsub.f32 %v4378_v7, %v4475_v63 }
 0x113   : > { %v4529_v11 = vpop.eup %2577  ;;  %v1844_v32 = vsel %vm4511_vm11, %v2560_v25, %v1840_v1  ;;  %v997_v57 = vadd.f32 %v981_v61, %v865_v37  ;;  %v1095_v18 = vadd.f32 %v4501_v60, %v963_v14  ;;  %v1377_v50 = vmul.f32 %v4518_v3, %v5621_v12  ;;  %v4545_v25 = vld [vmem:[%s2876_s19 + $0x468] sm:$0xff] }
 0x114   : > { %5712 = vst [vmem:[#allocation121_spill] sm:$0xff] %v4529_v11  ;;  %v4538_v24 = vsel %vm4467_vm9, %v1848_v59, %v1844_v32  ;;  %v1509_v36 = vmul.f32 %v4521_v29, %v3120_v4  ;;  %2581 = vpow2.f32 %v680_v22  ;;  %v944_v7 = vmul.f32 1.442695, %v916_v23  ;;  %v4568_v32 = vld [vmem:[%s2876_s19 + $0x270] sm:$0xff] }
 0x115   : > { %5713 = vst [vmem:[#allocation122_spill] sm:$0xff] %v4538_v24  ;;  %v1930_v2 = vmul.f32 %v4538_v24, %v1656_v43  ;;  %v1129_v17 = vadd.f32 %v1113_v5, %v997_v57  ;;  %v1227_v61 = vadd.f32 %v4506_v44, %v1095_v18  ;;  %2583 = vpow2.f32 %v812_v0 }
 0x116   : > { %v1641_v14 = vmul.f32 %v4036_v35, %v4529_v11  ;;  %v1076_v37 = vmul.f32 1.442695, %v1048_v51  ;;  %v1180_v26 = vsub.f32 %v4409_v46, %v4475_v63  ;;  %v1312_v59 = vsub.f32 %v4435_v45, %v4475_v63 }
 0x117   : > { %1946 = vst [vmem:[%s3307_s29 + $0x50] sm:$0xff] %v1930_v2  ;;  %v1261_v22 = vadd.f32 %v1245_v16, %v1129_v17  ;;  %v1359_v43 = vadd.f32 %v4518_v3, %v1227_v61  ;;  %2585 = vpow2.f32 %v944_v7  ;;  %v1444_v0 = vsub.f32 %v4448_v10, %v4475_v63 }
 0x118   : > { %v4557_v5 = vpop.eup %2579  ;;  %v1208_v1 = vmul.f32 1.442695, %v1180_v26  ;;  %v1340_v35 = vmul.f32 1.442695, %v1312_v59  ;;  %v1576_v23 = vsub.f32 %v4457_v19, %v4475_v63  ;;  %v4562_v46 = vmax.f32 %v472_v27, %v4545_v25 }
 0x119   : > { %v1393_v51 = vadd.f32 %v1377_v50, %v1261_v22  ;;  %v1491_v45 = vadd.f32 %v4521_v29, %v1359_v43  ;;  %v586_v16 = vmul.f32 %v4557_v5, %v2975_v42  ;;  %2587 = vpow2.f32 %v1076_v37 }
 0x11a   : > { %v4570_v10 = vpop.eup %2581  ;;  %2589 = vpow2.f32 %v1208_v1  ;;  %v1472_v57 = vmul.f32 1.442695, %v1444_v0  ;;  %v521_v18 = vsub.f32 %v4319_v9, %v4562_v46  ;;  %v653_v19 = vsub.f32 %v4322_v33, %v4562_v46 }
 0x11b   : > { %v4576_v63 = vpop.eup %2583  ;;  %v1525_v27 = vadd.f32 %v1509_v36, %v1393_v51  ;;  %v4579_v50 = vadd.f32 %v4529_v11, %v1491_v45  ;;  %v700_v7 = vadd.f32 %v4570_v10, %v4557_v5  ;;  %v718_v2 = vmul.f32 %v4570_v10, %v2989_v47 }
 0x11c   : > { %v850_v17 = vmul.f32 %v4576_v63, %v2991_v48  ;;  %2591 = vpow2.f32 %v1340_v35  ;;  %v1604_v9 = vmul.f32 1.442695, %v1576_v23  ;;  %v5714_v33 = vmax.f32 %v4421_v28, %v4451_v56 }
 0x11d   : > { %v4593_v36 = vpop.eup %2585  ;;  %v4595_v37 = vadd.f32 %v1641_v14, %v1525_v27  ;;  %2593 = vrcp.f32 %v4579_v50  ;;  %v550_v26 = vmul.f32 1.442695, %v521_v18  ;;  %v682_v59 = vmul.f32 1.442695, %v653_v19 }
 0x11e   : > { %v4591_v61 = vmax.f32 %v5714_v33, %v4568_v32  ;;  %vm1855_vm12 = vweird.f32 %v4579_v50  ;;  %v734_v22 = vadd.f32 %v718_v2, %v586_v16  ;;  %v832_v43 = vadd.f32 %v4576_v63, %v700_v7 }
 0x11f   : > { %v982_v0 = vmul.f32 %v4593_v36, %v2993_v49  ;;  %v4602_v1 = vpop.eup %2587  ;;  %v1859_v28 = vand.u32 2147483647, %v4579_v50  ;;  %v1861_v35 = vand.u32 2147483648, %v4579_v50  ;;  %2595 = vpow2.f32 %v1472_v57 }
 0x120   : > { %v785_v14 = vsub.f32 %v4349_v39, %v4562_v46  ;;  %v4608_v23 = vpop.eup %2589  ;;  %v866_v51 = vadd.f32 %v850_v17, %v734_v22  ;;  %v964_v45 = vadd.f32 %v4593_v36, %v832_v43  ;;  %v1114_v16 = vmul.f32 %v4602_v1, %v2996_v52 }
 0x121   : > { %5715 = vst [vmem:[#allocation123_spill] sm:$0xff] %v4608_v23  ;;  %2597 = vpow2.f32 %v1604_v9  ;;  %v1246_v18 = vmul.f32 %v4608_v23, %v2998_v53  ;;  %v917_v57 = vsub.f32 %v4381_v15, %v4562_v46  ;;  %v1049_v2 = vsub.f32 %v4418_v62, %v4562_v46 }
 0x122   : > { %2599 = vpow2.f32 %v550_v26  ;;  %v814_v19 = vmul.f32 1.442695, %v785_v14  ;;  %v4617_v27 = vpop.eup %2591  ;;  %v998_v39 = vadd.f32 %v982_v0, %v866_v51  ;;  %v1096_v7 = vadd.f32 %v4602_v1, %v964_v45 }
 0x123   : > { %5716 = vst [vmem:[#allocation124_spill] sm:$0xff] %v4617_v27  ;;  %2601 = vpow2.f32 %v682_v59  ;;  %v2594_v17 = vpop.eup %2593  ;;  %vm4622_vm13 = vcmp.eq.f32.partialorder %v1859_v28, 8.507059e+37  ;;  %v946_v33 = vmul.f32 1.442695, %v917_v57  ;;  %v1181_v26 = vsub.f32 %v4443_v21, %v4562_v46 }
 0x124   : > { %2603 = vpow2.f32 %v814_v19  ;;  %v1851_v15 = vmul.f32 %v2594_v17, %v4579_v50  ;;  %v1130_v22 = vadd.f32 %v1114_v16, %v998_v39  ;;  %v1228_v43 = vadd.f32 %v4608_v23, %v1096_v7 }
 0x125   : > { %v1378_v59 = vmul.f32 %v4617_v27, %v3000_v54  ;;  %v4632_v0 = vpop.eup %2595  ;;  %2605 = vpow2.f32 %v946_v33  ;;  %v1078_v62 = vmul.f32 1.442695, %v1049_v2  ;;  %v1210_v28 = vmul.f32 1.442695, %v1181_v26 }
 0x126   : > { %5719 = vst [vmem:[#allocation125_spill] sm:$0xff] %v4632_v0  ;;  %v1313_v14 = vsub.f32 %v4462_v6, %v4562_v46  ;;  %v1852_v45 = vsub.f32 1.0, %v1851_v15  ;;  %vm1856_vm14 = vweird.f32 %v2594_v17  ;;  %v1262_v21 = vadd.f32 %v1246_v18, %v1130_v22 }
 0x127   : > { %v4636_v51 = vpop.eup %2597  ;;  %v1360_v16 = vadd.f32 %v4617_v27, %v1228_v43  ;;  %v1862_v57 = vor.u32 1.1754944e-38, %v1861_v35  ;;  %2607 = vpow2.f32 %v1078_v62  ;;  %v1445_v7 = vsub.f32 %v4489_v34, %v4562_v46  ;;  %vm4654_vm15 = vmor %vm1855_vm12, %vm1856_vm14  ;;  %v4663_v62 = vld [vmem:[%s2876_s19 + $0x2f0] sm:$0xff] }
 0x128   : > { %5720 = vst [vmem:[#allocation126_spill] sm:$0xff] %v4636_v51  ;;  %v4639_v19 = vpop.eup %2599  ;;  %v1342_v39 = vmul.f32 1.442695, %v1313_v14  ;;  %v1853_v6 = vmul.f32 %v2594_v17, %v1852_v45  ;;  %v1510_v18 = vmul.f32 %v4632_v0, %v3002_v55  ;;  %v1394_v34 = vadd.f32 %v1378_v59, %v1262_v21  ;;  %v4674_v59 = vld [vmem:[%s2876_s19 + $0xf8] sm:$0xff] }
 0x129   : > { %v4643_v2 = vpop.eup %2601  ;;  %v1492_v33 = vadd.f32 %v4632_v0, %v1360_v16  ;;  %v587_v26 = vmul.f32 %v4639_v19, %v3042_v38  ;;  %2609 = vpow2.f32 %v1210_v28  ;;  %v1474_v16 = vmul.f32 1.442695, %v1445_v7  ;;  %v4671_v0 = vld [vmem:[%s2876_s19 + $0x78] sm:$0xff] }
 0x12a   : > { %5721 = vst [vmem:[#allocation127_spill] sm:$0xff] %v4643_v2  ;;  %v4650_v15 = vpop.eup %2603  ;;  %v701_v22 = vadd.f32 %v4643_v2, %v4639_v19  ;;  %v719_v43 = vmul.f32 %v4643_v2, %v3047_v40  ;;  %v1854_v14 = vadd.f32 %v2594_v17, %v1853_v6  ;;  %2611 = vpow2.f32 %v1342_v39 }
 0x12b   : > { %5722 = vst [vmem:[#allocation128_spill] sm:$0xff] %v4650_v15  ;;  %v4666_v45 = vadd.f32 %v4636_v51, %v1492_v33  ;;  %v851_v50 = vmul.f32 %v4650_v15, %v3050_v41  ;;  %v4676_v21 = vpop.eup %2605  ;;  %v1577_v6 = vsub.f32 %v4545_v25, %v4562_v46  ;;  %v407_v7 = vmax.f32 %v4591_v61, %v4663_v62 }
 0x12c   : > { %5725 = vst [vmem:[#allocation129_spill] sm:$0xff] %v4676_v21  ;;  %v735_v24 = vadd.f32 %v719_v43, %v587_v26  ;;  %v833_v28 = vadd.f32 %v4650_v15, %v701_v22  ;;  %v1858_v33 = vsel %vm4654_vm15, %v2594_v17, %v1854_v14  ;;  %v4693_v22 = vld [vmem:[%s2876_s19 + $0x370] sm:$0xff]  ;;  %v276_v25 = vmax.f32 %v4671_v0, %v4674_v59 }
 0x12d   : > { %2613 = vrcp.f32 %v4666_v45  ;;  %v4686_v27 = vpop.eup %2607  ;;  %v4690_v26 = vsel %vm4622_vm13, %v1862_v57, %v1858_v33  ;;  %v983_v61 = vmul.f32 %v4676_v21, %v3057_v8  ;;  %v4705_v57 = vld [vmem:[%s2876_s19 + $0x178] sm:$0xff]  ;;  %v1526_v35 = vadd.f32 %v1510_v18, %v1394_v34  ;;  %v4710_v43 = vld [vmem:[%s2887_s21 + $0x10] ss:$0 sm:$0xff] }
 0x12e   : > { %5726 = vst [vmem:[#allocation130_spill] sm:$0xff] %v4686_v27  ;;  %v867_v39 = vadd.f32 %v851_v50, %v735_v24  ;;  %v1931_v46 = vmul.f32 %v4690_v26, %v4595_v37  ;;  %v965_v17 = vadd.f32 %v4676_v21, %v833_v28  ;;  %v1115_v9 = vmul.f32 %v4686_v27, %v3064_v13  ;;  %v4715_v50 = vld [vmem:[%s2876_s19 + $0x3f0] sm:$0xff] }
 0x12f   : > { %5727 = vst [vmem:[#allocation131_spill] sm:$0xff] %v4690_v26  ;;  %v4707_v24 = vpop.eup %2609  ;;  %v1642_v14 = vmul.f32 %v4710_v43, %v4636_v51  ;;  %2615 = vpow2.f32 %v1474_v16  ;;  %v1606_v37 = vmul.f32 1.442695, %v1577_v6  ;;  %v440_v21 = vmax.f32 %v407_v7, %v4693_v22  ;;  %v4726_v51 = vld [vmem:[%s2876_s19 + $0x470] sm:$0xff] }
 0x130   : > { %5728 = vst [vmem:[#allocation132_spill] sm:$0xff] %v4707_v24  ;;  %v999_v28 = vadd.f32 %v983_v61, %v867_v39  ;;  %v1097_v33 = vadd.f32 %v4686_v27, %v965_v17  ;;  %v1247_v26 = vmul.f32 %v4707_v24, %v3081_v20  ;;  %v4722_v18 = vpop.eup %2611  ;;  %v1875_v34 = vand.u32 2147483648, %v4666_v45  ;;  %v4734_v61 = vld [vmem:[%s2876_s19 + $0x1f8] sm:$0xff] }
 0x131   : > { %1947 = vst [vmem:[%s3307_s29 + $0x58] sm:$0xff] %v1931_v46  ;;  %2617 = vpow2.f32 %v1606_v37  ;;  %v309_v16 = vmax.f32 %v276_v25, %v4705_v57  ;;  %v1379_v46 = vmul.f32 %v4722_v18, %v5621_v12  ;;  %v473_v17 = vmax.f32 %v440_v21, %v4715_v50 }
 0x132   : > { %5729 = vst [vmem:[#allocation133_spill] sm:$0xff] %v4722_v18  ;;  %v1131_v23 = vadd.f32 %v1115_v9, %v999_v28  ;;  %v1229_v39 = vadd.f32 %v4707_v24, %v1097_v33  ;;  %v1658_v7 = vadd.f32 %v1642_v14, %v1526_v35  ;;  %vm1869_vm0 = vweird.f32 %v4666_v45 }
 0x133   : > { %v2614_v6 = vpop.eup %2613  ;;  %v1873_v37 = vand.u32 2147483647, %v4666_v45  ;;  %v506_v9 = vmax.f32 %v473_v17, %v4726_v51  ;;  %v1876_v21 = vor.u32 1.1754944e-38, %v1875_v34  ;;  %v342_v35 = vmax.f32 %v309_v16, %v4734_v61  ;;  %v4754_v34 = vld [vmem:[%s2876_s19 + $0x278] sm:$0xff] }
 0x134   : > { %v1865_v27 = vmul.f32 %v2614_v6, %v4666_v45  ;;  %v1263_v11 = vadd.f32 %v1247_v26, %v1131_v23  ;;  %v1361_v25 = vadd.f32 %v4722_v18, %v1229_v39  ;;  %vm1870_vm1 = vweird.f32 %v2614_v6  ;;  %v5732_v18 = vld [vmem:[#allocation116_spill] sm:$0xff] }
 0x135   : > { %v4741_v28 = vpop.eup %2615  ;;  %v522_v23 = vsub.f32 %v4362_v58, %v506_v9  ;;  %v654_v17 = vsub.f32 %v4365_v30, %v506_v9  ;;  %v918_v2 = vsub.f32 %v4451_v56, %v506_v9  ;;  %vm4758_vm2 = vmor %vm1869_vm0, %vm1870_vm1  ;;  %vm1874_vm3 = vcmp.eq.f32.partialorder %v1873_v37, 8.507059e+37 }
 0x136   : > { %5730 = vst [vmem:[#allocation134_spill] sm:$0xff] %v4741_v28  ;;  %v1866_v33 = vsub.f32 1.0, %v1865_v27  ;;  %v1395_v14 = vadd.f32 %v1379_v46, %v1263_v11  ;;  %v1493_v24 = vadd.f32 %v4741_v28, %v1361_v25  ;;  %v1511_v15 = vmul.f32 %v4741_v28, %v3120_v4  ;;  %v4766_v46 = vld [vmem:[%s2887_s21 + $0x18] ss:$0 sm:$0xff] }
 0x137   : > { %v4748_v26 = vpop.eup %2617  ;;  %v786_v27 = vsub.f32 %v5732_v18, %v506_v9  ;;  %v552_v18 = vmul.f32 1.442695, %v522_v23  ;;  %v684_v25 = vmul.f32 1.442695, %v654_v17  ;;  %v948_v45 = vmul.f32 1.442695, %v918_v2 }
 0x138   : > { %5731 = vst [vmem:[#allocation135_spill] sm:$0xff] %v4748_v26  ;;  %v1867_v39 = vmul.f32 %v2614_v6, %v1866_v33  ;;  %v1527_v16 = vadd.f32 %v1511_v15, %v1395_v14  ;;  %v4763_v58 = vadd.f32 %v4748_v26, %v1493_v24  ;;  %v1643_v30 = vmul.f32 %v4766_v46, %v4748_v26  ;;  %v4782_v2 = vld [vmem:[%s2876_s19 + $0x2f8] sm:$0xff] }
 0x139   : > { %v816_v33 = vmul.f32 1.442695, %v786_v27  ;;  %v375_v28 = vmax.f32 %v342_v35, %v4754_v34  ;;  %v1050_v14 = vsub.f32 %v4568_v32, %v506_v9  ;;  %v1314_v32 = vsub.f32 %v4693_v22, %v506_v9  ;;  %v4789_v27 = vld [vmem:[%s2876_s19 + $0x378] sm:$0xff] }
 0x13a   : > { %v1868_v56 = vadd.f32 %v2614_v6, %v1867_v39  ;;  %2619 = vrcp.f32 %v4763_v58  ;;  %v4774_v24 = vadd.f32 %v1643_v30, %v1527_v16  ;;  %v1887_v37 = vand.u32 2147483647, %v4763_v58 }
 0x13b   : > { %2621 = vpow2.f32 %v552_v18  ;;  %v1182_v39 = vsub.f32 %v4663_v62, %v506_v9  ;;  %vm1883_vm4 = vweird.f32 %v4763_v58  ;;  %v1889_v62 = vand.u32 2147483648, %v4763_v58 }
 0x13c   : > { %v1872_v15 = vsel %vm4758_vm2, %v2614_v6, %v1868_v56  ;;  %2623 = vpow2.f32 %v684_v25  ;;  %v1080_v6 = vmul.f32 1.442695, %v1050_v14  ;;  %v408_v11 = vmax.f32 %v375_v28, %v4782_v2 }
 0x13d   : > { %v4777_v23 = vsel %vm1874_vm3, %v1876_v21, %v1872_v15  ;;  %2625 = vpow2.f32 %v816_v33  ;;  %v1212_v17 = vmul.f32 1.442695, %v1182_v39  ;;  %v1446_v21 = vsub.f32 %v4715_v50, %v506_v9  ;;  %v4800_v50 = vld [vmem:[%s2887_s21 + $0x20] sm:$0xff] }
 0x13e   : > { %5735 = vst [vmem:[#allocation116_spill] sm:$0xff] %v4777_v23  ;;  %v1932_v35 = vmul.f32 %v4777_v23, %v1658_v7  ;;  %2627 = vpow2.f32 %v948_v45  ;;  %v1578_v7 = vsub.f32 %v4726_v51, %v506_v9  ;;  %vm4795_vm5 = vcmp.eq.f32.partialorder %v1887_v37, 8.507059e+37  ;;  %v4807_v9 = vld [vmem:[%s2876_s19 + $0x3f8] sm:$0xff] }
 0x13f   : > { %2629 = vpow2.f32 %v1080_v6  ;;  %v1344_v22 = vmul.f32 1.442695, %v1314_v32  ;;  %v1476_v18 = vmul.f32 1.442695, %v1446_v21  ;;  %v441_v51 = vmax.f32 %v408_v11, %v4789_v27 }
 0x140   : > { %1948 = vst [vmem:[%s3307_s29 + $0x60] sm:$0xff] %v1932_v35  ;;  %v2620_v16 = vpop.eup %2619  ;;  %2631 = vpow2.f32 %v1212_v17  ;;  %v1608_v33 = vmul.f32 1.442695, %v1578_v7  ;;  %v4814_v15 = vperm.slane %v4800_v50, 0  ;;  %v4817_v14 = vperm.slane %v4800_v50, 1  ;;  %v4826_v17 = vld [vmem:[%s2876_s19 + $0x478] sm:$0xff] }
 0x141   : > { %v4802_v56 = vpop.eup %2621  ;;  %v1879_v25 = vmul.f32 %v2620_v16, %v4763_v58  ;;  %vm1884_vm6 = vweird.f32 %v2620_v16  ;;  %2633 = vpow2.f32 %v1344_v22  ;;  %v1890_v32 = vor.u32 1.1754944e-38, %v1889_v62 }
 0x142   : > { %5738 = vst [vmem:[#allocation136_spill] sm:$0xff] %v4802_v56  ;;  %v4809_v28 = vpop.eup %2623  ;;  %v588_v45 = vmul.f32 %v4802_v56, %v2975_v42  ;;  %2635 = vpow2.f32 %v1476_v18  ;;  %v474_v7 = vmax.f32 %v441_v51, %v4807_v9  ;;  %vm4843_vm7 = vmor %vm1883_vm4, %vm1884_vm6  ;;  %v5744_v51 = vld [vmem:[#allocation8_spill] sm:$0xff]  ;;  %v4856_v58 = vperm.slane %v4800_v50, 2 }
 0x143   : > { %5739 = vst [vmem:[#allocation137_spill] sm:$0xff] %v4809_v28  ;;  %v4819_v37 = vpop.eup %2625  ;;  %v1880_v39 = vsub.f32 1.0, %v1879_v25  ;;  %v702_v35 = vadd.f32 %v4809_v28, %v4802_v56  ;;  %v720_v6 = vmul.f32 %v4809_v28, %v2989_v47  ;;  %2637 = vpow2.f32 %v1608_v33 }
 0x144   : > { %5740 = vst [vmem:[#allocation138_spill] sm:$0xff] %v4819_v37  ;;  %v4828_v42 = vpop.eup %2627  ;;  %v852_v21 = vmul.f32 %v4819_v37, %v2991_v48  ;;  %v507_v33 = vmax.f32 %v474_v7, %v4826_v17 }
 0x145   : > { %v4833_v11 = vpop.eup %2629  ;;  %v1881_v22 = vmul.f32 %v2620_v16, %v1880_v39  ;;  %v736_v25 = vadd.f32 %v720_v6, %v588_v45  ;;  %v834_v23 = vadd.f32 %v4819_v37, %v702_v35  ;;  %v984_v47 = vmul.f32 %v4828_v42, %v2993_v49  ;;  %v5745_v39 = vld [vmem:[#allocation9_spill] sm:$0xff] }
 0x146   : > { %v4838_v18 = vpop.eup %2631  ;;  %v1116_v48 = vmul.f32 %v4833_v11, %v2996_v52  ;;  %v608_v45 = vmul.f32 %v5744_v51, %v4814_v15  ;;  %v740_v49 = vmul.f32 %v5745_v39, %v4817_v14  ;;  %v523_v28 = vsub.f32 %v4671_v0, %v507_v33 }
 0x147   : > { %5741 = vst [vmem:[#allocation139_spill] sm:$0xff] %v4838_v18  ;;  %v1882_v35 = vadd.f32 %v2620_v16, %v1881_v22  ;;  %v868_v6 = vadd.f32 %v852_v21, %v736_v25  ;;  %v966_v26 = vadd.f32 %v4828_v42, %v834_v23  ;;  %v4858_v37 = vpop.eup %2633  ;;  %v655_v52 = vsub.f32 %v4674_v59, %v507_v33 }
 0x148   : > { %5746 = vst [vmem:[#allocation8_spill] sm:$0xff] %v4858_v37  ;;  %v787_v7 = vsub.f32 %v4705_v57, %v507_v33  ;;  %v919_v51 = vsub.f32 %v4734_v61, %v507_v33  ;;  %v4864_v56 = vpop.eup %2635  ;;  %v1248_v25 = vmul.f32 %v4838_v18, %v2998_v53  ;;  %v1380_v59 = vmul.f32 %v4858_v37, %v3000_v54 }
 0x149   : > { %5747 = vst [vmem:[#allocation9_spill] sm:$0xff] %v4864_v56  ;;  %v1886_v21 = vsel %vm4843_vm7, %v2620_v16, %v1882_v35  ;;  %v1000_v22 = vadd.f32 %v984_v47, %v868_v6  ;;  %v1098_v23 = vadd.f32 %v4833_v11, %v966_v26  ;;  %v4871_v39 = vpop.eup %2637  ;;  %v554_v57 = vmul.f32 1.442695, %v523_v28 }
 0x14a   : > { %5748 = vst [vmem:[#allocation140_spill] sm:$0xff] %v4871_v39  ;;  %v4875_v0 = vsel %vm4795_vm5, %v1890_v32, %v1886_v21  ;;  %v686_v61 = vmul.f32 1.442695, %v655_v52  ;;  %v1512_v53 = vmul.f32 %v4864_v56, %v3002_v55  ;;  %v818_v62 = vmul.f32 1.442695, %v787_v7 }
 0x14b   : > { %5749 = vst [vmem:[#allocation141_spill] sm:$0xff] %v4875_v0  ;;  %v1933_v16 = vmul.f32 %v4875_v0, %v4774_v24  ;;  %v1132_v47 = vadd.f32 %v1116_v48, %v1000_v22  ;;  %v1230_v26 = vadd.f32 %v4838_v18, %v1098_v23  ;;  %2639 = vpow2.f32 %v554_v57 }
 0x14c   : > { %v950_v35 = vmul.f32 1.442695, %v919_v51  ;;  %v1051_v30 = vsub.f32 %v4754_v34, %v507_v33  ;;  %2641 = vpow2.f32 %v686_v61  ;;  %v1183_v28 = vsub.f32 %v4782_v2, %v507_v33 }
 0x14d   : > { %1949 = vst [vmem:[%s3307_s29 + $0x68] sm:$0xff] %v1933_v16  ;;  %v1264_v32 = vadd.f32 %v1248_v25, %v1132_v47  ;;  %v1362_v54 = vadd.f32 %v4858_v37, %v1230_v26  ;;  %2643 = vpow2.f32 %v818_v62  ;;  %v1315_v48 = vsub.f32 %v4789_v27, %v507_v33  ;;  %v5751_v25 = vld [vmem:[#allocation10_spill] sm:$0xff] }
 0x14e   : > { %v1082_v24 = vmul.f32 1.442695, %v1051_v30  ;;  %v1447_v6 = vsub.f32 %v4807_v9, %v507_v33  ;;  %2645 = vpow2.f32 %v950_v35  ;;  %v1214_v7 = vmul.f32 1.442695, %v1183_v28 }
 0x14f   : > { %v1396_v52 = vadd.f32 %v1380_v59, %v1264_v32  ;;  %v1494_v55 = vadd.f32 %v4864_v56, %v1362_v54  ;;  %v1644_v34 = vmul.f32 %v4710_v43, %v4871_v39  ;;  %v1346_v51 = vmul.f32 1.442695, %v1315_v48  ;;  %v5757_v48 = vld [vmem:[#allocation11_spill] sm:$0xff] }
 0x150   : > { %2647 = vpow2.f32 %v1082_v24  ;;  %v1579_v21 = vsub.f32 %v4826_v17, %v507_v33  ;;  %v756_v27 = vadd.f32 %v740_v49, %v608_v45  ;;  %v1478_v9 = vmul.f32 1.442695, %v1447_v6 }
 0x151   : > { %v1528_v22 = vadd.f32 %v1512_v53, %v1396_v52  ;;  %v4895_v2 = vadd.f32 %v4871_v39, %v1494_v55  ;;  %2649 = vpow2.f32 %v1214_v7  ;;  %v4897_v23 = vpop.eup %2639  ;;  %v872_v59 = vmul.f32 %v5751_v25, %v4856_v58  ;;  %v5776_v55 = vld [vmem:[#allocation22_spill] sm:$0xff] }
 0x152   : > { %5750 = vst [vmem:[#allocation142_spill] sm:$0xff] %v4897_v23  ;;  %2651 = vpow2.f32 %v1346_v51  ;;  %v4901_v57 = vpop.eup %2641  ;;  %v1610_v17 = vmul.f32 1.442695, %v1579_v21  ;;  %v4906_v33 = vperm.slane %v4800_v50, 3  ;;  %v589_v49 = vmul.f32 %v4897_v23, %v3042_v38 }
 0x153   : > { %5752 = vst [vmem:[#allocation10_spill] sm:$0xff] %v4901_v57  ;;  %2653 = vrcp.f32 %v4895_v2  ;;  %v1901_v43 = vand.u32 2147483647, %v4895_v2  ;;  %v4908_v61 = vpop.eup %2643  ;;  %v1903_v45 = vand.u32 2147483648, %v4895_v2  ;;  %v703_v16 = vadd.f32 %v4901_v57, %v4897_v23 }
 0x154   : > { %5753 = vst [vmem:[#allocation143_spill] sm:$0xff] %v4908_v61  ;;  %v721_v47 = vmul.f32 %v4901_v57, %v3047_v40  ;;  %v4917_v26 = vpop.eup %2645  ;;  %v4919_v53 = vadd.f32 %v1644_v34, %v1528_v22  ;;  %vm1897_vm8 = vweird.f32 %v4895_v2  ;;  %v853_v62 = vmul.f32 %v4908_v61, %v3050_v41  ;;  %v5761_v22 = vld [vmem:[#allocation12_spill] sm:$0xff] }
 0x155   : > { %5754 = vst [vmem:[#allocation144_spill] sm:$0xff] %v4917_v26  ;;  %v888_v35 = vadd.f32 %v872_v59, %v756_v27  ;;  %v835_v38 = vadd.f32 %v4908_v61, %v703_v16  ;;  %v985_v54 = vmul.f32 %v4917_v26, %v3057_v8  ;;  %2655 = vpow2.f32 %v1478_v9 }
 0x156   : > { %v4924_v30 = vpop.eup %2647  ;;  %v737_v32 = vadd.f32 %v721_v47, %v589_v49  ;;  %v1904_v28 = vor.u32 1.1754944e-38, %v1903_v45  ;;  %v1004_v6 = vmul.f32 %v5757_v48, %v4906_v33  ;;  %v4936_v41 = vperm.slane %v4800_v50, 4  ;;  %v4960_v45 = vld [vmem:[%s2887_s21 + $0x30] ss:$0 sm:$0xff]  ;;  %v225_v49 = vld [vmem:[%s2887_s21 + $0x28] sm:$0xff] }
 0x157   : > { %5755 = vst [vmem:[#allocation145_spill] sm:$0xff] %v4924_v30  ;;  %v4929_v40 = vpop.eup %2649  ;;  %v1117_v24 = vmul.f32 %v4924_v30, %v3064_v13  ;;  %vm4940_vm9 = vcmp.eq.f32.partialorder %v1901_v43, 8.507059e+37  ;;  %v967_v7 = vadd.f32 %v4917_v26, %v835_v38  ;;  %2657 = vpow2.f32 %v1610_v17  ;;  %v5793_v26 = vld [vmem:[#allocation35_spill] sm:$0xff] }
 0x158   : > { %5756 = vst [vmem:[#allocation146_spill] sm:$0xff] %v4929_v40  ;;  %v4938_v52 = vpop.eup %2651  ;;  %v869_v8 = vadd.f32 %v853_v62, %v737_v32  ;;  %v4946_v13 = vperm.slane %v4800_v50, 5  ;;  %v1249_v51 = vmul.f32 %v4929_v40, %v3081_v20  ;;  %v1020_v21 = vadd.f32 %v1004_v6, %v888_v35  ;;  %v5762_v20 = vld [vmem:[#allocation13_spill] sm:$0xff]  ;;  %v5763_v62 = vld [vmem:[#allocation15_spill] sm:$0xff] }
 0x159   : > { %5758 = vst [vmem:[#allocation11_spill] sm:$0xff] %v4938_v52  ;;  %v2654_v34 = vpop.eup %2653  ;;  %v1136_v27 = vmul.f32 %v5761_v22, %v4936_v41  ;;  %v4953_v9 = vperm.slane %v4800_v50, 6  ;;  %v1099_v43 = vadd.f32 %v4924_v30, %v967_v7  ;;  %v1381_v17 = vmul.f32 %v4938_v52, %v5621_v12  ;;  %v5765_v7 = vld [vmem:[#allocation16_spill] sm:$0xff] }
 0x15a   : > { %v1893_v25 = vmul.f32 %v2654_v34, %v4895_v2  ;;  %v1001_v59 = vadd.f32 %v985_v54, %v869_v8  ;;  %v1268_v47 = vmul.f32 %v5762_v20, %v4946_v13  ;;  %v4968_v32 = vperm.slane %v4800_v50, 7 }
 0x15b   : > { %v1152_v16 = vadd.f32 %v1136_v27, %v1020_v21  ;;  %v1400_v35 = vmul.f32 %v5763_v62, %v4953_v9  ;;  %v4970_v38 = vpop.eup %2655  ;;  %vm1898_vm10 = vweird.f32 %v2654_v34  ;;  %v1231_v12 = vadd.f32 %v4929_v40, %v1099_v43  ;;  %v5770_v43 = vld [vmem:[#allocation18_spill] sm:$0xff]  ;;  %v5787_v40 = vld [vmem:[#allocation32_spill] sm:$0xff] }
 0x15c   : > { %5764 = vst [vmem:[#allocation12_spill] sm:$0xff] %v4970_v38  ;;  %v1894_v54 = vsub.f32 1.0, %v1893_v25  ;;  %v1133_v48 = vadd.f32 %v1117_v24, %v1001_v59  ;;  %v1513_v6 = vmul.f32 %v4970_v38, %v3120_v4  ;;  %v1532_v21 = vmul.f32 %v5765_v7, %v4968_v32  ;;  %v5767_v25 = vld [vmem:[#allocation17_spill] sm:$0xff]  ;;  %vm4986_vm11 = vmor %vm1897_vm8, %vm1898_vm10 }
 0x15d   : > { %v1284_v8 = vadd.f32 %v1268_v47, %v1152_v16  ;;  %v4977_v22 = vperm.slane %v225_v49, 0  ;;  %v4979_v27 = vpop.eup %2657  ;;  %v1363_v62 = vadd.f32 %v4938_v52, %v1231_v12  ;;  %v1664_v24 = vmul.f32 %v5767_v25, %v4960_v45  ;;  %v5771_v25 = vld [vmem:[#allocation19_spill] sm:$0xff] }
 0x15e   : > { %5766 = vst [vmem:[#allocation13_spill] sm:$0xff] %v4979_v27  ;;  %v1895_v50 = vmul.f32 %v2654_v34, %v1894_v54  ;;  %v1265_v20 = vadd.f32 %v1249_v51, %v1133_v48  ;;  %v4992_v47 = vperm.slane %v225_v49, 1  ;;  %v4994_v7 = vperm.slane %v225_v49, 2 }
 0x15f   : > { %v1416_v4 = vadd.f32 %v1400_v35, %v1284_v8  ;;  %v609_v16 = vmul.f32 %v5770_v43, %v4977_v22  ;;  %v1495_v48 = vadd.f32 %v4970_v38, %v1363_v62  ;;  %v4997_v12 = vperm.slane %v225_v49, 3  ;;  %v5772_v35 = vld [vmem:[#allocation20_spill] sm:$0xff]  ;;  %v5786_v38 = vld [vmem:[#allocation30_spill] sm:$0xff] }
 0x160   : > { %v1896_v51 = vadd.f32 %v2654_v34, %v1895_v50  ;;  %v1397_v54 = vadd.f32 %v1381_v17, %v1265_v20  ;;  %v741_v0 = vmul.f32 %v5771_v25, %v4992_v47  ;;  %v873_v8 = vmul.f32 %v5772_v35, %v4994_v7  ;;  %v5774_v25 = vld [vmem:[#allocation21_spill] sm:$0xff] }
 0x161   : > { %v1548_v2 = vadd.f32 %v1532_v21, %v1416_v4  ;;  %v5003_v52 = vperm.slane %v225_v49, 4  ;;  %v1627_v17 = vadd.f32 %v4979_v27, %v1495_v48  ;;  %v1645_v20 = vmul.f32 %v4766_v46, %v4979_v27 }
 0x162   : > { %v1900_v43 = vsel %vm4986_vm11, %v2654_v34, %v1896_v51  ;;  %v1529_v50 = vadd.f32 %v1513_v6, %v1397_v54  ;;  %v757_v4 = vadd.f32 %v741_v0, %v609_v16  ;;  %v1005_v35 = vmul.f32 %v5774_v25, %v4997_v12  ;;  %v5019_v34 = vld [vmem:[%s2887_s21 + $0x38] ss:$0 sm:$0xff] }
 0x163   : > { %v5012_v21 = vsel %vm4940_vm9, %v1904_v28, %v1900_v43  ;;  %v1680_v62 = vadd.f32 %v1664_v24, %v1548_v2  ;;  %2659 = vrcp.f32 %v1627_v17  ;;  %v1915_v6 = vand.u32 2147483647, %v1627_v17  ;;  %v5775_v51 = vld [vmem:[#allocation31_spill] sm:$0xff] }
 0x164   : > { %5773 = vst [vmem:[#allocation15_spill] sm:$0xff] %v5012_v21  ;;  %v1934_v59 = vmul.f32 %v5012_v21, %v4919_v53  ;;  %v889_v46 = vadd.f32 %v873_v8, %v757_v4  ;;  %v1137_v28 = vmul.f32 %v5776_v55, %v5003_v52  ;;  %v1917_v24 = vand.u32 2147483648, %v1627_v17  ;;  %v5777_v43 = vld [vmem:[#allocation27_spill] sm:$0xff]  ;;  %v5779_v4 = vld [vmem:[#allocation26_spill] sm:$0xff] }
 0x165   : > { %v1952_v54 = vmul.f32 %v5775_v51, %v1680_v62  ;;  %v5025_v48 = vperm.slane %v225_v49, 5  ;;  %v5027_v0 = vperm.slane %v225_v49, 6  ;;  %v5029_v16 = vperm.slane %v225_v49, 7  ;;  %v5778_v8 = vld [vmem:[#allocation23_spill] sm:$0xff]  ;;  %v5780_v51 = vld [vmem:[#allocation28_spill] sm:$0xff] }
 0x166   : > { %1950 = vst [vmem:[%s3307_s29 + $0x70] sm:$0xff] %v1934_v59  ;;  %v1661_v2 = vadd.f32 %v1645_v20, %v1529_v50  ;;  %v1021_v53 = vadd.f32 %v1005_v35, %v889_v46  ;;  %v610_v25 = vmul.f32 %v5777_v43, %v4814_v15  ;;  %vm1911_vm12 = vweird.f32 %v1627_v17  ;;  %v5783_v50 = vld [vmem:[#allocation24_spill] sm:$0xff]  ;;  %v5784_v35 = vld [vmem:[#allocation29_spill] sm:$0xff] }
 0x167   : > { %2245 = vst [vmem:[%s3307_s29 + $0x80] sm:$0xff] %v1952_v54  ;;  %v1269_v62 = vmul.f32 %v5778_v8, %v5025_v48  ;;  %v1665_v59 = vmul.f32 %v5779_v4, %v5019_v34  ;;  %v742_v55 = vmul.f32 %v5780_v51, %v4817_v14  ;;  %vm5040_vm13 = vcmp.eq.f32.partialorder %v1915_v6, 8.507059e+37  ;;  %v5785_v8 = vld [vmem:[#allocation25_spill] sm:$0xff] }
 0x168   : > { %v1153_v49 = vadd.f32 %v1137_v28, %v1021_v53  ;;  %v1401_v20 = vmul.f32 %v5783_v50, %v5027_v0  ;;  %v874_v54 = vmul.f32 %v5784_v35, %v4856_v58  ;;  %v1918_v43 = vor.u32 1.1754944e-38, %v1917_v24  ;;  %v5788_v53 = vld [vmem:[#allocation33_spill] sm:$0xff]  ;;  %v5790_v24 = vld [vmem:[#allocation39_spill] sm:$0xff] }
 0x169   : > { %v2660_v46 = vpop.eup %2659  ;;  %v1533_v27 = vmul.f32 %v5785_v8, %v5029_v16  ;;  %v758_v4 = vadd.f32 %v742_v55, %v610_v25  ;;  %v1006_v51 = vmul.f32 %v5786_v38, %v4906_v33  ;;  %v1138_v28 = vmul.f32 %v5787_v40, %v4936_v41  ;;  %v5789_v35 = vld [vmem:[#allocation37_spill] sm:$0xff]  ;;  %v5791_v25 = vld [vmem:[#allocation40_spill] sm:$0xff] }
 0x16a   : > { %v1907_v6 = vmul.f32 %v2660_v46, %v1627_v17  ;;  %v1285_v39 = vadd.f32 %v1269_v62, %v1153_v49  ;;  %v1270_v50 = vmul.f32 %v5788_v53, %v4946_v13  ;;  %v611_v30 = vmul.f32 %v5789_v35, %v4977_v22  ;;  %v5792_v62 = vld [vmem:[#allocation34_spill] sm:$0xff]  ;;  %v5802_v17 = vld [vmem:[#allocation55_spill] sm:$0xff] }
 0x16b   : > { %v890_v56 = vadd.f32 %v874_v54, %v758_v4  ;;  %v743_v37 = vmul.f32 %v5790_v24, %v4992_v47  ;;  %v875_v55 = vmul.f32 %v5791_v25, %v4994_v7  ;;  %vm1912_vm14 = vweird.f32 %v2660_v46  ;;  %v5794_v4 = vld [vmem:[#allocation41_spill] sm:$0xff]  ;;  %v5795_v24 = vld [vmem:[#allocation36_spill] sm:$0xff] }
 0x16c   : > { %v1908_v8 = vsub.f32 1.0, %v1907_v6  ;;  %v1417_v38 = vadd.f32 %v1401_v20, %v1285_v39  ;;  %v1402_v49 = vmul.f32 %v5792_v62, %v4953_v9  ;;  %v1534_v53 = vmul.f32 %v5793_v26, %v4968_v32  ;;  %v5796_v6 = vld [vmem:[#allocation43_spill] sm:$0xff]  ;;  %vm5073_vm15 = vmor %vm1911_vm12, %vm1912_vm14 }
 0x16d   : > { %v1022_v40 = vadd.f32 %v1006_v51, %v890_v56  ;;  %v759_v54 = vadd.f32 %v743_v37, %v611_v30  ;;  %v1007_v35 = vmul.f32 %v5794_v4, %v4997_v12  ;;  %v1666_v57 = vmul.f32 %v5795_v24, %v4960_v45  ;;  %v5799_v37 = vld [vmem:[#allocation53_spill] sm:$0xff]  ;;  %v5800_v30 = vld [vmem:[#allocation54_spill] sm:$0xff] }
 0x16e   : > { %v1909_v18 = vmul.f32 %v2660_v46, %v1908_v8  ;;  %v1549_v61 = vadd.f32 %v1533_v27, %v1417_v38  ;;  %v1139_v25 = vmul.f32 %v5796_v6, %v5003_v52  ;;  %v612_v26 = vmul.f32 %v5799_v37, %v4814_v15  ;;  %v5801_v38 = vld [vmem:[#allocation45_spill] sm:$0xff] }
 0x16f   : > { %v1154_v56 = vadd.f32 %v1138_v28, %v1022_v40  ;;  %v891_v20 = vadd.f32 %v875_v55, %v759_v54  ;;  %v744_v51 = vmul.f32 %v5800_v30, %v4817_v14  ;;  %v1271_v62 = vmul.f32 %v5801_v38, %v5025_v48  ;;  %v5803_v28 = vld [vmem:[#allocation56_spill] sm:$0xff]  ;;  %v5804_v54 = vld [vmem:[#allocation38_spill] sm:$0xff] }
 0x170   : > { %v1910_v27 = vadd.f32 %v2660_v46, %v1909_v18  ;;  %v1681_v8 = vadd.f32 %v1665_v59, %v1549_v61  ;;  %v876_v4 = vmul.f32 %v5802_v17, %v4856_v58  ;;  %v1008_v55 = vmul.f32 %v5803_v28, %v4906_v33  ;;  %v5805_v18 = vld [vmem:[#allocation49_spill] sm:$0xff] }
 0x171   : > { %v1286_v24 = vadd.f32 %v1270_v50, %v1154_v56  ;;  %v1023_v6 = vadd.f32 %v1007_v35, %v891_v20  ;;  %v760_v23 = vadd.f32 %v744_v51, %v612_v26  ;;  %v1403_v61 = vmul.f32 %v5805_v18, %v5027_v0  ;;  %v5806_v59 = vld [vmem:[#allocation57_spill] sm:$0xff]  ;;  %v5808_v51 = vld [vmem:[#allocation58_spill] sm:$0xff]  ;;  %v5815_v18 = vld [vmem:[#allocation60_spill] sm:$0xff] }
 0x172   : > { %v1914_v40 = vsel %vm5073_vm15, %v2660_v46, %v1910_v27  ;;  %v1953_v37 = vmul.f32 %v5804_v54, %v1681_v8  ;;  %v1140_v30 = vmul.f32 %v5806_v59, %v4936_v41  ;;  %v5807_v46 = vld [vmem:[#allocation50_spill] sm:$0xff]  ;;  %v1272_v27 = vmul.f32 %v5808_v51, %v4946_v13  ;;  %v5809_v8 = vld [vmem:[#allocation63_spill] sm:$0xff] }
 0x173   : > { %v5096_v50 = vsel %vm5040_vm13, %v1918_v43, %v1914_v40  ;;  %v1418_v35 = vadd.f32 %v1402_v49, %v1286_v24  ;;  %v1155_v56 = vadd.f32 %v1139_v25, %v1023_v6  ;;  %v892_v20 = vadd.f32 %v876_v4, %v760_v23  ;;  %v5810_v43 = vld [vmem:[#allocation64_spill] sm:$0xff]  ;;  %v5811_v23 = vld [vmem:[#allocation51_spill] sm:$0xff]  ;;  %v5813_v24 = vld [vmem:[#allocation65_spill] sm:$0xff] }
 0x174   : > { %v1935_v26 = vmul.f32 %v5096_v50, %v1661_v2  ;;  %2246 = vst [vmem:[%s3307_s29 + $0x88] sm:$0xff] %v1953_v37  ;;  %v1535_v39 = vmul.f32 %v5807_v46, %v5029_v16  ;;  %v613_v38 = vmul.f32 %v5809_v8, %v4977_v22  ;;  %v745_v49 = vmul.f32 %v5810_v43, %v4992_v47  ;;  %v5812_v25 = vld [vmem:[#allocation59_spill] sm:$0xff]  ;;  %v5814_v40 = vld [vmem:[#allocation66_spill] sm:$0xff]  ;;  %v5818_v46 = vld [vmem:[#allocation52_spill] sm:$0xff] }
 0x175   : > { %v1550_v17 = vadd.f32 %v1534_v53, %v1418_v35  ;;  %v1287_v28 = vadd.f32 %v1271_v62, %v1155_v56  ;;  %v1024_v21 = vadd.f32 %v1008_v55, %v892_v20  ;;  %v1667_v2 = vmul.f32 %v5811_v23, %v5019_v34  ;;  %v5816_v35 = vld [vmem:[#allocation67_spill] sm:$0xff]  ;;  %v5817_v20 = vld [vmem:[#allocation70_spill] sm:$0xff] }
 0x176   : > { %1951 = vst [vmem:[%s3307_s29 + $0x78] sm:$0xff] %v1935_v26  ;;  %v1404_v4 = vmul.f32 %v5812_v25, %v4953_v9  ;;  %v877_v6 = vmul.f32 %v5813_v24, %v4994_v7  ;;  %v1009_v54 = vmul.f32 %v5814_v40, %v4997_v12  ;;  %v761_v37 = vadd.f32 %v745_v49, %v613_v38  ;;  %v5819_v25 = vld [vmem:[#allocation62_spill] sm:$0xff]  ;;  %v5821_v38 = vld [vmem:[#allocation71_spill] sm:$0xff] }
 0x177   : > { %v1682_v53 = vadd.f32 %v1666_v57, %v1550_v17  ;;  %v1419_v62 = vadd.f32 %v1403_v61, %v1287_v28  ;;  %v1156_v55 = vadd.f32 %v1140_v30, %v1024_v21  ;;  %v1536_v59 = vmul.f32 %v5815_v18, %v4968_v32  ;;  %v5820_v61 = vld [vmem:[#allocation68_spill] sm:$0xff]  ;;  %v5826_v18 = vld [vmem:[#allocation73_spill] sm:$0xff] }
 0x178   : > { %v1141_v56 = vmul.f32 %v5816_v35, %v5003_v52  ;;  %v614_v26 = vmul.f32 %v5817_v20, %v4814_v15  ;;  %v893_v23 = vadd.f32 %v877_v6, %v761_v37  ;;  %v1668_v57 = vmul.f32 %v5819_v25, %v4960_v45  ;;  %v5822_v28 = vld [vmem:[#allocation72_spill] sm:$0xff]  ;;  %v5824_v6 = vld [vmem:[#allocation14_spill] sm:$0xff]  ;;  %v5827_v20 = vld [vmem:[#allocation61_spill] sm:$0xff] }
 0x179   : > { %v1954_v51 = vmul.f32 %v5818_v46, %v1682_v53  ;;  %v1551_v8 = vadd.f32 %v1535_v39, %v1419_v62  ;;  %v1288_v43 = vadd.f32 %v1272_v27, %v1156_v55  ;;  %v1273_v30 = vmul.f32 %v5820_v61, %v5025_v48  ;;  %v5823_v39 = vld [vmem:[#allocation47_spill] sm:$0xff]  ;;  %v5825_v62 = vld [vmem:[#allocation69_spill] sm:$0xff]  ;;  %v5830_v25 = vld [vmem:[#allocation78_spill] sm:$0xff] }
 0x17a   : > { %v746_v17 = vmul.f32 %v5821_v38, %v4817_v14  ;;  %v878_v21 = vmul.f32 %v5822_v28, %v4856_v58  ;;  %v1025_v40 = vadd.f32 %v1009_v54, %v893_v23  ;;  %v1405_v27 = vmul.f32 %v5823_v39, %v5027_v0  ;;  %v5831_v38 = vld [vmem:[#allocation79_spill] sm:$0xff] }
 0x17b   : > { %2247 = vst [vmem:[%s3307_s29 + $0x90] sm:$0xff] %v1954_v51  ;;  %v1683_v49 = vadd.f32 %v1667_v2, %v1551_v8  ;;  %v1420_v24 = vadd.f32 %v1404_v4, %v1288_v43  ;;  %v1537_v53 = vmul.f32 %v5824_v6, %v5029_v16  ;;  %v1669_v55 = vmul.f32 %v5825_v62, %v5019_v34  ;;  %v5828_v4 = vld [vmem:[#allocation77_spill] sm:$0xff]  ;;  %v5829_v43 = vld [vmem:[#allocation74_spill] sm:$0xff]  ;;  %v5835_v62 = vld [vmem:[#allocation80_spill] sm:$0xff] }
 0x17c   : > { %v762_v37 = vadd.f32 %v746_v17, %v614_v26  ;;  %v1010_v35 = vmul.f32 %v5826_v18, %v4906_v33  ;;  %v1157_v2 = vadd.f32 %v1141_v56, %v1025_v40  ;;  %v615_v54 = vmul.f32 %v5828_v4, %v4977_v22  ;;  %v5834_v40 = vld [vmem:[#allocation44_spill] sm:$0xff]  ;;  %v5836_v18 = vld [vmem:[#allocation75_spill] sm:$0xff] }
 0x17d   : > { %v1955_v46 = vmul.f32 %v5827_v20, %v1683_v49  ;;  %v1552_v51 = vadd.f32 %v1536_v59, %v1420_v24  ;;  %v1142_v23 = vmul.f32 %v5829_v43, %v4936_v41  ;;  %v747_v61 = vmul.f32 %v5830_v25, %v4992_v47  ;;  %v5832_v59 = vld [vmem:[#allocation76_spill] sm:$0xff]  ;;  %v5833_v49 = vld [vmem:[#allocation42_spill] sm:$0xff] }
 0x17e   : > { %v894_v8 = vadd.f32 %v878_v21, %v762_v37  ;;  %v879_v26 = vmul.f32 %v5831_v38, %v4994_v7  ;;  %v1289_v28 = vadd.f32 %v1273_v30, %v1157_v2  ;;  %v1274_v56 = vmul.f32 %v5832_v59, %v4946_v13  ;;  %v5840_v25 = vld [vmem:[#allocation90_spill] sm:$0xff]  ;;  %v5843_v59 = vld [vmem:[#allocation84_spill] sm:$0xff] }
 0x17f   : > { %2248 = vst [vmem:[%s3307_s29 + $0x98] sm:$0xff] %v1955_v46  ;;  %v1684_v17 = vadd.f32 %v1668_v57, %v1552_v51  ;;  %v1406_v24 = vmul.f32 %v5833_v49, %v4953_v9  ;;  %v1538_v39 = vmul.f32 %v5834_v40, %v4968_v32  ;;  %v763_v6 = vadd.f32 %v747_v61, %v615_v54  ;;  %v5837_v57 = vld [vmem:[#allocation81_spill] sm:$0xff]  ;;  %v5838_v51 = vld [vmem:[#allocation88_spill] sm:$0xff]  ;;  %v5841_v38 = vld [vmem:[#allocation46_spill] sm:$0xff] }
 0x180   : > { %v1026_v21 = vadd.f32 %v1010_v35, %v894_v8  ;;  %v1011_v37 = vmul.f32 %v5835_v62, %v4997_v12  ;;  %v1421_v46 = vadd.f32 %v1405_v27, %v1289_v28  ;;  %v1143_v30 = vmul.f32 %v5837_v57, %v5003_v52  ;;  %v5839_v35 = vld [vmem:[#allocation89_spill] sm:$0xff]  ;;  %v5842_v27 = vld [vmem:[#allocation83_spill] sm:$0xff]  ;;  %v5847_v57 = vld [vmem:[#allocation98_spill] sm:$0xff] }
 0x181   : > { %v1956_v20 = vmul.f32 %v5836_v18, %v1684_v17  ;;  %v616_v2 = vmul.f32 %v5838_v51, %v4814_v15  ;;  %v895_v43 = vadd.f32 %v879_v26, %v763_v6  ;;  %v748_v8 = vmul.f32 %v5839_v35, %v4817_v14  ;;  %v5845_v18 = vld [vmem:[#allocation85_spill] sm:$0xff] }
 0x182   : > { %v1158_v4 = vadd.f32 %v1142_v23, %v1026_v21  ;;  %v880_v54 = vmul.f32 %v5840_v25, %v4856_v58  ;;  %v1553_v61 = vadd.f32 %v1537_v53, %v1421_v46  ;;  %v1670_v17 = vmul.f32 %v5841_v38, %v4960_v45  ;;  %v5844_v21 = vld [vmem:[#allocation91_spill] sm:$0xff] }
 0x183   : > { %2249 = vst [vmem:[%s3307_s29 + $0xa0] sm:$0xff] %v1956_v20  ;;  %v1275_v28 = vmul.f32 %v5842_v27, %v5025_v48  ;;  %v1407_v49 = vmul.f32 %v5843_v59, %v5027_v0  ;;  %v1027_v23 = vadd.f32 %v1011_v37, %v895_v43  ;;  %v764_v26 = vadd.f32 %v748_v8, %v616_v2  ;;  %v5846_v20 = vld [vmem:[#allocation92_spill] sm:$0xff]  ;;  %v5852_v27 = vld [vmem:[#allocation101_spill] sm:$0xff] }
 0x184   : > { %v1290_v40 = vadd.f32 %v1274_v56, %v1158_v4  ;;  %v1012_v6 = vmul.f32 %v5844_v21, %v4906_v33  ;;  %v1685_v62 = vadd.f32 %v1669_v55, %v1553_v61  ;;  %v1539_v53 = vmul.f32 %v5845_v18, %v5029_v16  ;;  %v5848_v56 = vld [vmem:[#allocation99_spill] sm:$0xff]  ;;  %v5849_v2 = vld [vmem:[#allocation48_spill] sm:$0xff]  ;;  %v5850_v55 = vld [vmem:[#allocation93_spill] sm:$0xff] }
 0x185   : > { %v1144_v46 = vmul.f32 %v5846_v20, %v4936_v41  ;;  %v617_v51 = vmul.f32 %v5847_v57, %v4977_v22  ;;  %v1159_v25 = vadd.f32 %v1143_v30, %v1027_v23  ;;  %v896_v38 = vadd.f32 %v880_v54, %v764_v26  ;;  %v5851_v8 = vld [vmem:[#allocation100_spill] sm:$0xff]  ;;  %v5853_v30 = vld [vmem:[#allocation86_spill] sm:$0xff]  ;;  %v5855_v26 = vld [vmem:[#allocation95_spill] sm:$0xff] }
 0x186   : > { %v1422_v35 = vadd.f32 %v1406_v24, %v1290_v40  ;;  %v749_v37 = vmul.f32 %v5848_v56, %v4992_v47  ;;  %v1957_v4 = vmul.f32 %v5849_v2, %v1685_v62  ;;  %v1276_v43 = vmul.f32 %v5850_v55, %v4946_v13  ;;  %v5854_v40 = vld [vmem:[#allocation94_spill] sm:$0xff] }
 0x187   : > { %v881_v61 = vmul.f32 %v5851_v8, %v4994_v7  ;;  %v1013_v59 = vmul.f32 %v5852_v27, %v4997_v12  ;;  %v1291_v18 = vadd.f32 %v1275_v28, %v1159_v25  ;;  %v1028_v20 = vadd.f32 %v1012_v6, %v896_v38  ;;  %v5856_v57 = vld [vmem:[#allocation102_spill] sm:$0xff]  ;;  %v5857_v6 = vld [vmem:[#allocation103_spill] sm:$0xff]  ;;  %v5859_v38 = vld [vmem:[#allocation108_spill] sm:$0xff] }
 0x188   : > { %v1554_v21 = vadd.f32 %v1538_v39, %v1422_v35  ;;  %v765_v24 = vadd.f32 %v749_v37, %v617_v51  ;;  %2250 = vst [vmem:[%s3307_s29 + $0xa8] sm:$0xff] %v1957_v4  ;;  %v1671_v54 = vmul.f32 %v5853_v30, %v5019_v34  ;;  %v1408_v23 = vmul.f32 %v5854_v40, %v4953_v9  ;;  %v5858_v35 = vld [vmem:[#allocation107_spill] sm:$0xff]  ;;  %v5860_v4 = vld [vmem:[#allocation109_spill] sm:$0xff] }
 0x189   : > { %v1540_v62 = vmul.f32 %v5855_v26, %v4968_v32  ;;  %v1145_v56 = vmul.f32 %v5856_v57, %v5003_v52  ;;  %v1423_v55 = vadd.f32 %v1407_v49, %v1291_v18  ;;  %v1160_v39 = vadd.f32 %v1144_v46, %v1028_v20  ;;  %v5861_v27 = vld [vmem:[#allocation87_spill] sm:$0xff]  ;;  %v5862_v49 = vld [vmem:[#allocation96_spill] sm:$0xff] }
 0x18a   : > { %v1686_v2 = vadd.f32 %v1670_v17, %v1554_v21  ;;  %v897_v28 = vadd.f32 %v881_v61, %v765_v24  ;;  %v1277_v51 = vmul.f32 %v5857_v6, %v5025_v48  ;;  %v618_v25 = vmul.f32 %v5858_v35, %v4814_v15  ;;  %v5863_v61 = vld [vmem:[#allocation104_spill] sm:$0xff]  ;;  %v5864_v24 = vld [vmem:[#allocation110_spill] sm:$0xff] }
 0x18b   : > { %v750_v37 = vmul.f32 %v5859_v38, %v4817_v14  ;;  %v882_v8 = vmul.f32 %v5860_v4, %v4856_v58  ;;  %v1555_v40 = vadd.f32 %v1539_v53, %v1423_v55  ;;  %v1292_v17 = vadd.f32 %v1276_v43, %v1160_v39  ;;  %v5867_v39 = vld [vmem:[#allocation118_spill] sm:$0xff] }
 0x18c   : > { %v1958_v30 = vmul.f32 %v5861_v27, %v1686_v2  ;;  %v1029_v21 = vadd.f32 %v1013_v59, %v897_v28  ;;  %v1672_v46 = vmul.f32 %v5862_v49, %v4960_v45  ;;  %v1409_v18 = vmul.f32 %v5863_v61, %v5027_v0  ;;  %v5865_v2 = vld [vmem:[#allocation105_spill] sm:$0xff]  ;;  %v5866_v59 = vld [vmem:[#allocation111_spill] sm:$0xff] }
 0x18d   : > { %v766_v20 = vadd.f32 %v750_v37, %v618_v25  ;;  %v1014_v26 = vmul.f32 %v5864_v24, %v4906_v33  ;;  %v1687_v57 = vadd.f32 %v1671_v54, %v1555_v40  ;;  %v1424_v6 = vadd.f32 %v1408_v23, %v1292_v17  ;;  %v5868_v25 = vld [vmem:[#allocation119_spill] sm:$0xff]  ;;  %v5869_v37 = vld [vmem:[#allocation97_spill] sm:$0xff]  ;;  %v5870_v23 = vld [vmem:[#allocation120_spill] sm:$0xff] }
 0x18e   : > { %2251 = vst [vmem:[%s3307_s29 + $0xb0] sm:$0xff] %v1958_v30  ;;  %v1161_v35 = vadd.f32 %v1145_v56, %v1029_v21  ;;  %v1541_v53 = vmul.f32 %v5865_v2, %v5029_v16  ;;  %v1146_v55 = vmul.f32 %v5866_v59, %v4936_v41  ;;  %v619_v28 = vmul.f32 %v5867_v39, %v4977_v22  ;;  %v5871_v40 = vld [vmem:[#allocation113_spill] sm:$0xff] }
 0x18f   : > { %v898_v43 = vadd.f32 %v882_v8, %v766_v20  ;;  %v751_v38 = vmul.f32 %v5868_v25, %v4992_v47  ;;  %v1959_v4 = vmul.f32 %v5869_v37, %v1687_v57  ;;  %v1556_v27 = vadd.f32 %v1540_v62, %v1424_v6  ;;  %v5872_v20 = vld [vmem:[#allocation106_spill] sm:$0xff] }
 0x190   : > { %v1293_v54 = vadd.f32 %v1277_v51, %v1161_v35  ;;  %v883_v56 = vmul.f32 %v5870_v23, %v4994_v7  ;;  %v1278_v8 = vmul.f32 %v5871_v40, %v4946_v13  ;;  %v1015_v21 = vmul.f32 %v4491_v31, %v4997_v12  ;;  %v5873_v62 = vld [vmem:[#allocation114_spill] sm:$0xff] }
 0x191   : > { %v1030_v30 = vadd.f32 %v1014_v26, %v898_v43  ;;  %v767_v17 = vadd.f32 %v751_v38, %v619_v28  ;;  %2252 = vst [vmem:[%s3307_s29 + $0xb8] sm:$0xff] %v1959_v4  ;;  %v1688_v49 = vadd.f32 %v1672_v46, %v1556_v27  ;;  %v1673_v24 = vmul.f32 %v5872_v20, %v5019_v34  ;;  %v5874_v26 = vld [vmem:[#allocation115_spill] sm:$0xff]  ;;  %v5875_v43 = vld [vmem:[#allocation112_spill] sm:$0xff] }
 0x192   : > { %v1425_v61 = vadd.f32 %v1409_v18, %v1293_v54  ;;  %v1410_v51 = vmul.f32 %v5873_v62, %v4953_v9  ;;  %v1542_v6 = vmul.f32 %v5874_v26, %v4968_v32  ;;  %v1147_v2 = vmul.f32 %v4501_v60, %v5003_v52  ;;  %v5876_v60 = vld [vmem:[#allocation82_spill] sm:$0xff]  ;;  %v5877_v54 = vld [vmem:[#allocation117_spill] sm:$0xff]  ;;  %v5881_v20 = vld [vmem:[#allocation123_spill] sm:$0xff] }
 0x193   : > { %v1162_v57 = vadd.f32 %v1146_v55, %v1030_v30  ;;  %v899_v35 = vadd.f32 %v883_v56, %v767_v17  ;;  %v1960_v31 = vmul.f32 %v5875_v43, %v1688_v49  ;;  %v620_v46 = vmul.f32 %v4557_v5, %v4814_v15 }
 0x194   : > { %v1557_v59 = vadd.f32 %v1541_v53, %v1425_v61  ;;  %v752_v18 = vmul.f32 %v4570_v10, %v4817_v14  ;;  %v1279_v55 = vmul.f32 %v4506_v44, %v5025_v48  ;;  %v884_v25 = vmul.f32 %v4576_v63, %v4856_v58 }
 0x195   : > { %v1294_v39 = vadd.f32 %v1278_v8, %v1162_v57  ;;  %v1031_v28 = vadd.f32 %v1015_v21, %v899_v35  ;;  %2253 = vst [vmem:[%s3307_s29 + $0xc0] sm:$0xff] %v1960_v31  ;;  %v1674_v53 = vmul.f32 %v5876_v60, %v4960_v45  ;;  %v1016_v5 = vmul.f32 %v4593_v36, %v4906_v33  ;;  %v5878_v36 = vld [vmem:[#allocation127_spill] sm:$0xff]  ;;  %v5879_v21 = vld [vmem:[#allocation128_spill] sm:$0xff]  ;;  %v5888_v60 = vld [vmem:[#allocation125_spill] sm:$0xff] }
 0x196   : > { %v1689_v38 = vadd.f32 %v1673_v24, %v1557_v59  ;;  %v768_v37 = vadd.f32 %v752_v18, %v620_v46  ;;  %v1411_v27 = vmul.f32 %v4518_v3, %v5027_v0  ;;  %v1543_v44 = vmul.f32 %v4521_v29, %v5029_v16  ;;  %v5880_v29 = vld [vmem:[#allocation121_spill] sm:$0xff]  ;;  %v5885_v31 = vld [vmem:[#allocation136_spill] sm:$0xff]  ;;  %v5886_v46 = vld [vmem:[#allocation122_spill] sm:$0xff] }
 0x197   : > { %v1426_v4 = vadd.f32 %v1410_v51, %v1294_v39  ;;  %v1163_v10 = vadd.f32 %v1147_v2, %v1031_v28  ;;  %v1148_v56 = vmul.f32 %v4602_v1, %v4936_v41  ;;  %v621_v30 = vmul.f32 %v4639_v19, %v4977_v22  ;;  %v5882_v51 = vld [vmem:[#allocation129_spill] sm:$0xff]  ;;  %v5884_v2 = vld [vmem:[#allocation130_spill] sm:$0xff] }
 0x198   : > { %v1961_v63 = vmul.f32 %v5877_v54, %v1689_v38  ;;  %v900_v23 = vadd.f32 %v884_v25, %v768_v37  ;;  %v753_v17 = vmul.f32 %v5878_v36, %v4992_v47  ;;  %v885_v3 = vmul.f32 %v5879_v21, %v4994_v7  ;;  %v5889_v37 = vld [vmem:[#allocation132_spill] sm:$0xff]  ;;  %v5894_v21 = vld [vmem:[#allocation142_spill] sm:$0xff] }
 0x199   : > { %v1558_v40 = vadd.f32 %v1542_v6, %v1426_v4  ;;  %v1295_v8 = vadd.f32 %v1279_v55, %v1163_v10  ;;  %v1675_v49 = vmul.f32 %v5880_v29, %v5019_v34  ;;  %v1280_v24 = vmul.f32 %v5881_v20, %v4946_v13  ;;  %v5883_v6 = vld [vmem:[#allocation124_spill] sm:$0xff]  ;;  %v5887_v55 = vld [vmem:[#allocation137_spill] sm:$0xff]  ;;  %v5890_v4 = vld [vmem:[#allocation138_spill] sm:$0xff] }
 0x19a   : > { %2254 = vst [vmem:[%s3307_s29 + $0xc8] sm:$0xff] %v1961_v63  ;;  %v1032_v61 = vadd.f32 %v1016_v5, %v900_v23  ;;  %v769_v19 = vadd.f32 %v753_v17, %v621_v30  ;;  %v1017_v57 = vmul.f32 %v5882_v51, %v4997_v12  ;;  %v1412_v35 = vmul.f32 %v5883_v6, %v4953_v9 }
 0x19b   : > { %v1690_v1 = vadd.f32 %v1674_v53, %v1558_v40  ;;  %v1427_v62 = vadd.f32 %v1411_v27, %v1295_v8  ;;  %v1149_v43 = vmul.f32 %v5884_v2, %v5003_v52  ;;  %v622_v59 = vmul.f32 %v5885_v31, %v4814_v15  ;;  %v5893_v8 = vld [vmem:[#allocation131_spill] sm:$0xff] }
 0x19c   : > { %v1164_v26 = vadd.f32 %v1148_v56, %v1032_v61  ;;  %v901_v28 = vadd.f32 %v885_v3, %v769_v19  ;;  %v754_v25 = vmul.f32 %v5887_v55, %v4817_v14  ;;  %v1544_v53 = vmul.f32 %v5888_v60, %v4968_v32  ;;  %v5891_v14 = vld [vmem:[#allocation126_spill] sm:$0xff]  ;;  %v5892_v56 = vld [vmem:[#allocation133_spill] sm:$0xff] }
 0x19d   : > { %v1962_v18 = vmul.f32 %v5886_v46, %v1690_v1  ;;  %v1559_v39 = vadd.f32 %v1543_v44, %v1427_v62  ;;  %v1281_v5 = vmul.f32 %v5889_v37, %v5025_v48  ;;  %v886_v10 = vmul.f32 %v5890_v4, %v4856_v58  ;;  %v5903_v46 = vld [vmem:[#allocation145_spill] sm:$0xff] }
 0x19e   : > { %v1296_v38 = vadd.f32 %v1280_v24, %v1164_v26  ;;  %v1033_v27 = vadd.f32 %v1017_v57, %v901_v28  ;;  %v770_v54 = vadd.f32 %v754_v25, %v622_v59  ;;  %v1018_v44 = vmul.f32 %v4828_v42, %v4906_v33  ;;  %v5895_v42 = vld [vmem:[#allocation10_spill] sm:$0xff] }
 0x19f   : > { %2255 = vst [vmem:[%s3307_s29 + $0xd0] sm:$0xff] %v1962_v18  ;;  %v1691_v15 = vadd.f32 %v1675_v49, %v1559_v39  ;;  %v1676_v23 = vmul.f32 %v5891_v14, %v4960_v45  ;;  %v1413_v30 = vmul.f32 %v5892_v56, %v5027_v0  ;;  %v1150_v40 = vmul.f32 %v4833_v11, %v4936_v41  ;;  %v5896_v49 = vld [vmem:[#allocation143_spill] sm:$0xff]  ;;  %v5897_v24 = vld [vmem:[#allocation134_spill] sm:$0xff] }
 0x1a0   : > { %v1428_v63 = vadd.f32 %v1412_v35, %v1296_v38  ;;  %v1165_v36 = vadd.f32 %v1149_v43, %v1033_v27  ;;  %v902_v17 = vadd.f32 %v886_v10, %v770_v54  ;;  %v623_v3 = vmul.f32 %v5894_v21, %v4977_v22  ;;  %v5898_v41 = vld [vmem:[#allocation139_spill] sm:$0xff]  ;;  %v5899_v22 = vld [vmem:[#allocation144_spill] sm:$0xff]  ;;  %v5905_v25 = vld [vmem:[#allocation146_spill] sm:$0xff] }
 0x1a1   : > { %v1963_v58 = vmul.f32 %v5893_v8, %v1691_v15  ;;  %v755_v33 = vmul.f32 %v5895_v42, %v4992_v47  ;;  %v887_v61 = vmul.f32 %v5896_v49, %v4994_v7  ;;  %v1545_v1 = vmul.f32 %v5897_v24, %v5029_v16  ;;  %v5900_v47 = vld [vmem:[#allocation135_spill] sm:$0xff]  ;;  %v5901_v35 = vld [vmem:[#allocation8_spill] sm:$0xff]  ;;  %v5908_v10 = vld [vmem:[#allocation141_spill] sm:$0xff] }
 0x1a2   : > { %v1560_v29 = vadd.f32 %v1544_v53, %v1428_v63  ;;  %v1297_v20 = vadd.f32 %v1281_v5, %v1165_v36  ;;  %v1034_v11 = vadd.f32 %v1018_v44, %v902_v17  ;;  %v1282_v62 = vmul.f32 %v5898_v41, %v4946_v13  ;;  %v5902_v43 = vld [vmem:[#allocation116_spill] sm:$0xff]  ;;  %v5910_v63 = vld [vmem:[#allocation13_spill] sm:$0xff]  ;;  %v5911_v14 = vld [vmem:[#allocation15_spill] sm:$0xff] }
 0x1a3   : > { %2256 = vst [vmem:[%s3307_s29 + $0xd8] sm:$0xff] %v1963_v58  ;;  %v771_v51 = vadd.f32 %v755_v33, %v623_v3  ;;  %v1019_v57 = vmul.f32 %v5899_v22, %v4997_v12  ;;  %v1677_v6 = vmul.f32 %v5900_v47, %v5019_v34  ;;  %v1414_v2 = vmul.f32 %v5901_v35, %v4953_v9  ;;  %v5904_v12 = vld [vmem:[#allocation9_spill] sm:$0xff]  ;;  %v5906_v9 = vld [vmem:[#allocation140_spill] sm:$0xff] }
 0x1a4   : > { %v1692_v19 = vadd.f32 %v1676_v23, %v1560_v29  ;;  %v1429_v26 = vadd.f32 %v1413_v30, %v1297_v20  ;;  %v1166_v7 = vadd.f32 %v1150_v40, %v1034_v11  ;;  %v1151_v13 = vmul.f32 %v5903_v46, %v5003_v52  ;;  %v5907_v52 = vld [vmem:[#allocation11_spill] sm:$0xff]  ;;  %v5909_v54 = vld [vmem:[#allocation12_spill] sm:$0xff] }
 0x1a5   : > { %v903_v59 = vadd.f32 %v887_v61, %v771_v51  ;;  %v1546_v28 = vmul.f32 %v5904_v12, %v4968_v32  ;;  %v1283_v38 = vmul.f32 %v5905_v25, %v5025_v48  ;;  %v1678_v37 = vmul.f32 %v5906_v9, %v4960_v45 }
 0x1a6   : > { %v1964_v31 = vmul.f32 %v5902_v43, %v1692_v19  ;;  %v1561_v18 = vadd.f32 %v1545_v1, %v1429_v26  ;;  %v1298_v39 = vadd.f32 %v1282_v62, %v1166_v7  ;;  %v1415_v4 = vmul.f32 %v5907_v52, %v5027_v0 }
 0x1a7   : > { %v1035_v55 = vadd.f32 %v1019_v57, %v903_v59  ;;  %v1547_v48 = vmul.f32 %v5909_v54, %v5029_v16  ;;  %v1679_v0 = vmul.f32 %v5910_v63, %v5019_v34 }
 0x1a8   : > { %2257 = vst [vmem:[%s3307_s29 + $0xe0] sm:$0xff] %v1964_v31  ;;  %v1693_v60 = vadd.f32 %v1677_v6, %v1561_v18  ;;  %v1430_v53 = vadd.f32 %v1414_v2, %v1298_v39 }
 0x1a9   : > { %v1167_v5 = vadd.f32 %v1151_v13, %v1035_v55 }
 0x1aa   : > { %v1965_v15 = vmul.f32 %v5908_v10, %v1693_v60  ;;  %v1562_v32 = vadd.f32 %v1546_v28, %v1430_v53 }
 0x1ab   : > { %v1299_v27 = vadd.f32 %v1283_v38, %v1167_v5 }
 0x1ac   : > { %2258 = vst [vmem:[%s3307_s29 + $0xe8] sm:$0xff] %v1965_v15  ;;  %v1694_v44 = vadd.f32 %v1678_v37, %v1562_v32 }
 0x1ad   : > { %v1431_v45 = vadd.f32 %v1415_v4, %v1299_v27 }
 0x1ae   : > { %v1966_v23 = vmul.f32 %v5911_v14, %v1694_v44 }
 0x1af   : > { %v1563_v56 = vadd.f32 %v1547_v48, %v1431_v45 }
 0x1b0   : > { %2259 = vst [vmem:[%s3307_s29 + $0xf0] sm:$0xff] %v1966_v23 }
 0x1b1   : > { %v1695_v30 = vadd.f32 %v1679_v0, %v1563_v56 }
 0x1b3   : > { %v1967_v16 = vmul.f32 %v5096_v50, %v1695_v30 }
 0x1b5   : > { %2260 = vst [vmem:[%s3307_s29 + $0xf8] sm:$0xff] %v1967_v16 }
 0x1b6   : > { %2722 = shalt.err (!%p2719_p0)
}
 0x1b7   : > { %s2781_s15 = smov 256   ;;  %s2782_s27 = smov 16  }
 0x1b8   : > { %2273 = dma.vmem_to_hbm [thread:$0]  (%p2849_p9), %s2001_s12, 4096, %s2003_s6, %s1986_s7, %s2781_s15, %s2781_s15, %s2782_s27  }
 0x1b9 PF: > { %s2017_s21 = sand.u32 1, %s2757_s9   ;;  %p2280_p1 = pnand %p2111_p12, %p2856_p11 }
 0x1ba   : > { %s2018_s28 = scalar_lea.sflag [#allocation4], %s2017_s21 }
 0x1bb   : > { %p2281_p2 = pneg %p2280_p1 }
 0x1bd   : > { %2752 = dma.done.wait (%p2281_p2), %s2018_s28, 4096  }
 0x1be   : > { %2754 = vsyncadd (%p2281_p2), %s2018_s28, 4294963200  ;;  %s18_s14 = sadd.s32 1, %s2777_s14   ;;  %s5912_s9 = smov %s2761_s10 }
 0x1bf   : > { %p15_p3 = scmp.ge.s32.totalorder %s18_s14, 4   ;;  %s5913_s10 = smov %s2765_s11 }
 0x1c0   : > { %s5914_s11 = smov %s2854_s23  ;;  %s5915_s12 = smov %s2773_s13 }
 0x1c1   : > { %s5916_s13 = smov %s5918_s17  ;;  %17 = sbr.rel (!%p15_p3) target bundleno = 6 (0x6), region = 85 }
 0x1c6   :  { %2024 = vsyncpa [#allocation3], 1 }
 0x1c7   :  { %2026 = vsyncpa [#allocation3 + $0x1], 1 }
 0x1c8   :  { %2027 = vsyncpa [#allocation4], 1 }
 0x1c9   :  { %2029 = vsyncpa [#allocation4 + $0x1], 1 }

</bundles_post_ra>
